<compile_context>
chip_gen: v7x
topology: tpu7x:2x2x1
jax: 0.10.0
libtpu: 0.0.40
codegen_flags: <defaults>
</compile_context>

<pallas_src>
import numpy as np
import jax
import jax.numpy as jnp
from jax import lax
from jax.experimental import pallas as pl
from jax.experimental.pallas import tpu as pltpu


# Set to jnp.bfloat16 on v6e/v7x for MXU throughput (accumulation stays f32).
MATMUL_DTYPE = jnp.float32


def _mm(a, b):
    return jnp.dot(a.astype(MATMUL_DTYPE), b.astype(MATMUL_DTYPE),
                   preferred_element_type=jnp.float32)


def _vmem():
    return pl.BlockSpec(memory_space=pltpu.MemorySpace.VMEM)


# ----------------------------------------------------------------------------
# Kernels
# ----------------------------------------------------------------------------

def embed_contract_kernel(y_ref, we_ref, be_ref, wc_ref, bc_ref, o_ref):
    """Fused performance_embedding_layer + performance_contractor.

    contracted = (mask_y * (y @ We + be)) @ Wc_perf + bc, zeroed where the
    embedded row is all-zero.  Wc_perf is the performance-column block of the
    contractor weight (the score block always multiplies zeros in this module).
    """
    y = y_ref[...]
    ey = _mm(y, we_ref[...]) + be_ref[...]
    # (y == 0).all(-1)  (differs only for inf/NaN inputs)
    y_zero = jnp.sum(jnp.abs(y), axis=-1, keepdims=True) == 0.0
    ey = jnp.where(y_zero, 0.0, ey)

    ct = _mm(ey, wc_ref[...]) + bc_ref[...]
    ey_zero = jnp.sum(jnp.abs(ey), axis=-1, keepdims=True) == 0.0
    o_ref[...] = jnp.where(ey_zero, 0.0, ct)


def _bilstm_layer(x_val, wi, whf, whb, b, gin_ref, hf_ref, hb_ref):
    """One bidirectional LSTM layer over time-major input.

    x_val: (S, N, Din) value.  wi: (Din, 8H) = [Wi_f^T | Wi_b^T],
    b: (1, 8H) = [b_f | b_b], whf/whb: (H, 4H).
    Writes per-step hidden states into hf_ref / hb_ref (each (S, N, H)).
    """
    S, N, _ = x_val.shape
    H = whf.shape[0]

    # Hoisted input projection for both directions: one big matmul.
    gin = _mm(x_val.reshape(S * N, x_val.shape[-1]), wi) + b
    gin_ref[...] = gin.reshape(S, N, 8 * H)

    def cell(pre, h, c, wh):
        g = pre + _mm(h, wh)
        i = jax.nn.sigmoid(g[:, 0 * H:1 * H])
        f = jax.nn.sigmoid(g[:, 1 * H:2 * H])
        gg = jnp.tanh(g[:, 2 * H:3 * H])
        o = jax.nn.sigmoid(g[:, 3 * H:4 * H])
        c = f * c + i * gg
        return o * jnp.tanh(c), c

    zeros = jnp.zeros((N, H), jnp.float32)

    def body(t, carry):
        hf, cf, hb, cb = carry
        hf, cf = cell(gin_ref[t][:, 0:4 * H], hf, cf, whf)
        hf_ref[t] = hf
        tb = S - 1 - t
        hb, cb = cell(gin_ref[tb][:, 4 * H:8 * H], hb, cb, whb)
        hb_ref[tb] = hb
        return (hf, cf, hb, cb)

    lax.fori_loop(0, S, body, (zeros, zeros, zeros, zeros))


def note_bilstm_kernel(x_ref, wi_ref, whf_ref, whb_ref, b_ref, o_ref,
                       gin_ref, hf_ref, hb_ref):
    """performance_note_encoder: single bidirectional LSTM, time-major I/O."""
    H = whf_ref.shape[0]
    _bilstm_layer(x_ref[...], wi_ref[...], whf_ref[...], whb_ref[...], b_ref[...],
                  gin_ref, hf_ref, hb_ref)
    # Two block stores instead of 2*T per-timestep masked stores.
    o_ref[:, :, 0:H] = hf_ref[...]
    o_ref[:, :, H:2 * H] = hb_ref[...]


def measure_attn_kernel(x_ref, seg_ref, aw_ref, ab_ref, cvr_ref, o_ref):
    """make_higher_node(lower_is_note=True) with the attention similarity fused.

    x_ref:   (N, T, size)  note hidden states (batch-first)
    seg_ref: (N, M, T)     0/1 measure-membership masks
    aw_ref/ab_ref: ContextAttention linear (size, size), (1, size)
    cvr_ref: (heads, size) per-head context vectors laid out as full rows
    o_ref:   (N, M, size)
    """
    N, T, size = x_ref.shape
    heads = cvr_ref.shape[0]
    hs = size // heads

    x = x_ref[...]
    att = jnp.tanh(_mm(x.reshape(N * T, size), aw_ref[...]) + ab_ref[...])
    att3 = att.reshape(N, T, size)
    seg = seg_ref[...]

    for h in range(heads):                      # heads is small and static
        cv_h = cvr_ref[h:h + 1, :]              # (1, size)
        sim_h = jnp.sum(att3 * cv_h, axis=-1)   # (N, T)
        logits = jnp.where(seg > 0.5, sim_h[:, None, :], -1e30)   # (N, M, T)
        mx = jnp.max(logits, axis=-1, keepdims=True)
        e = jnp.exp(logits - mx) * seg
        den = jnp.sum(e, axis=-1, keepdims=True)
        den = jnp.where(den == 0.0, 1.0, den)   # guard empty (padded) measures
        w = e * pl.reciprocal(den, approx=True)                   # (N, M, T)
        out_h = jnp.einsum('nmt,ntd->nmd', w, x[:, :, h * hs:(h + 1) * hs],
                           preferred_element_type=jnp.float32)    # (N, M, hs)
        o_ref[:, :, h * hs:(h + 1) * hs] = out_h


def perf_tail_kernel(x_ref, wi_ref, whf_ref, whb_ref, b_ref,
                     aw_ref, ab_ref, acv_ref, o_ref,
                     gin_ref, hf_ref, hb_ref, cat_ref):
    """performance_encoder (multi-layer BiLSTM over measure nodes) fused with
    performance_final_attention (ContextAttention.forward).

    x_ref: (M, N, size) measure nodes, time(measure)-major.
    wi/whf/whb/b: per-layer stacked LSTM weights (L, ...).
    o_ref: (N, size)
    """
    M, N, size = x_ref.shape
    L = wi_ref.shape[0]
    H = whf_ref.shape[1]
    heads = acv_ref.shape[1]
    hs = size // heads

    for l in range(L):                          # static, small layer count
        x_in = x_ref[...] if l == 0 else cat_ref[...]
        _bilstm_layer(x_in, wi_ref[l], whf_ref[l], whb_ref[l], b_ref[l],
                      gin_ref, hf_ref, hb_ref)
        cat_ref[:, :, 0:H] = hf_ref[...]
        cat_ref[:, :, H:2 * H] = hb_ref[...]

    enc = cat_ref[...]                          # (M, N, size)

    # Fused ContextAttention.forward
    att = jnp.tanh(_mm(enc.reshape(M * N, size), aw_ref[...]) + ab_ref[...])
    sim = _mm(att, acv_ref[...]).reshape(M, N, heads)
    rowsum = jnp.sum(enc, axis=-1, keepdims=True)          # (M, N, 1)
    sim = jnp.where(rowsum == 0.0, -1e10, sim)
    mx = jnp.max(sim, axis=0, keepdims=True)
    e = jnp.exp(sim - mx)
    den = jnp.sum(e, axis=0, keepdims=True)
    wgt = e * pl.reciprocal(den, approx=True)               # (M, N, heads)

    for h in range(heads):
        w_h = wgt[:, :, h:h + 1]                             # (M, N, 1)
        pooled = jnp.sum(w_h * enc[:, :, h * hs:(h + 1) * hs], axis=0)  # (N, hs)
        o_ref[:, h * hs:(h + 1) * hs] = pooled


# ----------------------------------------------------------------------------
# pallas_call wrappers
# ----------------------------------------------------------------------------

def embed_contract(y2d, p):
    """y2d: (R, Cy) flattened rows -> (R, ENC), row-tiled parallel grid."""
    R, Cy = y2d.shape
    E = p['we'].shape[1]
    C = p['wc'].shape[1]
    blk = R if R <= 1024 else 1024
    grid = (pl.cdiv(R, blk),)
    return pl.pallas_call(
        embed_contract_kernel,
        out_shape=jax.ShapeDtypeStruct((R, C), jnp.float32),
        grid=grid,
        in_specs=[pl.BlockSpec((blk, Cy), lambda i: (i, 0)),
                  pl.BlockSpec((Cy, E), lambda i: (0, 0)),
                  pl.BlockSpec((1, E), lambda i: (0, 0)),
                  pl.BlockSpec((E, C), lambda i: (0, 0)),
                  pl.BlockSpec((1, C), lambda i: (0, 0))],
        out_specs=pl.BlockSpec((blk, C), lambda i: (i, 0)),
        compiler_params=pltpu.CompilerParams(
            dimension_semantics=("parallel",),
            vmem_limit_bytes=32 * 1024 * 1024),
    )(y2d, p['we'], p['be'], p['wc'], p['bc'])


def note_bilstm(x_tm, p):
    """x_tm: (T, N, Din) time-major -> (T, N, 2H) time-major."""
    T, N, _ = x_tm.shape
    H = p['whf'].shape[0]
    return pl.pallas_call(
        note_bilstm_kernel,
        out_shape=jax.ShapeDtypeStruct((T, N, 2 * H), jnp.float32),
        in_specs=[_vmem()] * 5,
        out_specs=_vmem(),
        scratch_shapes=[pltpu.VMEM((T, N, 8 * H), jnp.float32),
                        pltpu.VMEM((T, N, H), jnp.float32),
                        pltpu.VMEM((T, N, H), jnp.float32)],
        compiler_params=pltpu.CompilerParams(
            vmem_limit_bytes=48 * 1024 * 1024),
    )(x_tm, p['wi'], p['whf'], p['whb'], p['b'])


def measure_pool(x_nb, seg, p):
    """x_nb: (N, T, size), seg: (N, M, T) -> (N, M, size)."""
    N, T, size = x_nb.shape
    M = seg.shape[1]
    return pl.pallas_call(
        measure_attn_kernel,
        out_shape=jax.ShapeDtypeStruct((N, M, size), jnp.float32),
        in_specs=[_vmem()] * 5,
        out_specs=_vmem(),
        compiler_params=pltpu.CompilerParams(
            vmem_limit_bytes=48 * 1024 * 1024),
    )(x_nb, seg, p['w'], p['b'], p['cv_rows'])


def perf_tail(mn_tm, lstm_p, attn_p):
    """mn_tm: (M, N, size) measure nodes -> (N, size) style vector."""
    M, N, size = mn_tm.shape
    H = lstm_p['whf'].shape[1]
    return pl.pallas_call(
        perf_tail_kernel,
        out_shape=jax.ShapeDtypeStruct((N, size), jnp.float32),
        in_specs=[_vmem()] * 8,
        out_specs=_vmem(),
        scratch_shapes=[pltpu.VMEM((M, N, 8 * H), jnp.float32),
                        pltpu.VMEM((M, N, H), jnp.float32),
                        pltpu.VMEM((M, N, H), jnp.float32),
                        pltpu.VMEM((M, N, 2 * H), jnp.float32)],
        compiler_params=pltpu.CompilerParams(
            vmem_limit_bytes=48 * 1024 * 1024),
    )(mn_tm, lstm_p['wi'], lstm_p['whf'], lstm_p['whb'], lstm_p['b'],
      attn_p['w'], attn_p['b'], attn_p['cv_mat'])


# ----------------------------------------------------------------------------
# Forward pass
# ----------------------------------------------------------------------------

def forward_impl(kparams, total_note_cat, y, seg_onehot):
    # The score embedding is replaced by zeros in this encoder, so total_note_cat
    # never contributes; the contractor is applied only to the performance block.
    del total_note_cat
    N, T, Cy = y.shape

    # Single small layout change up front: time-major rows so LSTM recurrences
    # index the leading axis.
    y_tm = jnp.transpose(y, (1, 0, 2)).reshape(T * N, Cy)

    contracted = embed_contract(y_tm, kparams['emb_ctr'])             # (T*N, ENC)
    ENC = contracted.shape[-1]

    note_hidden = note_bilstm(contracted.reshape(T, N, ENC),
                              kparams['note_lstm'])                   # (T, N, 2H)

    # TODO(synk): these two tiny batch-first/time-major relayouts could be
    # folded into the kernels once Mosaic supports the required transposes.
    note_hidden_nb = jnp.transpose(note_hidden, (1, 0, 2))            # (N, T, 2H)
    measure_nodes = measure_pool(note_hidden_nb, seg_onehot,
                                 kparams['meas_attn'])                # (N, M, 2H)

    mn_tm = jnp.transpose(measure_nodes, (1, 0, 2))                   # (M, N, 2H)
    perform_style_vector = perf_tail(mn_tm, kparams['perf_lstm'],
                                     kparams['final_attn'])           # (N, 2H)
    return perform_style_vector


forward = jax.jit(forward_impl)


# ----------------------------------------------------------------------------
# Pure-JAX reference (original parameter layout) for correctness checking
# ----------------------------------------------------------------------------

def _ref_mlinear(x, p):
    out = jnp.dot(x, p['w'], precision=lax.Precision.HIGHEST) + p['b']
    zero = jnp.all(x == 0, axis=-1, keepdims=True)
    return jnp.where(zero, 0.0, out)


def _ref_bilstm(x, p):
    N, T, _ = x.shape
    H = p['whf'].shape[0]

    def run(wi, wh, b, reverse):
        h = jnp.zeros((N, H), jnp.float32)
        c = jnp.zeros((N, H), jnp.float32)
        outs = []
        order = range(T - 1, -1, -1) if reverse else range(T)
        for t in order:
            g = x[:, t, :] @ wi + h @ wh + b
            i = jax.nn.sigmoid(g[:, :H])
            f = jax.nn.sigmoid(g[:, H:2 * H])
            gg = jnp.tanh(g[:, 2 * H:3 * H])
            o = jax.nn.sigmoid(g[:, 3 * H:])
            c = f * c + i * gg
            h = o * jnp.tanh(c)
            outs.append(h)
        if reverse:
            outs = outs[::-1]
        return jnp.stack(outs, axis=1)

    return jnp.concatenate(
        [run(p['wif'], p['whf'], p['bf'], False),
         run(p['wib'], p['whb'], p['bb'], True)], axis=-1)


def _ref_attn_sim(x, p):
    att = jnp.tanh(x @ p['w'] + p['b'])
    return att @ p['cv_mat']


def _ref_measure_nodes(x, sim, seg):
    N, T, size = x.shape
    heads = sim.shape[-1]
    hs = size // heads
    M = seg.shape[1]
    out = jnp.zeros((N, M, size), jnp.float32)
    for n in range(N):
        for m in range(M):
            mask = seg[n, m] > 0.5
            for h in range(heads):
                s = jnp.where(mask, sim[n, :, h], -jnp.inf)
                w = jax.nn.softmax(s)
                w = jnp.where(mask, w, 0.0)
                out = out.at[n, m, h * hs:(h + 1) * hs].set(
                    w @ x[n, :, h * hs:(h + 1) * hs])
    return out


def _ref_final_pool(x, sim):
    N, M, size = x.shape
    heads = sim.shape[-1]
    hs = size // heads
    rowzero = jnp.sum(x, axis=-1) == 0
    sim = jnp.where(rowzero[..., None], -1e10, sim)
    w = jax.nn.softmax(sim, axis=1)
    out = jnp.zeros((N, size), jnp.float32)
    for h in range(heads):
        out = out.at[:, h * hs:(h + 1) * hs].set(
            jnp.einsum('nm,nmk->nk', w[:, :, h], x[:, :, h * hs:(h + 1) * hs]))
    return out


def ref_forward(params, total_note_cat, y, seg_onehot):
    ey = _ref_mlinear(y, params['emb'])
    pc = jnp.concatenate([jnp.zeros_like(total_note_cat), ey], axis=-1)
    ct = _ref_mlinear(pc, params['ctr'])
    nh = _ref_bilstm(ct, params['note_lstm'])
    sim = _ref_attn_sim(nh, params['meas_attn'])
    mn = _ref_measure_nodes(nh, sim, seg_onehot)
    enc = mn
    for lp in params['perf_lstm']:
        enc = _ref_bilstm(enc, lp)
    sim2 = _ref_attn_sim(enc, params['final_attn'])
    return _ref_final_pool(enc, sim2)


# ----------------------------------------------------------------------------
# Parameter / input construction
# ----------------------------------------------------------------------------

def dense_init(key, din, dout, scale=0.1):
    kw, kb = jax.random.split(key)
    return {'w': jax.random.normal(kw, (din, dout), jnp.float32) * scale,
            'b': (jax.random.normal(kb, (dout,), jnp.float32) * scale).reshape(1, dout)}


def lstm_init(key, din, h, scale=0.1):
    ks = jax.random.split(key, 8)
    m = lambda k, s: jax.random.normal(k, s, jnp.float32) * scale
    return {
        'wif': m(ks[0], (4 * h, din)).T, 'whf': m(ks[1], (4 * h, h)).T,
        'bf': (m(ks[2], (4 * h,)) + m(ks[3], (4 * h,))).reshape(1, 4 * h),
        'wib': m(ks[4], (4 * h, din)).T, 'whb': m(ks[5], (4 * h, h)).T,
        'bb': (m(ks[6], (4 * h,)) + m(ks[7], (4 * h,))).reshape(1, 4 * h),
    }


def attn_init(key, size, heads, scale=0.1):
    hs = size // heads
    k1, k2, k3 = jax.random.split(key, 3)
    w = jax.random.normal(k1, (size, size), jnp.float32) * scale
    b = (jax.random.normal(k2, (size,), jnp.float32) * scale).reshape(1, size)
    cv = jax.random.uniform(k3, (heads, hs), jnp.float32, minval=-1.0, maxval=1.0)
    cv_mat = jnp.zeros((size, heads), jnp.float32)
    for h in range(heads):
        cv_mat = cv_mat.at[h * hs:(h + 1) * hs, h].set(cv[h])
    return {'w': w, 'b': b, 'cv_mat': cv_mat}


def pack_params(params, score_dim):
    """Repack reference-layout params into the fused kernel layout."""
    def pack_lstm(p):
        return {'wi': jnp.concatenate([p['wif'], p['wib']], axis=1),   # (Din, 8H)
                'whf': p['whf'], 'whb': p['whb'],
                'b': jnp.concatenate([p['bf'], p['bb']], axis=1)}      # (1, 8H)

    perf = [pack_lstm(p) for p in params['perf_lstm']]
    return {
        'emb_ctr': {'we': params['emb']['w'], 'be': params['emb']['b'],
                    # score block of the contractor always multiplies zeros
                    'wc': params['ctr']['w'][score_dim:, :],
                    'bc': params['ctr']['b']},
        'note_lstm': pack_lstm(params['note_lstm']),
        'meas_attn': {'w': params['meas_attn']['w'],
                      'b': params['meas_attn']['b'],
                      'cv_rows': params['meas_attn']['cv_mat'].T},     # (heads, size)
        'perf_lstm': {'wi': jnp.stack([p['wi'] for p in perf]),
                      'whf': jnp.stack([p['whf'] for p in perf]),
                      'whb': jnp.stack([p['whb'] for p in perf]),
                      'b': jnp.stack([p['b'] for p in perf])},
        'final_attn': {'w': params['final_attn']['w'],
                       'b': params['final_attn']['b'],
                       'cv_mat': params['final_attn']['cv_mat']},
    }


def build_segment_onehot(measure_numbers):
    mn = np.asarray(measure_numbers)
    N, T = mn.shape
    change = np.concatenate(
        [np.zeros((N, 1), np.int32), (mn[:, 1:] != mn[:, :-1]).astype(np.int32)], axis=1)
    seg_id = np.cumsum(change, axis=1)
    counts = seg_id.max(axis=1) + 1
    # TODO(synk): ragged per-batch measure counts (pad_sequence padding) not modeled.
    assert np.all(counts == counts[0]), "all batch items must have the same measure count"
    M = int(counts[0])
    return (seg_id[:, None, :] == np.arange(M)[None, :, None]).astype(np.float32)


# ----------------------------------------------------------------------------
# main
# ----------------------------------------------------------------------------

if __name__ == "__main__":
    N, T = 2, 8
    OUTPUT_SIZE = 8        # net_params.output_size (raw performance feature dim)
    PERF_EMB = 16          # performance_embedding_size
    SCORE_DIM = 16         # total_note_cat channel dim
    ENC_SIZE = 16          # encoder_size
    ENC_LAYERS = 2         # encoder.layer
    HEADS = 4              # num_attention_head  (2*ENC_SIZE divisible by HEADS)
    ENC_INPUT = SCORE_DIM + PERF_EMB   # encoder.input

    key = jax.random.PRNGKey(0)
    k_param, k_data = jax.random.split(key)
    kp = jax.random.split(k_param, 6)
    params = {
        'emb': dense_init(kp[0], OUTPUT_SIZE, PERF_EMB),
        'ctr': dense_init(kp[1], ENC_INPUT, ENC_SIZE),
        'note_lstm': lstm_init(kp[2], ENC_SIZE, ENC_SIZE),
        'meas_attn': attn_init(kp[3], 2 * ENC_SIZE, HEADS),
        'perf_lstm': [lstm_init(k, 2 * ENC_SIZE, ENC_SIZE)
                      for k in jax.random.split(kp[4], ENC_LAYERS)],
        'final_attn': attn_init(kp[5], 2 * ENC_SIZE, HEADS),
    }
    kparams = pack_params(params, SCORE_DIM)

    kd1, kd2 = jax.random.split(k_data)
    y = jax.random.normal(kd1, (N, T, OUTPUT_SIZE), jnp.float32)
    total_note_cat = jax.random.normal(kd2, (N, T, SCORE_DIM), jnp.float32)
    measure_numbers = np.array([[0, 0, 0, 1, 1, 2, 2, 2],
                                [0, 0, 0, 1, 1, 2, 2, 2]], np.int32)
    seg_onehot = jnp.asarray(build_segment_onehot(measure_numbers))

    out = forward(kparams, total_note_cat, y, seg_onehot)
    out = jax.block_until_ready(out)

    assert out.shape == (N, 2 * ENC_SIZE), out.shape
    assert bool(jnp.all(jnp.isfinite(out)))

    ref = ref_forward(params, total_note_cat, y, seg_onehot)
    max_err = float(jnp.max(jnp.abs(out - ref)))
    # Tolerance accommodates pl.reciprocal(approx=True) in the softmax denominators.
    assert max_err < 5e-2, f"kernel/reference mismatch: max abs err = {max_err}"

    print("KERNEL_OK")
</pallas_src>

<mosaic_0001>
module attributes {stable_mosaic.version = 11 : i64} {
  func.func @note_bilstm_kernel(%arg0: memref<8x2x16xf32, #tpu.memory_space<vmem>>, %arg1: memref<16x128xf32, #tpu.memory_space<vmem>>, %arg2: memref<16x64xf32, #tpu.memory_space<vmem>>, %arg3: memref<16x64xf32, #tpu.memory_space<vmem>>, %arg4: memref<1x128xf32, #tpu.memory_space<vmem>>, %arg5: memref<8x2x32xf32, #tpu.memory_space<vmem>>, %arg6: memref<8x2x128xf32, #tpu.memory_space<vmem>>, %arg7: memref<8x2x16xf32, #tpu.memory_space<vmem>>, %arg8: memref<8x2x16xf32, #tpu.memory_space<vmem>>) attributes {dimension_semantics = [], scalar_prefetch = 0 : i64, scratch_operands = 3 : i64, tpu.core_type = #tpu.core_type<tc>} {
    %c0 = arith.constant 0 : index
    %c0_0 = arith.constant 0 : index
    %c0_1 = arith.constant 0 : index
    %0 = vector.load %arg0[%c0, %c0_0, %c0_1] : memref<8x2x16xf32, #tpu.memory_space<vmem>>, vector<8x2x16xf32>
    %c0_2 = arith.constant 0 : index
    %c0_3 = arith.constant 0 : index
    %1 = vector.load %arg1[%c0_2, %c0_3] : memref<16x128xf32, #tpu.memory_space<vmem>>, vector<16x128xf32>
    %c0_4 = arith.constant 0 : index
    %c0_5 = arith.constant 0 : index
    %2 = vector.load %arg2[%c0_4, %c0_5] : memref<16x64xf32, #tpu.memory_space<vmem>>, vector<16x64xf32>
    %c0_6 = arith.constant 0 : index
    %c0_7 = arith.constant 0 : index
    %3 = vector.load %arg3[%c0_6, %c0_7] : memref<16x64xf32, #tpu.memory_space<vmem>>, vector<16x64xf32>
    %c0_8 = arith.constant 0 : index
    %c0_9 = arith.constant 0 : index
    %4 = vector.load %arg4[%c0_8, %c0_9] : memref<1x128xf32, #tpu.memory_space<vmem>>, vector<1x128xf32>
    %5 = vector.shape_cast %0 : vector<8x2x16xf32> to vector<16x16xf32>
    %cst = arith.constant dense<0.000000e+00> : vector<16x128xf32>
    %6 = tpu.matmul %5, %1, %cst {dimension_numbers = #tpu.dot_dimension_numbers<[1], [0], [0], [1], [0, 0, 1, 1], [], []>} : vector<16x16xf32>, vector<16x128xf32>, vector<16x128xf32> -> vector<16x128xf32>
    %7 = vector.broadcast %4 : vector<1x128xf32> to vector<16x128xf32>
    %8 = arith.addf %6, %7 : vector<16x128xf32>
    %9 = vector.shape_cast %8 : vector<16x128xf32> to vector<8x2x128xf32>
    %c0_10 = arith.constant 0 : index
    %c0_11 = arith.constant 0 : index
    %c0_12 = arith.constant 0 : index
    %10 = vector.load %arg6[%c0_10, %c0_11, %c0_12] : memref<8x2x128xf32, #tpu.memory_space<vmem>>, vector<8x2x128xf32>
    tpu.vector_store %arg6[%c0_10, %c0_11, %c0_12], %9 {strides = array<i32>} : memref<8x2x128xf32, #tpu.memory_space<vmem>>, vector<8x2x128xf32>,
    %cst_13 = arith.constant 0.000000e+00 : f32
    %11 = vector.broadcast %cst_13 : f32 to vector<2x16xf32>
    %c0_i32 = arith.constant 0 : i32
    %c8_i32 = arith.constant 8 : i32
    %12 = arith.addi %c0_i32, %c8_i32 : i32
    %c1_i32 = arith.constant 1 : i32
    %13:4 = scf.for %arg9 = %c0_i32 to %12 step %c1_i32 iter_args(%arg10 = %11, %arg11 = %11, %arg12 = %11, %arg13 = %11) -> (vector<2x16xf32>, vector<2x16xf32>, vector<2x16xf32>, vector<2x16xf32>)  : i32 {
      %18 = arith.index_cast %arg9 : i32 to index
      %c0_26 = arith.constant 0 : index
      %c0_27 = arith.constant 0 : index
      %19 = vector.load %arg6[%18, %c0_26, %c0_27] : memref<8x2x128xf32, #tpu.memory_space<vmem>>, vector<1x2x128xf32>
      %20 = vector.shape_cast %19 : vector<1x2x128xf32> to vector<2x128xf32>
      %21 = vector.extract_strided_slice %20 {offsets = [0, 0], sizes = [2, 64], strides = [1, 1]} : vector<2x128xf32> to vector<2x64xf32>
      %cst_28 = arith.constant dense<0.000000e+00> : vector<2x64xf32>
      %22 = tpu.matmul %arg10, %2, %cst_28 {dimension_numbers = #tpu.dot_dimension_numbers<[1], [0], [0], [1], [0, 0, 1, 1], [], []>} : vector<2x16xf32>, vector<16x64xf32>, vector<2x64xf32> -> vector<2x64xf32>
      %23 = arith.addf %21, %22 : vector<2x64xf32>
      %24 = vector.extract_strided_slice %23 {offsets = [0, 0], sizes = [2, 16], strides = [1, 1]} : vector<2x64xf32> to vector<2x16xf32>
      %25 = arith.negf %24 : vector<2x16xf32>
      %26 = math.exp %25 : vector<2x16xf32>
      %cst_29 = arith.constant 1.000000e+00 : f32
      %27 = vector.broadcast %cst_29 : f32 to vector<2x16xf32>
      %28 = arith.addf %27, %26 : vector<2x16xf32>
      %29 = arith.divf %27, %28 : vector<2x16xf32>
      %30 = vector.extract_strided_slice %23 {offsets = [0, 16], sizes = [2, 16], strides = [1, 1]} : vector<2x64xf32> to vector<2x16xf32>
      %31 = arith.negf %30 : vector<2x16xf32>
      %32 = math.exp %31 : vector<2x16xf32>
      %cst_30 = arith.constant 1.000000e+00 : f32
      %33 = vector.broadcast %cst_30 : f32 to vector<2x16xf32>
      %34 = arith.addf %33, %32 : vector<2x16xf32>
      %35 = arith.divf %33, %34 : vector<2x16xf32>
      %36 = vector.extract_strided_slice %23 {offsets = [0, 32], sizes = [2, 16], strides = [1, 1]} : vector<2x64xf32> to vector<2x16xf32>
      %37 = math.tanh %36 : vector<2x16xf32>
      %38 = vector.extract_strided_slice %23 {offsets = [0, 48], sizes = [2, 16], strides = [1, 1]} : vector<2x64xf32> to vector<2x16xf32>
      %39 = arith.negf %38 : vector<2x16xf32>
      %40 = math.exp %39 : vector<2x16xf32>
      %cst_31 = arith.constant 1.000000e+00 : f32
      %41 = vector.broadcast %cst_31 : f32 to vector<2x16xf32>
      %42 = arith.addf %41, %40 : vector<2x16xf32>
      %43 = arith.divf %41, %42 : vector<2x16xf32>
      %44 = arith.mulf %35, %arg11 : vector<2x16xf32>
      %45 = arith.mulf %29, %37 : vector<2x16xf32>
      %46 = arith.addf %44, %45 : vector<2x16xf32>
      %47 = math.tanh %46 : vector<2x16xf32>
      %48 = arith.mulf %43, %47 : vector<2x16xf32>
      %49 = arith.index_cast %arg9 : i32 to index
      %c0_32 = arith.constant 0 : index
      %c0_33 = arith.constant 0 : index
      %50 = vector.load %arg7[%49, %c0_32, %c0_33] : memref<8x2x16xf32, #tpu.memory_space<vmem>>, vector<1x2x16xf32>
      %51 = vector.shape_cast %50 : vector<1x2x16xf32> to vector<2x16xf32>
      %52 = vector.shape_cast %48 : vector<2x16xf32> to vector<1x2x16xf32>
      tpu.vector_store %arg7[%49, %c0_32, %c0_33], %52 {strides = array<i32>} : memref<8x2x16xf32, #tpu.memory_space<vmem>>, vector<1x2x16xf32>,
      %c7_i32 = arith.constant 7 : i32
      %53 = arith.subi %c7_i32, %arg9 : i32
      %54 = arith.index_cast %53 : i32 to index
      %c0_34 = arith.constant 0 : index
      %c0_35 = arith.constant 0 : index
      %55 = vector.load %arg6[%54, %c0_34, %c0_35] : memref<8x2x128xf32, #tpu.memory_space<vmem>>, vector<1x2x128xf32>
      %56 = vector.shape_cast %55 : vector<1x2x128xf32> to vector<2x128xf32>
      %57 = vector.extract_strided_slice %56 {offsets = [0, 64], sizes = [2, 64], strides = [1, 1]} : vector<2x128xf32> to vector<2x64xf32>
      %cst_36 = arith.constant dense<0.000000e+00> : vector<2x64xf32>
      %58 = tpu.matmul %arg12, %3, %cst_36 {dimension_numbers = #tpu.dot_dimension_numbers<[1], [0], [0], [1], [0, 0, 1, 1], [], []>} : vector<2x16xf32>, vector<16x64xf32>, vector<2x64xf32> -> vector<2x64xf32>
      %59 = arith.addf %57, %58 : vector<2x64xf32>
      %60 = vector.extract_strided_slice %59 {offsets = [0, 0], sizes = [2, 16], strides = [1, 1]} : vector<2x64xf32> to vector<2x16xf32>
      %61 = arith.negf %60 : vector<2x16xf32>
      %62 = math.exp %61 : vector<2x16xf32>
      %cst_37 = arith.constant 1.000000e+00 : f32
      %63 = vector.broadcast %cst_37 : f32 to vector<2x16xf32>
      %64 = arith.addf %63, %62 : vector<2x16xf32>
      %65 = arith.divf %63, %64 : vector<2x16xf32>
      %66 = vector.extract_strided_slice %59 {offsets = [0, 16], sizes = [2, 16], strides = [1, 1]} : vector<2x64xf32> to vector<2x16xf32>
      %67 = arith.negf %66 : vector<2x16xf32>
      %68 = math.exp %67 : vector<2x16xf32>
      %cst_38 = arith.constant 1.000000e+00 : f32
      %69 = vector.broadcast %cst_38 : f32 to vector<2x16xf32>
      %70 = arith.addf %69, %68 : vector<2x16xf32>
      %71 = arith.divf %69, %70 : vector<2x16xf32>
      %72 = vector.extract_strided_slice %59 {offsets = [0, 32], sizes = [2, 16], strides = [1, 1]} : vector<2x64xf32> to vector<2x16xf32>
      %73 = math.tanh %72 : vector<2x16xf32>
      %74 = vector.extract_strided_slice %59 {offsets = [0, 48], sizes = [2, 16], strides = [1, 1]} : vector<2x64xf32> to vector<2x16xf32>
      %75 = arith.negf %74 : vector<2x16xf32>
      %76 = math.exp %75 : vector<2x16xf32>
      %cst_39 = arith.constant 1.000000e+00 : f32
      %77 = vector.broadcast %cst_39 : f32 to vector<2x16xf32>
      %78 = arith.addf %77, %76 : vector<2x16xf32>
      %79 = arith.divf %77, %78 : vector<2x16xf32>
      %80 = arith.mulf %71, %arg13 : vector<2x16xf32>
      %81 = arith.mulf %65, %73 : vector<2x16xf32>
      %82 = arith.addf %80, %81 : vector<2x16xf32>
      %83 = math.tanh %82 : vector<2x16xf32>
      %84 = arith.mulf %79, %83 : vector<2x16xf32>
      %85 = arith.index_cast %53 : i32 to index
      %c0_40 = arith.constant 0 : index
      %c0_41 = arith.constant 0 : index
      %86 = vector.load %arg8[%85, %c0_40, %c0_41] : memref<8x2x16xf32, #tpu.memory_space<vmem>>, vector<1x2x16xf32>
      %87 = vector.shape_cast %86 : vector<1x2x16xf32> to vector<2x16xf32>
      %88 = vector.shape_cast %84 : vector<2x16xf32> to vector<1x2x16xf32>
      tpu.vector_store %arg8[%85, %c0_40, %c0_41], %88 {strides = array<i32>} : memref<8x2x16xf32, #tpu.memory_space<vmem>>, vector<1x2x16xf32>,
      scf.yield %48, %46, %84, %82 : vector<2x16xf32>, vector<2x16xf32>, vector<2x16xf32>, vector<2x16xf32>
    }
    %c8_i32_14 = arith.constant 8 : i32
    %c0_15 = arith.constant 0 : index
    %c0_16 = arith.constant 0 : index
    %c0_17 = arith.constant 0 : index
    %14 = vector.load %arg7[%c0_15, %c0_16, %c0_17] : memref<8x2x16xf32, #tpu.memory_space<vmem>>, vector<8x2x16xf32>
    %c0_18 = arith.constant 0 : index
    %c0_19 = arith.constant 0 : index
    %c0_20 = arith.constant 0 : index
    %15 = vector.load %arg5[%c0_18, %c0_19, %c0_20] : memref<8x2x32xf32, #tpu.memory_space<vmem>>, vector<8x2x16xf32>
    tpu.vector_store %arg5[%c0_18, %c0_19, %c0_20], %14 {strides = array<i32>} : memref<8x2x32xf32, #tpu.memory_space<vmem>>, vector<8x2x16xf32>,
    %c0_21 = arith.constant 0 : index
    %c0_22 = arith.constant 0 : index
    %c0_23 = arith.constant 0 : index
    %16 = vector.load %arg8[%c0_21, %c0_22, %c0_23] : memref<8x2x16xf32, #tpu.memory_space<vmem>>, vector<8x2x16xf32>
    %c0_24 = arith.constant 0 : index
    %c0_25 = arith.constant 0 : index
    %c16 = arith.constant 16 : index
    %17 = vector.load %arg5[%c0_24, %c0_25, %c16] : memref<8x2x32xf32, #tpu.memory_space<vmem>>, vector<8x2x16xf32>
    tpu.vector_store %arg5[%c0_24, %c0_25, %c16], %16 {strides = array<i32>} : memref<8x2x32xf32, #tpu.memory_space<vmem>>, vector<8x2x16xf32>,
    return
  }
}

module attributes {stable_mosaic.version = 11 : i64} {
  func.func @embed_contract_kernel(%arg0: i32, %arg1: memref<16x8xf32, #tpu.memory_space<vmem>>, %arg2: memref<8x16xf32, #tpu.memory_space<vmem>>, %arg3: memref<1x16xf32, #tpu.memory_space<vmem>>, %arg4: memref<16x16xf32, #tpu.memory_space<vmem>>, %arg5: memref<1x16xf32, #tpu.memory_space<vmem>>, %arg6: memref<16x16xf32, #tpu.memory_space<vmem>>) attributes {dimension_semantics = [#tpu.dimension_semantics<parallel>], iteration_bounds = array<i64: 1>, scalar_prefetch = 0 : i64, scratch_operands = 0 : i64, tpu.core_type = #tpu.core_type<tc>, window_params = [{transform_indices = @transform_0, window_bounds = array<i64: 16, 8>}, {pipeline_mode = #tpu.pipeline_mode<synchronous>, transform_indices = @transform_1, window_bounds = array<i64: 8, 16>}, {pipeline_mode = #tpu.pipeline_mode<synchronous>, transform_indices = @transform_2, window_bounds = array<i64: 1, 16>}, {pipeline_mode = #tpu.pipeline_mode<synchronous>, transform_indices = @transform_3, window_bounds = array<i64: 16, 16>}, {pipeline_mode = #tpu.pipeline_mode<synchronous>, transform_indices = @transform_4, window_bounds = array<i64: 1, 16>}, {transform_indices = @transform_5, window_bounds = array<i64: 16, 16>}]} {
    %c0 = arith.constant 0 : index
    %c0_0 = arith.constant 0 : index
    %0 = vector.load %arg1[%c0, %c0_0] : memref<16x8xf32, #tpu.memory_space<vmem>>, vector<16x8xf32>
    %c0_1 = arith.constant 0 : index
    %c0_2 = arith.constant 0 : index
    %1 = vector.load %arg2[%c0_1, %c0_2] : memref<8x16xf32, #tpu.memory_space<vmem>>, vector<8x16xf32>
    %cst = arith.constant dense<0.000000e+00> : vector<16x16xf32>
    %2 = tpu.matmul %0, %1, %cst {dimension_numbers = #tpu.dot_dimension_numbers<[1], [0], [0], [1], [0, 0, 1, 1], [], []>} : vector<16x8xf32>, vector<8x16xf32>, vector<16x16xf32> -> vector<16x16xf32>
    %c0_3 = arith.constant 0 : index
    %c0_4 = arith.constant 0 : index
    %3 = vector.load %arg3[%c0_3, %c0_4] : memref<1x16xf32, #tpu.memory_space<vmem>>, vector<1x16xf32>
    %4 = vector.broadcast %3 : vector<1x16xf32> to vector<16x16xf32>
    %5 = arith.addf %2, %4 : vector<16x16xf32>
    %6 = math.absf %0 : vector<16x8xf32>
    %cst_5 = arith.constant dense<0.000000e+00> : vector<16xf32>
    %7 = vector.multi_reduction <add>, %6, %cst_5 [1] : vector<16x8xf32> to vector<16xf32>
    %8 = vector.shape_cast %7 : vector<16xf32> to vector<16x1xf32>
    %cst_6 = arith.constant 0.000000e+00 : f32
    %9 = vector.broadcast %cst_6 : f32 to vector<16x1xf32>
    %10 = arith.cmpf oeq, %8, %9 : vector<16x1xf32>
    %cst_7 = arith.constant 0.000000e+00 : f32
    %11 = vector.shape_cast %10 : vector<16x1xi1> to vector<16x1xi1>
    %12 = vector.broadcast %11 : vector<16x1xi1> to vector<16x16xi1>
    %13 = vector.broadcast %cst_7 : f32 to vector<16x16xf32>
    %14 = arith.select %12, %13, %5 : vector<16x16xi1>, vector<16x16xf32>
    %c0_8 = arith.constant 0 : index
    %c0_9 = arith.constant 0 : index
    %15 = vector.load %arg4[%c0_8, %c0_9] : memref<16x16xf32, #tpu.memory_space<vmem>>, vector<16x16xf32>
    %cst_10 = arith.constant dense<0.000000e+00> : vector<16x16xf32>
    %16 = tpu.matmul %14, %15, %cst_10 {dimension_numbers = #tpu.dot_dimension_numbers<[1], [0], [0], [1], [0, 0, 1, 1], [], []>} : vector<16x16xf32>, vector<16x16xf32>, vector<16x16xf32> -> vector<16x16xf32>
    %c0_11 = arith.constant 0 : index
    %c0_12 = arith.constant 0 : index
    %17 = vector.load %arg5[%c0_11, %c0_12] : memref<1x16xf32, #tpu.memory_space<vmem>>, vector<1x16xf32>
    %18 = vector.broadcast %17 : vector<1x16xf32> to vector<16x16xf32>
    %19 = arith.addf %16, %18 : vector<16x16xf32>
    %20 = math.absf %14 : vector<16x16xf32>
    %cst_13 = arith.constant dense<0.000000e+00> : vector<16xf32>
    %21 = vector.multi_reduction <add>, %20, %cst_13 [1] : vector<16x16xf32> to vector<16xf32>
    %22 = vector.shape_cast %21 : vector<16xf32> to vector<16x1xf32>
    %cst_14 = arith.constant 0.000000e+00 : f32
    %23 = vector.broadcast %cst_14 : f32 to vector<16x1xf32>
    %24 = arith.cmpf oeq, %22, %23 : vector<16x1xf32>
    %cst_15 = arith.constant 0.000000e+00 : f32
    %25 = vector.shape_cast %24 : vector<16x1xi1> to vector<16x1xi1>
    %26 = vector.broadcast %25 : vector<16x1xi1> to vector<16x16xi1>
    %27 = vector.broadcast %cst_15 : f32 to vector<16x16xf32>
    %28 = arith.select %26, %27, %19 : vector<16x16xi1>, vector<16x16xf32>
    %c0_16 = arith.constant 0 : index
    %c0_17 = arith.constant 0 : index
    %29 = vector.load %arg6[%c0_16, %c0_17] : memref<16x16xf32, #tpu.memory_space<vmem>>, vector<16x16xf32>
    tpu.vector_store %arg6[%c0_16, %c0_17], %28 {strides = array<i32>} : memref<16x16xf32, #tpu.memory_space<vmem>>, vector<16x16xf32>,
    return
  }
  func.func @transform_0(%arg0: i32) -> (i32, i32) {
    %c0_i32 = arith.constant 0 : i32
    %c0_i32_0 = arith.constant 0 : i32
    return %arg0, %c0_i32 : i32, i32
  }
  func.func @transform_1(%arg0: i32) -> (i32, i32) {
    %c0_i32 = arith.constant 0 : i32
    %c0_i32_0 = arith.constant 0 : i32
    %c0_i32_1 = arith.constant 0 : i32
    return %c0_i32, %c0_i32_0 : i32, i32
  }
  func.func @transform_2(%arg0: i32) -> (i32, i32) {
    %c0_i32 = arith.constant 0 : i32
    %c0_i32_0 = arith.constant 0 : i32
    %c0_i32_1 = arith.constant 0 : i32
    return %c0_i32, %c0_i32_0 : i32, i32
  }
  func.func @transform_3(%arg0: i32) -> (i32, i32) {
    %c0_i32 = arith.constant 0 : i32
    %c0_i32_0 = arith.constant 0 : i32
    %c0_i32_1 = arith.constant 0 : i32
    return %c0_i32, %c0_i32_0 : i32, i32
  }
  func.func @transform_4(%arg0: i32) -> (i32, i32) {
    %c0_i32 = arith.constant 0 : i32
    %c0_i32_0 = arith.constant 0 : i32
    %c0_i32_1 = arith.constant 0 : i32
    return %c0_i32, %c0_i32_0 : i32, i32
  }
  func.func @transform_5(%arg0: i32) -> (i32, i32) {
    %c0_i32 = arith.constant 0 : i32
    %c0_i32_0 = arith.constant 0 : i32
    return %arg0, %c0_i32 : i32, i32
  }
}

module attributes {stable_mosaic.version = 11 : i64} {
  func.func @measure_attn_kernel(%arg0: memref<2x8x32xf32, #tpu.memory_space<vmem>>, %arg1: memref<2x3x8xf32, #tpu.memory_space<vmem>>, %arg2: memref<32x32xf32, #tpu.memory_space<vmem>>, %arg3: memref<1x32xf32, #tpu.memory_space<vmem>>, %arg4: memref<4x32xf32, #tpu.memory_space<vmem>>, %arg5: memref<2x3x32xf32, #tpu.memory_space<vmem>>) attributes {dimension_semantics = [], scalar_prefetch = 0 : i64, scratch_operands = 0 : i64, tpu.core_type = #tpu.core_type<tc>} {
    %c0 = arith.constant 0 : index
    %c0_0 = arith.constant 0 : index
    %c0_1 = arith.constant 0 : index
    %0 = vector.load %arg0[%c0, %c0_0, %c0_1] : memref<2x8x32xf32, #tpu.memory_space<vmem>>, vector<2x8x32xf32>
    %1 = vector.shape_cast %0 : vector<2x8x32xf32> to vector<16x32xf32>
    %c0_2 = arith.constant 0 : index
    %c0_3 = arith.constant 0 : index
    %2 = vector.load %arg2[%c0_2, %c0_3] : memref<32x32xf32, #tpu.memory_space<vmem>>, vector<32x32xf32>
    %cst = arith.constant dense<0.000000e+00> : vector<16x32xf32>
    %3 = tpu.matmul %1, %2, %cst {dimension_numbers = #tpu.dot_dimension_numbers<[1], [0], [0], [1], [0, 0, 1, 1], [], []>} : vector<16x32xf32>, vector<32x32xf32>, vector<16x32xf32> -> vector<16x32xf32>
    %c0_4 = arith.constant 0 : index
    %c0_5 = arith.constant 0 : index
    %4 = vector.load %arg3[%c0_4, %c0_5] : memref<1x32xf32, #tpu.memory_space<vmem>>, vector<1x32xf32>
    %5 = vector.broadcast %4 : vector<1x32xf32> to vector<16x32xf32>
    %6 = arith.addf %3, %5 : vector<16x32xf32>
    %7 = math.tanh %6 : vector<16x32xf32>
    %8 = vector.shape_cast %7 : vector<16x32xf32> to vector<2x8x32xf32>
    %c0_6 = arith.constant 0 : index
    %c0_7 = arith.constant 0 : index
    %c0_8 = arith.constant 0 : index
    %9 = vector.load %arg1[%c0_6, %c0_7, %c0_8] : memref<2x3x8xf32, #tpu.memory_space<vmem>>, vector<2x3x8xf32>
    %c0_9 = arith.constant 0 : index
    %c0_10 = arith.constant 0 : index
    %10 = vector.load %arg4[%c0_9, %c0_10] : memref<4x32xf32, #tpu.memory_space<vmem>>, vector<1x32xf32>
    %11 = vector.shape_cast %10 : vector<1x32xf32> to vector<1x1x32xf32>
    %12 = vector.broadcast %11 : vector<1x1x32xf32> to vector<2x8x32xf32>
    %13 = arith.mulf %8, %12 : vector<2x8x32xf32>
    %cst_11 = arith.constant dense<0.000000e+00> : vector<2x8xf32>
    %14 = vector.multi_reduction <add>, %13, %cst_11 [2] : vector<2x8x32xf32> to vector<2x8xf32>
    %cst_12 = arith.constant 5.000000e-01 : f32
    %15 = vector.broadcast %cst_12 : f32 to vector<2x3x8xf32>
    %16 = arith.cmpf ogt, %9, %15 : vector<2x3x8xf32>
    %17 = vector.shape_cast %14 : vector<2x8xf32> to vector<2x1x8xf32>
    %cst_13 = arith.constant -1.000000e+30 : f32
    %18 = vector.shape_cast %17 : vector<2x1x8xf32> to vector<2x1x8xf32>
    %19 = vector.broadcast %18 : vector<2x1x8xf32> to vector<2x3x8xf32>
    %20 = vector.broadcast %cst_13 : f32 to vector<2x3x8xf32>
    %21 = arith.select %16, %19, %20 : vector<2x3x8xi1>, vector<2x3x8xf32>
    %cst_14 = arith.constant dense<0xFF800000> : vector<2x3xf32>
    %22 = vector.multi_reduction <maximumf>, %21, %cst_14 [2] : vector<2x3x8xf32> to vector<2x3xf32>
    %23 = vector.shape_cast %22 : vector<2x3xf32> to vector<2x3x1xf32>
    %24 = vector.broadcast %23 : vector<2x3x1xf32> to vector<2x3x8xf32>
    %25 = arith.subf %21, %24 : vector<2x3x8xf32>
    %26 = math.exp %25 : vector<2x3x8xf32>
    %27 = arith.mulf %26, %9 : vector<2x3x8xf32>
    %cst_15 = arith.constant dense<0.000000e+00> : vector<2x3xf32>
    %28 = vector.multi_reduction <add>, %27, %cst_15 [2] : vector<2x3x8xf32> to vector<2x3xf32>
    %29 = vector.shape_cast %28 : vector<2x3xf32> to vector<2x3x1xf32>
    %cst_16 = arith.constant 0.000000e+00 : f32
    %30 = vector.broadcast %cst_16 : f32 to vector<2x3x1xf32>
    %31 = arith.cmpf oeq, %29, %30 : vector<2x3x1xf32>
    %cst_17 = arith.constant 1.000000e+00 : f32
    %32 = vector.broadcast %cst_17 : f32 to vector<2x3x1xf32>
    %33 = arith.select %31, %32, %29 : vector<2x3x1xi1>, vector<2x3x1xf32>
    %34 = tpu.reciprocal %33 {approx = true} : vector<2x3x1xf32> -> vector<2x3x1xf32>
    %35 = vector.broadcast %34 : vector<2x3x1xf32> to vector<2x3x8xf32>
    %36 = arith.mulf %27, %35 : vector<2x3x8xf32>
    %37 = vector.extract_strided_slice %0 {offsets = [0, 0, 0], sizes = [2, 8, 8], strides = [1, 1, 1]} : vector<2x8x32xf32> to vector<2x8x8xf32>
    "tpu.trace_start"() <{level = 10 : i32, message = "nmt,ntd->nmd"}> : () -> ()
    %cst_18 = arith.constant dense<0.000000e+00> : vector<2x3x8xf32>
    %38 = tpu.matmul %36, %37, %cst_18 {dimension_numbers = #tpu.dot_dimension_numbers<[2], [1], [1], [2], [0, 0, 0, 1, 1, 2], [0], [0]>} : vector<2x3x8xf32>, vector<2x8x8xf32>, vector<2x3x8xf32> -> vector<2x3x8xf32>
    "tpu.trace_stop"() : () -> ()
    %c0_19 = arith.constant 0 : index
    %c0_20 = arith.constant 0 : index
    %c0_21 = arith.constant 0 : index
    %39 = vector.load %arg5[%c0_19, %c0_20, %c0_21] : memref<2x3x32xf32, #tpu.memory_space<vmem>>, vector<2x3x8xf32>
    tpu.vector_store %arg5[%c0_19, %c0_20, %c0_21], %38 {strides = array<i32>} : memref<2x3x32xf32, #tpu.memory_space<vmem>>, vector<2x3x8xf32>,
    %c1 = arith.constant 1 : index
    %c0_22 = arith.constant 0 : index
    %40 = vector.load %arg4[%c1, %c0_22] : memref<4x32xf32, #tpu.memory_space<vmem>>, vector<1x32xf32>
    %41 = vector.shape_cast %40 : vector<1x32xf32> to vector<1x1x32xf32>
    %42 = vector.broadcast %41 : vector<1x1x32xf32> to vector<2x8x32xf32>
    %43 = arith.mulf %8, %42 : vector<2x8x32xf32>
    %cst_23 = arith.constant dense<0.000000e+00> : vector<2x8xf32>
    %44 = vector.multi_reduction <add>, %43, %cst_23 [2] : vector<2x8x32xf32> to vector<2x8xf32>
    %cst_24 = arith.constant 5.000000e-01 : f32
    %45 = vector.broadcast %cst_24 : f32 to vector<2x3x8xf32>
    %46 = arith.cmpf ogt, %9, %45 : vector<2x3x8xf32>
    %47 = vector.shape_cast %44 : vector<2x8xf32> to vector<2x1x8xf32>
    %cst_25 = arith.constant -1.000000e+30 : f32
    %48 = vector.shape_cast %47 : vector<2x1x8xf32> to vector<2x1x8xf32>
    %49 = vector.broadcast %48 : vector<2x1x8xf32> to vector<2x3x8xf32>
    %50 = vector.broadcast %cst_25 : f32 to vector<2x3x8xf32>
    %51 = arith.select %46, %49, %50 : vector<2x3x8xi1>, vector<2x3x8xf32>
    %cst_26 = arith.constant dense<0xFF800000> : vector<2x3xf32>
    %52 = vector.multi_reduction <maximumf>, %51, %cst_26 [2] : vector<2x3x8xf32> to vector<2x3xf32>
    %53 = vector.shape_cast %52 : vector<2x3xf32> to vector<2x3x1xf32>
    %54 = vector.broadcast %53 : vector<2x3x1xf32> to vector<2x3x8xf32>
    %55 = arith.subf %51, %54 : vector<2x3x8xf32>
    %56 = math.exp %55 : vector<2x3x8xf32>
    %57 = arith.mulf %56, %9 : vector<2x3x8xf32>
    %cst_27 = arith.constant dense<0.000000e+00> : vector<2x3xf32>
    %58 = vector.multi_reduction <add>, %57, %cst_27 [2] : vector<2x3x8xf32> to vector<2x3xf32>
    %59 = vector.shape_cast %58 : vector<2x3xf32> to vector<2x3x1xf32>
    %cst_28 = arith.constant 0.000000e+00 : f32
    %60 = vector.broadcast %cst_28 : f32 to vector<2x3x1xf32>
    %61 = arith.cmpf oeq, %59, %60 : vector<2x3x1xf32>
    %cst_29 = arith.constant 1.000000e+00 : f32
    %62 = vector.broadcast %cst_29 : f32 to vector<2x3x1xf32>
    %63 = arith.select %61, %62, %59 : vector<2x3x1xi1>, vector<2x3x1xf32>
    %64 = tpu.reciprocal %63 {approx = true} : vector<2x3x1xf32> -> vector<2x3x1xf32>
    %65 = vector.broadcast %64 : vector<2x3x1xf32> to vector<2x3x8xf32>
    %66 = arith.mulf %57, %65 : vector<2x3x8xf32>
    %67 = vector.extract_strided_slice %0 {offsets = [0, 0, 8], sizes = [2, 8, 8], strides = [1, 1, 1]} : vector<2x8x32xf32> to vector<2x8x8xf32>
    "tpu.trace_start"() <{level = 10 : i32, message = "nmt,ntd->nmd"}> : () -> ()
    %cst_30 = arith.constant dense<0.000000e+00> : vector<2x3x8xf32>
    %68 = tpu.matmul %66, %67, %cst_30 {dimension_numbers = #tpu.dot_dimension_numbers<[2], [1], [1], [2], [0, 0, 0, 1, 1, 2], [0], [0]>} : vector<2x3x8xf32>, vector<2x8x8xf32>, vector<2x3x8xf32> -> vector<2x3x8xf32>
    "tpu.trace_stop"() : () -> ()
    %c0_31 = arith.constant 0 : index
    %c0_32 = arith.constant 0 : index
    %c8 = arith.constant 8 : index
    %69 = vector.load %arg5[%c0_31, %c0_32, %c8] : memref<2x3x32xf32, #tpu.memory_space<vmem>>, vector<2x3x8xf32>
    tpu.vector_store %arg5[%c0_31, %c0_32, %c8], %68 {strides = array<i32>} : memref<2x3x32xf32, #tpu.memory_space<vmem>>, vector<2x3x8xf32>,
    %c2 = arith.constant 2 : index
    %c0_33 = arith.constant 0 : index
    %70 = vector.load %arg4[%c2, %c0_33] : memref<4x32xf32, #tpu.memory_space<vmem>>, vector<1x32xf32>
    %71 = vector.shape_cast %70 : vector<1x32xf32> to vector<1x1x32xf32>
    %72 = vector.broadcast %71 : vector<1x1x32xf32> to vector<2x8x32xf32>
    %73 = arith.mulf %8, %72 : vector<2x8x32xf32>
    %cst_34 = arith.constant dense<0.000000e+00> : vector<2x8xf32>
    %74 = vector.multi_reduction <add>, %73, %cst_34 [2] : vector<2x8x32xf32> to vector<2x8xf32>
    %cst_35 = arith.constant 5.000000e-01 : f32
    %75 = vector.broadcast %cst_35 : f32 to vector<2x3x8xf32>
    %76 = arith.cmpf ogt, %9, %75 : vector<2x3x8xf32>
    %77 = vector.shape_cast %74 : vector<2x8xf32> to vector<2x1x8xf32>
    %cst_36 = arith.constant -1.000000e+30 : f32
    %78 = vector.shape_cast %77 : vector<2x1x8xf32> to vector<2x1x8xf32>
    %79 = vector.broadcast %78 : vector<2x1x8xf32> to vector<2x3x8xf32>
    %80 = vector.broadcast %cst_36 : f32 to vector<2x3x8xf32>
    %81 = arith.select %76, %79, %80 : vector<2x3x8xi1>, vector<2x3x8xf32>
    %cst_37 = arith.constant dense<0xFF800000> : vector<2x3xf32>
    %82 = vector.multi_reduction <maximumf>, %81, %cst_37 [2] : vector<2x3x8xf32> to vector<2x3xf32>
    %83 = vector.shape_cast %82 : vector<2x3xf32> to vector<2x3x1xf32>
    %84 = vector.broadcast %83 : vector<2x3x1xf32> to vector<2x3x8xf32>
    %85 = arith.subf %81, %84 : vector<2x3x8xf32>
    %86 = math.exp %85 : vector<2x3x8xf32>
    %87 = arith.mulf %86, %9 : vector<2x3x8xf32>
    %cst_38 = arith.constant dense<0.000000e+00> : vector<2x3xf32>
    %88 = vector.multi_reduction <add>, %87, %cst_38 [2] : vector<2x3x8xf32> to vector<2x3xf32>
    %89 = vector.shape_cast %88 : vector<2x3xf32> to vector<2x3x1xf32>
    %cst_39 = arith.constant 0.000000e+00 : f32
    %90 = vector.broadcast %cst_39 : f32 to vector<2x3x1xf32>
    %91 = arith.cmpf oeq, %89, %90 : vector<2x3x1xf32>
    %cst_40 = arith.constant 1.000000e+00 : f32
    %92 = vector.broadcast %cst_40 : f32 to vector<2x3x1xf32>
    %93 = arith.select %91, %92, %89 : vector<2x3x1xi1>, vector<2x3x1xf32>
    %94 = tpu.reciprocal %93 {approx = true} : vector<2x3x1xf32> -> vector<2x3x1xf32>
    %95 = vector.broadcast %94 : vector<2x3x1xf32> to vector<2x3x8xf32>
    %96 = arith.mulf %87, %95 : vector<2x3x8xf32>
    %97 = vector.extract_strided_slice %0 {offsets = [0, 0, 16], sizes = [2, 8, 8], strides = [1, 1, 1]} : vector<2x8x32xf32> to vector<2x8x8xf32>
    "tpu.trace_start"() <{level = 10 : i32, message = "nmt,ntd->nmd"}> : () -> ()
    %cst_41 = arith.constant dense<0.000000e+00> : vector<2x3x8xf32>
    %98 = tpu.matmul %96, %97, %cst_41 {dimension_numbers = #tpu.dot_dimension_numbers<[2], [1], [1], [2], [0, 0, 0, 1, 1, 2], [0], [0]>} : vector<2x3x8xf32>, vector<2x8x8xf32>, vector<2x3x8xf32> -> vector<2x3x8xf32>
    "tpu.trace_stop"() : () -> ()
    %c0_42 = arith.constant 0 : index
    %c0_43 = arith.constant 0 : index
    %c16 = arith.constant 16 : index
    %99 = vector.load %arg5[%c0_42, %c0_43, %c16] : memref<2x3x32xf32, #tpu.memory_space<vmem>>, vector<2x3x8xf32>
    tpu.vector_store %arg5[%c0_42, %c0_43, %c16], %98 {strides = array<i32>} : memref<2x3x32xf32, #tpu.memory_space<vmem>>, vector<2x3x8xf32>,
    %c3 = arith.constant 3 : index
    %c0_44 = arith.constant 0 : index
    %100 = vector.load %arg4[%c3, %c0_44] : memref<4x32xf32, #tpu.memory_space<vmem>>, vector<1x32xf32>
    %101 = vector.shape_cast %100 : vector<1x32xf32> to vector<1x1x32xf32>
    %102 = vector.broadcast %101 : vector<1x1x32xf32> to vector<2x8x32xf32>
    %103 = arith.mulf %8, %102 : vector<2x8x32xf32>
    %cst_45 = arith.constant dense<0.000000e+00> : vector<2x8xf32>
    %104 = vector.multi_reduction <add>, %103, %cst_45 [2] : vector<2x8x32xf32> to vector<2x8xf32>
    %cst_46 = arith.constant 5.000000e-01 : f32
    %105 = vector.broadcast %cst_46 : f32 to vector<2x3x8xf32>
    %106 = arith.cmpf ogt, %9, %105 : vector<2x3x8xf32>
    %107 = vector.shape_cast %104 : vector<2x8xf32> to vector<2x1x8xf32>
    %cst_47 = arith.constant -1.000000e+30 : f32
    %108 = vector.shape_cast %107 : vector<2x1x8xf32> to vector<2x1x8xf32>
    %109 = vector.broadcast %108 : vector<2x1x8xf32> to vector<2x3x8xf32>
    %110 = vector.broadcast %cst_47 : f32 to vector<2x3x8xf32>
    %111 = arith.select %106, %109, %110 : vector<2x3x8xi1>, vector<2x3x8xf32>
    %cst_48 = arith.constant dense<0xFF800000> : vector<2x3xf32>
    %112 = vector.multi_reduction <maximumf>, %111, %cst_48 [2] : vector<2x3x8xf32> to vector<2x3xf32>
    %113 = vector.shape_cast %112 : vector<2x3xf32> to vector<2x3x1xf32>
    %114 = vector.broadcast %113 : vector<2x3x1xf32> to vector<2x3x8xf32>
    %115 = arith.subf %111, %114 : vector<2x3x8xf32>
    %116 = math.exp %115 : vector<2x3x8xf32>
    %117 = arith.mulf %116, %9 : vector<2x3x8xf32>
    %cst_49 = arith.constant dense<0.000000e+00> : vector<2x3xf32>
    %118 = vector.multi_reduction <add>, %117, %cst_49 [2] : vector<2x3x8xf32> to vector<2x3xf32>
    %119 = vector.shape_cast %118 : vector<2x3xf32> to vector<2x3x1xf32>
    %cst_50 = arith.constant 0.000000e+00 : f32
    %120 = vector.broadcast %cst_50 : f32 to vector<2x3x1xf32>
    %121 = arith.cmpf oeq, %119, %120 : vector<2x3x1xf32>
    %cst_51 = arith.constant 1.000000e+00 : f32
    %122 = vector.broadcast %cst_51 : f32 to vector<2x3x1xf32>
    %123 = arith.select %121, %122, %119 : vector<2x3x1xi1>, vector<2x3x1xf32>
    %124 = tpu.reciprocal %123 {approx = true} : vector<2x3x1xf32> -> vector<2x3x1xf32>
    %125 = vector.broadcast %124 : vector<2x3x1xf32> to vector<2x3x8xf32>
    %126 = arith.mulf %117, %125 : vector<2x3x8xf32>
    %127 = vector.extract_strided_slice %0 {offsets = [0, 0, 24], sizes = [2, 8, 8], strides = [1, 1, 1]} : vector<2x8x32xf32> to vector<2x8x8xf32>
    "tpu.trace_start"() <{level = 10 : i32, message = "nmt,ntd->nmd"}> : () -> ()
    %cst_52 = arith.constant dense<0.000000e+00> : vector<2x3x8xf32>
    %128 = tpu.matmul %126, %127, %cst_52 {dimension_numbers = #tpu.dot_dimension_numbers<[2], [1], [1], [2], [0, 0, 0, 1, 1, 2], [0], [0]>} : vector<2x3x8xf32>, vector<2x8x8xf32>, vector<2x3x8xf32> -> vector<2x3x8xf32>
    "tpu.trace_stop"() : () -> ()
    %c0_53 = arith.constant 0 : index
    %c0_54 = arith.constant 0 : index
    %c24 = arith.constant 24 : index
    %129 = vector.load %arg5[%c0_53, %c0_54, %c24] : memref<2x3x32xf32, #tpu.memory_space<vmem>>, vector<2x3x8xf32>
    tpu.vector_store %arg5[%c0_53, %c0_54, %c24], %128 {strides = array<i32>} : memref<2x3x32xf32, #tpu.memory_space<vmem>>, vector<2x3x8xf32>,
    return
  }
}

module attributes {stable_mosaic.version = 11 : i64} {
  func.func @perf_tail_kernel(%arg0: memref<3x2x32xf32, #tpu.memory_space<vmem>>, %arg1: memref<2x32x128xf32, #tpu.memory_space<vmem>>, %arg2: memref<2x16x64xf32, #tpu.memory_space<vmem>>, %arg3: memref<2x16x64xf32, #tpu.memory_space<vmem>>, %arg4: memref<2x1x128xf32, #tpu.memory_space<vmem>>, %arg5: memref<32x32xf32, #tpu.memory_space<vmem>>, %arg6: memref<1x32xf32, #tpu.memory_space<vmem>>, %arg7: memref<32x4xf32, #tpu.memory_space<vmem>>, %arg8: memref<2x32xf32, #tpu.memory_space<vmem>>, %arg9: memref<3x2x128xf32, #tpu.memory_space<vmem>>, %arg10: memref<3x2x16xf32, #tpu.memory_space<vmem>>, %arg11: memref<3x2x16xf32, #tpu.memory_space<vmem>>, %arg12: memref<3x2x32xf32, #tpu.memory_space<vmem>>) attributes {dimension_semantics = [], scalar_prefetch = 0 : i64, scratch_operands = 4 : i64, tpu.core_type = #tpu.core_type<tc>} {
    %c0 = arith.constant 0 : index
    %c0_0 = arith.constant 0 : index
    %c0_1 = arith.constant 0 : index
    %0 = vector.load %arg0[%c0, %c0_0, %c0_1] : memref<3x2x32xf32, #tpu.memory_space<vmem>>, vector<3x2x32xf32>
    %c0_2 = arith.constant 0 : index
    %c0_3 = arith.constant 0 : index
    %c0_4 = arith.constant 0 : index
    %1 = vector.load %arg1[%c0_2, %c0_3, %c0_4] : memref<2x32x128xf32, #tpu.memory_space<vmem>>, vector<1x32x128xf32>
    %2 = vector.shape_cast %1 : vector<1x32x128xf32> to vector<32x128xf32>
    %c0_5 = arith.constant 0 : index
    %c0_6 = arith.constant 0 : index
    %c0_7 = arith.constant 0 : index
    %3 = vector.load %arg2[%c0_5, %c0_6, %c0_7] : memref<2x16x64xf32, #tpu.memory_space<vmem>>, vector<1x16x64xf32>
    %4 = vector.shape_cast %3 : vector<1x16x64xf32> to vector<16x64xf32>
    %c0_8 = arith.constant 0 : index
    %c0_9 = arith.constant 0 : index
    %c0_10 = arith.constant 0 : index
    %5 = vector.load %arg3[%c0_8, %c0_9, %c0_10] : memref<2x16x64xf32, #tpu.memory_space<vmem>>, vector<1x16x64xf32>
    %6 = vector.shape_cast %5 : vector<1x16x64xf32> to vector<16x64xf32>
    %c0_11 = arith.constant 0 : index
    %c0_12 = arith.constant 0 : index
    %c0_13 = arith.constant 0 : index
    %7 = vector.load %arg4[%c0_11, %c0_12, %c0_13] : memref<2x1x128xf32, #tpu.memory_space<vmem>>, vector<1x1x128xf32>
    %8 = vector.shape_cast %7 : vector<1x1x128xf32> to vector<1x128xf32>
    %9 = vector.shape_cast %0 : vector<3x2x32xf32> to vector<6x32xf32>
    %cst = arith.constant dense<0.000000e+00> : vector<6x128xf32>
    %10 = tpu.matmul %9, %2, %cst {dimension_numbers = #tpu.dot_dimension_numbers<[1], [0], [0], [1], [0, 0, 1, 1], [], []>} : vector<6x32xf32>, vector<32x128xf32>, vector<6x128xf32> -> vector<6x128xf32>
    %11 = vector.broadcast %8 : vector<1x128xf32> to vector<6x128xf32>
    %12 = arith.addf %10, %11 : vector<6x128xf32>
    %13 = vector.shape_cast %12 : vector<6x128xf32> to vector<3x2x128xf32>
    %c0_14 = arith.constant 0 : index
    %c0_15 = arith.constant 0 : index
    %c0_16 = arith.constant 0 : index
    %14 = vector.load %arg9[%c0_14, %c0_15, %c0_16] : memref<3x2x128xf32, #tpu.memory_space<vmem>>, vector<3x2x128xf32>
    tpu.vector_store %arg9[%c0_14, %c0_15, %c0_16], %13 {strides = array<i32>} : memref<3x2x128xf32, #tpu.memory_space<vmem>>, vector<3x2x128xf32>,
    %cst_17 = arith.constant 0.000000e+00 : f32
    %15 = vector.broadcast %cst_17 : f32 to vector<2x16xf32>
    %c0_i32 = arith.constant 0 : i32
    %c3_i32 = arith.constant 3 : i32
    %16 = arith.addi %c0_i32, %c3_i32 : i32
    %c1_i32 = arith.constant 1 : i32
    %17:4 = scf.for %arg13 = %c0_i32 to %16 step %c1_i32 iter_args(%arg14 = %15, %arg15 = %15, %arg16 = %15, %arg17 = %15) -> (vector<2x16xf32>, vector<2x16xf32>, vector<2x16xf32>, vector<2x16xf32>)  : i32 {
      %97 = arith.index_cast %arg13 : i32 to index
      %c0_91 = arith.constant 0 : index
      %c0_92 = arith.constant 0 : index
      %98 = vector.load %arg9[%97, %c0_91, %c0_92] : memref<3x2x128xf32, #tpu.memory_space<vmem>>, vector<1x2x128xf32>
      %99 = vector.shape_cast %98 : vector<1x2x128xf32> to vector<2x128xf32>
      %100 = vector.extract_strided_slice %99 {offsets = [0, 0], sizes = [2, 64], strides = [1, 1]} : vector<2x128xf32> to vector<2x64xf32>
      %cst_93 = arith.constant dense<0.000000e+00> : vector<2x64xf32>
      %101 = tpu.matmul %arg14, %4, %cst_93 {dimension_numbers = #tpu.dot_dimension_numbers<[1], [0], [0], [1], [0, 0, 1, 1], [], []>} : vector<2x16xf32>, vector<16x64xf32>, vector<2x64xf32> -> vector<2x64xf32>
      %102 = arith.addf %100, %101 : vector<2x64xf32>
      %103 = vector.extract_strided_slice %102 {offsets = [0, 0], sizes = [2, 16], strides = [1, 1]} : vector<2x64xf32> to vector<2x16xf32>
      %104 = arith.negf %103 : vector<2x16xf32>
      %105 = math.exp %104 : vector<2x16xf32>
      %cst_94 = arith.constant 1.000000e+00 : f32
      %106 = vector.broadcast %cst_94 : f32 to vector<2x16xf32>
      %107 = arith.addf %106, %105 : vector<2x16xf32>
      %108 = arith.divf %106, %107 : vector<2x16xf32>
      %109 = vector.extract_strided_slice %102 {offsets = [0, 16], sizes = [2, 16], strides = [1, 1]} : vector<2x64xf32> to vector<2x16xf32>
      %110 = arith.negf %109 : vector<2x16xf32>
      %111 = math.exp %110 : vector<2x16xf32>
      %cst_95 = arith.constant 1.000000e+00 : f32
      %112 = vector.broadcast %cst_95 : f32 to vector<2x16xf32>
      %113 = arith.addf %112, %111 : vector<2x16xf32>
      %114 = arith.divf %112, %113 : vector<2x16xf32>
      %115 = vector.extract_strided_slice %102 {offsets = [0, 32], sizes = [2, 16], strides = [1, 1]} : vector<2x64xf32> to vector<2x16xf32>
      %116 = math.tanh %115 : vector<2x16xf32>
      %117 = vector.extract_strided_slice %102 {offsets = [0, 48], sizes = [2, 16], strides = [1, 1]} : vector<2x64xf32> to vector<2x16xf32>
      %118 = arith.negf %117 : vector<2x16xf32>
      %119 = math.exp %118 : vector<2x16xf32>
      %cst_96 = arith.constant 1.000000e+00 : f32
      %120 = vector.broadcast %cst_96 : f32 to vector<2x16xf32>
      %121 = arith.addf %120, %119 : vector<2x16xf32>
      %122 = arith.divf %120, %121 : vector<2x16xf32>
      %123 = arith.mulf %114, %arg15 : vector<2x16xf32>
      %124 = arith.mulf %108, %116 : vector<2x16xf32>
      %125 = arith.addf %123, %124 : vector<2x16xf32>
      %126 = math.tanh %125 : vector<2x16xf32>
      %127 = arith.mulf %122, %126 : vector<2x16xf32>
      %128 = arith.index_cast %arg13 : i32 to index
      %c0_97 = arith.constant 0 : index
      %c0_98 = arith.constant 0 : index
      %129 = vector.load %arg10[%128, %c0_97, %c0_98] : memref<3x2x16xf32, #tpu.memory_space<vmem>>, vector<1x2x16xf32>
      %130 = vector.shape_cast %129 : vector<1x2x16xf32> to vector<2x16xf32>
      %131 = vector.shape_cast %127 : vector<2x16xf32> to vector<1x2x16xf32>
      tpu.vector_store %arg10[%128, %c0_97, %c0_98], %131 {strides = array<i32>} : memref<3x2x16xf32, #tpu.memory_space<vmem>>, vector<1x2x16xf32>,
      %c2_i32 = arith.constant 2 : i32
      %132 = arith.subi %c2_i32, %arg13 : i32
      %133 = arith.index_cast %132 : i32 to index
      %c0_99 = arith.constant 0 : index
      %c0_100 = arith.constant 0 : index
      %134 = vector.load %arg9[%133, %c0_99, %c0_100] : memref<3x2x128xf32, #tpu.memory_space<vmem>>, vector<1x2x128xf32>
      %135 = vector.shape_cast %134 : vector<1x2x128xf32> to vector<2x128xf32>
      %136 = vector.extract_strided_slice %135 {offsets = [0, 64], sizes = [2, 64], strides = [1, 1]} : vector<2x128xf32> to vector<2x64xf32>
      %cst_101 = arith.constant dense<0.000000e+00> : vector<2x64xf32>
      %137 = tpu.matmul %arg16, %6, %cst_101 {dimension_numbers = #tpu.dot_dimension_numbers<[1], [0], [0], [1], [0, 0, 1, 1], [], []>} : vector<2x16xf32>, vector<16x64xf32>, vector<2x64xf32> -> vector<2x64xf32>
      %138 = arith.addf %136, %137 : vector<2x64xf32>
      %139 = vector.extract_strided_slice %138 {offsets = [0, 0], sizes = [2, 16], strides = [1, 1]} : vector<2x64xf32> to vector<2x16xf32>
      %140 = arith.negf %139 : vector<2x16xf32>
      %141 = math.exp %140 : vector<2x16xf32>
      %cst_102 = arith.constant 1.000000e+00 : f32
      %142 = vector.broadcast %cst_102 : f32 to vector<2x16xf32>
      %143 = arith.addf %142, %141 : vector<2x16xf32>
      %144 = arith.divf %142, %143 : vector<2x16xf32>
      %145 = vector.extract_strided_slice %138 {offsets = [0, 16], sizes = [2, 16], strides = [1, 1]} : vector<2x64xf32> to vector<2x16xf32>
      %146 = arith.negf %145 : vector<2x16xf32>
      %147 = math.exp %146 : vector<2x16xf32>
      %cst_103 = arith.constant 1.000000e+00 : f32
      %148 = vector.broadcast %cst_103 : f32 to vector<2x16xf32>
      %149 = arith.addf %148, %147 : vector<2x16xf32>
      %150 = arith.divf %148, %149 : vector<2x16xf32>
      %151 = vector.extract_strided_slice %138 {offsets = [0, 32], sizes = [2, 16], strides = [1, 1]} : vector<2x64xf32> to vector<2x16xf32>
      %152 = math.tanh %151 : vector<2x16xf32>
      %153 = vector.extract_strided_slice %138 {offsets = [0, 48], sizes = [2, 16], strides = [1, 1]} : vector<2x64xf32> to vector<2x16xf32>
      %154 = arith.negf %153 : vector<2x16xf32>
      %155 = math.exp %154 : vector<2x16xf32>
      %cst_104 = arith.constant 1.000000e+00 : f32
      %156 = vector.broadcast %cst_104 : f32 to vector<2x16xf32>
      %157 = arith.addf %156, %155 : vector<2x16xf32>
      %158 = arith.divf %156, %157 : vector<2x16xf32>
      %159 = arith.mulf %150, %arg17 : vector<2x16xf32>
      %160 = arith.mulf %144, %152 : vector<2x16xf32>
      %161 = arith.addf %159, %160 : vector<2x16xf32>
      %162 = math.tanh %161 : vector<2x16xf32>
      %163 = arith.mulf %158, %162 : vector<2x16xf32>
      %164 = arith.index_cast %132 : i32 to index
      %c0_105 = arith.constant 0 : index
      %c0_106 = arith.constant 0 : index
      %165 = vector.load %arg11[%164, %c0_105, %c0_106] : memref<3x2x16xf32, #tpu.memory_space<vmem>>, vector<1x2x16xf32>
      %166 = vector.shape_cast %165 : vector<1x2x16xf32> to vector<2x16xf32>
      %167 = vector.shape_cast %163 : vector<2x16xf32> to vector<1x2x16xf32>
      tpu.vector_store %arg11[%164, %c0_105, %c0_106], %167 {strides = array<i32>} : memref<3x2x16xf32, #tpu.memory_space<vmem>>, vector<1x2x16xf32>,
      scf.yield %127, %125, %163, %161 : vector<2x16xf32>, vector<2x16xf32>, vector<2x16xf32>, vector<2x16xf32>
    }
    %c3_i32_18 = arith.constant 3 : i32
    %c0_19 = arith.constant 0 : index
    %c0_20 = arith.constant 0 : index
    %c0_21 = arith.constant 0 : index
    %18 = vector.load %arg10[%c0_19, %c0_20, %c0_21] : memref<3x2x16xf32, #tpu.memory_space<vmem>>, vector<3x2x16xf32>
    %c0_22 = arith.constant 0 : index
    %c0_23 = arith.constant 0 : index
    %c0_24 = arith.constant 0 : index
    %19 = vector.load %arg12[%c0_22, %c0_23, %c0_24] : memref<3x2x32xf32, #tpu.memory_space<vmem>>, vector<3x2x16xf32>
    tpu.vector_store %arg12[%c0_22, %c0_23, %c0_24], %18 {strides = array<i32>} : memref<3x2x32xf32, #tpu.memory_space<vmem>>, vector<3x2x16xf32>,
    %c0_25 = arith.constant 0 : index
    %c0_26 = arith.constant 0 : index
    %c0_27 = arith.constant 0 : index
    %20 = vector.load %arg11[%c0_25, %c0_26, %c0_27] : memref<3x2x16xf32, #tpu.memory_space<vmem>>, vector<3x2x16xf32>
    %c0_28 = arith.constant 0 : index
    %c0_29 = arith.constant 0 : index
    %c16 = arith.constant 16 : index
    %21 = vector.load %arg12[%c0_28, %c0_29, %c16] : memref<3x2x32xf32, #tpu.memory_space<vmem>>, vector<3x2x16xf32>
    tpu.vector_store %arg12[%c0_28, %c0_29, %c16], %20 {strides = array<i32>} : memref<3x2x32xf32, #tpu.memory_space<vmem>>, vector<3x2x16xf32>,
    %c0_30 = arith.constant 0 : index
    %c0_31 = arith.constant 0 : index
    %c0_32 = arith.constant 0 : index
    %22 = vector.load %arg12[%c0_30, %c0_31, %c0_32] : memref<3x2x32xf32, #tpu.memory_space<vmem>>, vector<3x2x32xf32>
    %c1 = arith.constant 1 : index
    %c0_33 = arith.constant 0 : index
    %c0_34 = arith.constant 0 : index
    %23 = vector.load %arg1[%c1, %c0_33, %c0_34] : memref<2x32x128xf32, #tpu.memory_space<vmem>>, vector<1x32x128xf32>
    %24 = vector.shape_cast %23 : vector<1x32x128xf32> to vector<32x128xf32>
    %c1_35 = arith.constant 1 : index
    %c0_36 = arith.constant 0 : index
    %c0_37 = arith.constant 0 : index
    %25 = vector.load %arg2[%c1_35, %c0_36, %c0_37] : memref<2x16x64xf32, #tpu.memory_space<vmem>>, vector<1x16x64xf32>
    %26 = vector.shape_cast %25 : vector<1x16x64xf32> to vector<16x64xf32>
    %c1_38 = arith.constant 1 : index
    %c0_39 = arith.constant 0 : index
    %c0_40 = arith.constant 0 : index
    %27 = vector.load %arg3[%c1_38, %c0_39, %c0_40] : memref<2x16x64xf32, #tpu.memory_space<vmem>>, vector<1x16x64xf32>
    %28 = vector.shape_cast %27 : vector<1x16x64xf32> to vector<16x64xf32>
    %c1_41 = arith.constant 1 : index
    %c0_42 = arith.constant 0 : index
    %c0_43 = arith.constant 0 : index
    %29 = vector.load %arg4[%c1_41, %c0_42, %c0_43] : memref<2x1x128xf32, #tpu.memory_space<vmem>>, vector<1x1x128xf32>
    %30 = vector.shape_cast %29 : vector<1x1x128xf32> to vector<1x128xf32>
    %31 = vector.shape_cast %22 : vector<3x2x32xf32> to vector<6x32xf32>
    %cst_44 = arith.constant dense<0.000000e+00> : vector<6x128xf32>
    %32 = tpu.matmul %31, %24, %cst_44 {dimension_numbers = #tpu.dot_dimension_numbers<[1], [0], [0], [1], [0, 0, 1, 1], [], []>} : vector<6x32xf32>, vector<32x128xf32>, vector<6x128xf32> -> vector<6x128xf32>
    %33 = vector.broadcast %30 : vector<1x128xf32> to vector<6x128xf32>
    %34 = arith.addf %32, %33 : vector<6x128xf32>
    %35 = vector.shape_cast %34 : vector<6x128xf32> to vector<3x2x128xf32>
    %c0_45 = arith.constant 0 : index
    %c0_46 = arith.constant 0 : index
    %c0_47 = arith.constant 0 : index
    %36 = vector.load %arg9[%c0_45, %c0_46, %c0_47] : memref<3x2x128xf32, #tpu.memory_space<vmem>>, vector<3x2x128xf32>
    tpu.vector_store %arg9[%c0_45, %c0_46, %c0_47], %35 {strides = array<i32>} : memref<3x2x128xf32, #tpu.memory_space<vmem>>, vector<3x2x128xf32>,
    %cst_48 = arith.constant 0.000000e+00 : f32
    %37 = vector.broadcast %cst_48 : f32 to vector<2x16xf32>
    %c0_i32_49 = arith.constant 0 : i32
    %c3_i32_50 = arith.constant 3 : i32
    %38 = arith.addi %c0_i32_49, %c3_i32_50 : i32
    %c1_i32_51 = arith.constant 1 : i32
    %39:4 = scf.for %arg13 = %c0_i32_49 to %38 step %c1_i32_51 iter_args(%arg14 = %37, %arg15 = %37, %arg16 = %37, %arg17 = %37) -> (vector<2x16xf32>, vector<2x16xf32>, vector<2x16xf32>, vector<2x16xf32>)  : i32 {
      %97 = arith.index_cast %arg13 : i32 to index
      %c0_91 = arith.constant 0 : index
      %c0_92 = arith.constant 0 : index
      %98 = vector.load %arg9[%97, %c0_91, %c0_92] : memref<3x2x128xf32, #tpu.memory_space<vmem>>, vector<1x2x128xf32>
      %99 = vector.shape_cast %98 : vector<1x2x128xf32> to vector<2x128xf32>
      %100 = vector.extract_strided_slice %99 {offsets = [0, 0], sizes = [2, 64], strides = [1, 1]} : vector<2x128xf32> to vector<2x64xf32>
      %cst_93 = arith.constant dense<0.000000e+00> : vector<2x64xf32>
      %101 = tpu.matmul %arg14, %26, %cst_93 {dimension_numbers = #tpu.dot_dimension_numbers<[1], [0], [0], [1], [0, 0, 1, 1], [], []>} : vector<2x16xf32>, vector<16x64xf32>, vector<2x64xf32> -> vector<2x64xf32>
      %102 = arith.addf %100, %101 : vector<2x64xf32>
      %103 = vector.extract_strided_slice %102 {offsets = [0, 0], sizes = [2, 16], strides = [1, 1]} : vector<2x64xf32> to vector<2x16xf32>
      %104 = arith.negf %103 : vector<2x16xf32>
      %105 = math.exp %104 : vector<2x16xf32>
      %cst_94 = arith.constant 1.000000e+00 : f32
      %106 = vector.broadcast %cst_94 : f32 to vector<2x16xf32>
      %107 = arith.addf %106, %105 : vector<2x16xf32>
      %108 = arith.divf %106, %107 : vector<2x16xf32>
      %109 = vector.extract_strided_slice %102 {offsets = [0, 16], sizes = [2, 16], strides = [1, 1]} : vector<2x64xf32> to vector<2x16xf32>
      %110 = arith.negf %109 : vector<2x16xf32>
      %111 = math.exp %110 : vector<2x16xf32>
      %cst_95 = arith.constant 1.000000e+00 : f32
      %112 = vector.broadcast %cst_95 : f32 to vector<2x16xf32>
      %113 = arith.addf %112, %111 : vector<2x16xf32>
      %114 = arith.divf %112, %113 : vector<2x16xf32>
      %115 = vector.extract_strided_slice %102 {offsets = [0, 32], sizes = [2, 16], strides = [1, 1]} : vector<2x64xf32> to vector<2x16xf32>
      %116 = math.tanh %115 : vector<2x16xf32>
      %117 = vector.extract_strided_slice %102 {offsets = [0, 48], sizes = [2, 16], strides = [1, 1]} : vector<2x64xf32> to vector<2x16xf32>
      %118 = arith.negf %117 : vector<2x16xf32>
      %119 = math.exp %118 : vector<2x16xf32>
      %cst_96 = arith.constant 1.000000e+00 : f32
      %120 = vector.broadcast %cst_96 : f32 to vector<2x16xf32>
      %121 = arith.addf %120, %119 : vector<2x16xf32>
      %122 = arith.divf %120, %121 : vector<2x16xf32>
      %123 = arith.mulf %114, %arg15 : vector<2x16xf32>
      %124 = arith.mulf %108, %116 : vector<2x16xf32>
      %125 = arith.addf %123, %124 : vector<2x16xf32>
      %126 = math.tanh %125 : vector<2x16xf32>
      %127 = arith.mulf %122, %126 : vector<2x16xf32>
      %128 = arith.index_cast %arg13 : i32 to index
      %c0_97 = arith.constant 0 : index
      %c0_98 = arith.constant 0 : index
      %129 = vector.load %arg10[%128, %c0_97, %c0_98] : memref<3x2x16xf32, #tpu.memory_space<vmem>>, vector<1x2x16xf32>
      %130 = vector.shape_cast %129 : vector<1x2x16xf32> to vector<2x16xf32>
      %131 = vector.shape_cast %127 : vector<2x16xf32> to vector<1x2x16xf32>
      tpu.vector_store %arg10[%128, %c0_97, %c0_98], %131 {strides = array<i32>} : memref<3x2x16xf32, #tpu.memory_space<vmem>>, vector<1x2x16xf32>,
      %c2_i32 = arith.constant 2 : i32
      %132 = arith.subi %c2_i32, %arg13 : i32
      %133 = arith.index_cast %132 : i32 to index
      %c0_99 = arith.constant 0 : index
      %c0_100 = arith.constant 0 : index
      %134 = vector.load %arg9[%133, %c0_99, %c0_100] : memref<3x2x128xf32, #tpu.memory_space<vmem>>, vector<1x2x128xf32>
      %135 = vector.shape_cast %134 : vector<1x2x128xf32> to vector<2x128xf32>
      %136 = vector.extract_strided_slice %135 {offsets = [0, 64], sizes = [2, 64], strides = [1, 1]} : vector<2x128xf32> to vector<2x64xf32>
      %cst_101 = arith.constant dense<0.000000e+00> : vector<2x64xf32>
      %137 = tpu.matmul %arg16, %28, %cst_101 {dimension_numbers = #tpu.dot_dimension_numbers<[1], [0], [0], [1], [0, 0, 1, 1], [], []>} : vector<2x16xf32>, vector<16x64xf32>, vector<2x64xf32> -> vector<2x64xf32>
      %138 = arith.addf %136, %137 : vector<2x64xf32>
      %139 = vector.extract_strided_slice %138 {offsets = [0, 0], sizes = [2, 16], strides = [1, 1]} : vector<2x64xf32> to vector<2x16xf32>
      %140 = arith.negf %139 : vector<2x16xf32>
      %141 = math.exp %140 : vector<2x16xf32>
      %cst_102 = arith.constant 1.000000e+00 : f32
      %142 = vector.broadcast %cst_102 : f32 to vector<2x16xf32>
      %143 = arith.addf %142, %141 : vector<2x16xf32>
      %144 = arith.divf %142, %143 : vector<2x16xf32>
      %145 = vector.extract_strided_slice %138 {offsets = [0, 16], sizes = [2, 16], strides = [1, 1]} : vector<2x64xf32> to vector<2x16xf32>
      %146 = arith.negf %145 : vector<2x16xf32>
      %147 = math.exp %146 : vector<2x16xf32>
      %cst_103 = arith.constant 1.000000e+00 : f32
      %148 = vector.broadcast %cst_103 : f32 to vector<2x16xf32>
      %149 = arith.addf %148, %147 : vector<2x16xf32>
      %150 = arith.divf %148, %149 : vector<2x16xf32>
      %151 = vector.extract_strided_slice %138 {offsets = [0, 32], sizes = [2, 16], strides = [1, 1]} : vector<2x64xf32> to vector<2x16xf32>
      %152 = math.tanh %151 : vector<2x16xf32>
      %153 = vector.extract_strided_slice %138 {offsets = [0, 48], sizes = [2, 16], strides = [1, 1]} : vector<2x64xf32> to vector<2x16xf32>
      %154 = arith.negf %153 : vector<2x16xf32>
      %155 = math.exp %154 : vector<2x16xf32>
      %cst_104 = arith.constant 1.000000e+00 : f32
      %156 = vector.broadcast %cst_104 : f32 to vector<2x16xf32>
      %157 = arith.addf %156, %155 : vector<2x16xf32>
      %158 = arith.divf %156, %157 : vector<2x16xf32>
      %159 = arith.mulf %150, %arg17 : vector<2x16xf32>
      %160 = arith.mulf %144, %152 : vector<2x16xf32>
      %161 = arith.addf %159, %160 : vector<2x16xf32>
      %162 = math.tanh %161 : vector<2x16xf32>
      %163 = arith.mulf %158, %162 : vector<2x16xf32>
      %164 = arith.index_cast %132 : i32 to index
      %c0_105 = arith.constant 0 : index
      %c0_106 = arith.constant 0 : index
      %165 = vector.load %arg11[%164, %c0_105, %c0_106] : memref<3x2x16xf32, #tpu.memory_space<vmem>>, vector<1x2x16xf32>
      %166 = vector.shape_cast %165 : vector<1x2x16xf32> to vector<2x16xf32>
      %167 = vector.shape_cast %163 : vector<2x16xf32> to vector<1x2x16xf32>
      tpu.vector_store %arg11[%164, %c0_105, %c0_106], %167 {strides = array<i32>} : memref<3x2x16xf32, #tpu.memory_space<vmem>>, vector<1x2x16xf32>,
      scf.yield %127, %125, %163, %161 : vector<2x16xf32>, vector<2x16xf32>, vector<2x16xf32>, vector<2x16xf32>
    }
    %c3_i32_52 = arith.constant 3 : i32
    %c0_53 = arith.constant 0 : index
    %c0_54 = arith.constant 0 : index
    %c0_55 = arith.constant 0 : index
    %40 = vector.load %arg10[%c0_53, %c0_54, %c0_55] : memref<3x2x16xf32, #tpu.memory_space<vmem>>, vector<3x2x16xf32>
    %c0_56 = arith.constant 0 : index
    %c0_57 = arith.constant 0 : index
    %c0_58 = arith.constant 0 : index
    %41 = vector.load %arg12[%c0_56, %c0_57, %c0_58] : memref<3x2x32xf32, #tpu.memory_space<vmem>>, vector<3x2x16xf32>
    tpu.vector_store %arg12[%c0_56, %c0_57, %c0_58], %40 {strides = array<i32>} : memref<3x2x32xf32, #tpu.memory_space<vmem>>, vector<3x2x16xf32>,
    %c0_59 = arith.constant 0 : index
    %c0_60 = arith.constant 0 : index
    %c0_61 = arith.constant 0 : index
    %42 = vector.load %arg11[%c0_59, %c0_60, %c0_61] : memref<3x2x16xf32, #tpu.memory_space<vmem>>, vector<3x2x16xf32>
    %c0_62 = arith.constant 0 : index
    %c0_63 = arith.constant 0 : index
    %c16_64 = arith.constant 16 : index
    %43 = vector.load %arg12[%c0_62, %c0_63, %c16_64] : memref<3x2x32xf32, #tpu.memory_space<vmem>>, vector<3x2x16xf32>
    tpu.vector_store %arg12[%c0_62, %c0_63, %c16_64], %42 {strides = array<i32>} : memref<3x2x32xf32, #tpu.memory_space<vmem>>, vector<3x2x16xf32>,
    %c0_65 = arith.constant 0 : index
    %c0_66 = arith.constant 0 : index
    %c0_67 = arith.constant 0 : index
    %44 = vector.load %arg12[%c0_65, %c0_66, %c0_67] : memref<3x2x32xf32, #tpu.memory_space<vmem>>, vector<3x2x32xf32>
    %45 = vector.shape_cast %44 : vector<3x2x32xf32> to vector<6x32xf32>
    %c0_68 = arith.constant 0 : index
    %c0_69 = arith.constant 0 : index
    %46 = vector.load %arg5[%c0_68, %c0_69] : memref<32x32xf32, #tpu.memory_space<vmem>>, vector<32x32xf32>
    %cst_70 = arith.constant dense<0.000000e+00> : vector<6x32xf32>
    %47 = tpu.matmul %45, %46, %cst_70 {dimension_numbers = #tpu.dot_dimension_numbers<[1], [0], [0], [1], [0, 0, 1, 1], [], []>} : vector<6x32xf32>, vector<32x32xf32>, vector<6x32xf32> -> vector<6x32xf32>
    %c0_71 = arith.constant 0 : index
    %c0_72 = arith.constant 0 : index
    %48 = vector.load %arg6[%c0_71, %c0_72] : memref<1x32xf32, #tpu.memory_space<vmem>>, vector<1x32xf32>
    %49 = vector.broadcast %48 : vector<1x32xf32> to vector<6x32xf32>
    %50 = arith.addf %47, %49 : vector<6x32xf32>
    %51 = math.tanh %50 : vector<6x32xf32>
    %c0_73 = arith.constant 0 : index
    %c0_74 = arith.constant 0 : index
    %52 = vector.load %arg7[%c0_73, %c0_74] : memref<32x4xf32, #tpu.memory_space<vmem>>, vector<32x4xf32>
    %cst_75 = arith.constant dense<0.000000e+00> : vector<6x4xf32>
    %53 = tpu.matmul %51, %52, %cst_75 {dimension_numbers = #tpu.dot_dimension_numbers<[1], [0], [0], [1], [0, 0, 1, 1], [], []>} : vector<6x32xf32>, vector<32x4xf32>, vector<6x4xf32> -> vector<6x4xf32>
    %54 = vector.shape_cast %53 : vector<6x4xf32> to vector<3x2x4xf32>
    %cst_76 = arith.constant dense<0.000000e+00> : vector<3x2xf32>
    %55 = vector.multi_reduction <add>, %44, %cst_76 [2] : vector<3x2x32xf32> to vector<3x2xf32>
    %56 = vector.shape_cast %55 : vector<3x2xf32> to vector<3x2x1xf32>
    %cst_77 = arith.constant 0.000000e+00 : f32
    %57 = vector.broadcast %cst_77 : f32 to vector<3x2x1xf32>
    %58 = arith.cmpf oeq, %56, %57 : vector<3x2x1xf32>
    %cst_78 = arith.constant -1.000000e+10 : f32
    %59 = vector.shape_cast %58 : vector<3x2x1xi1> to vector<3x2x1xi1>
    %60 = vector.broadcast %59 : vector<3x2x1xi1> to vector<3x2x4xi1>
    %61 = vector.broadcast %cst_78 : f32 to vector<3x2x4xf32>
    %62 = arith.select %60, %61, %54 : vector<3x2x4xi1>, vector<3x2x4xf32>
    %cst_79 = arith.constant dense<0xFF800000> : vector<2x4xf32>
    %63 = vector.multi_reduction <maximumf>, %62, %cst_79 [0] : vector<3x2x4xf32> to vector<2x4xf32>
    %64 = vector.shape_cast %63 : vector<2x4xf32> to vector<1x2x4xf32>
    %65 = vector.broadcast %64 : vector<1x2x4xf32> to vector<3x2x4xf32>
    %66 = arith.subf %62, %65 : vector<3x2x4xf32>
    %67 = math.exp %66 : vector<3x2x4xf32>
    %cst_80 = arith.constant dense<0.000000e+00> : vector<2x4xf32>
    %68 = vector.multi_reduction <add>, %67, %cst_80 [0] : vector<3x2x4xf32> to vector<2x4xf32>
    %69 = vector.shape_cast %68 : vector<2x4xf32> to vector<1x2x4xf32>
    %70 = tpu.reciprocal %69 {approx = true} : vector<1x2x4xf32> -> vector<1x2x4xf32>
    %71 = vector.broadcast %70 : vector<1x2x4xf32> to vector<3x2x4xf32>
    %72 = arith.mulf %67, %71 : vector<3x2x4xf32>
    %73 = vector.extract_strided_slice %72 {offsets = [0, 0, 0], sizes = [3, 2, 1], strides = [1, 1, 1]} : vector<3x2x4xf32> to vector<3x2x1xf32>
    %74 = vector.extract_strided_slice %44 {offsets = [0, 0, 0], sizes = [3, 2, 8], strides = [1, 1, 1]} : vector<3x2x32xf32> to vector<3x2x8xf32>
    %75 = vector.broadcast %73 : vector<3x2x1xf32> to vector<3x2x8xf32>
    %76 = arith.mulf %75, %74 : vector<3x2x8xf32>
    %cst_81 = arith.constant dense<0.000000e+00> : vector<2x8xf32>
    %77 = vector.multi_reduction <add>, %76, %cst_81 [0] : vector<3x2x8xf32> to vector<2x8xf32>
    %c0_82 = arith.constant 0 : index
    %c0_83 = arith.constant 0 : index
    %78 = vector.load %arg8[%c0_82, %c0_83] : memref<2x32xf32, #tpu.memory_space<vmem>>, vector<2x8xf32>
    tpu.vector_store %arg8[%c0_82, %c0_83], %77 {strides = array<i32>} : memref<2x32xf32, #tpu.memory_space<vmem>>, vector<2x8xf32>,
    %79 = vector.extract_strided_slice %72 {offsets = [0, 0, 1], sizes = [3, 2, 1], strides = [1, 1, 1]} : vector<3x2x4xf32> to vector<3x2x1xf32>
    %80 = vector.extract_strided_slice %44 {offsets = [0, 0, 8], sizes = [3, 2, 8], strides = [1, 1, 1]} : vector<3x2x32xf32> to vector<3x2x8xf32>
    %81 = vector.broadcast %79 : vector<3x2x1xf32> to vector<3x2x8xf32>
    %82 = arith.mulf %81, %80 : vector<3x2x8xf32>
    %cst_84 = arith.constant dense<0.000000e+00> : vector<2x8xf32>
    %83 = vector.multi_reduction <add>, %82, %cst_84 [0] : vector<3x2x8xf32> to vector<2x8xf32>
    %c0_85 = arith.constant 0 : index
    %c8 = arith.constant 8 : index
    %84 = vector.load %arg8[%c0_85, %c8] : memref<2x32xf32, #tpu.memory_space<vmem>>, vector<2x8xf32>
    tpu.vector_store %arg8[%c0_85, %c8], %83 {strides = array<i32>} : memref<2x32xf32, #tpu.memory_space<vmem>>, vector<2x8xf32>,
    %85 = vector.extract_strided_slice %72 {offsets = [0, 0, 2], sizes = [3, 2, 1], strides = [1, 1, 1]} : vector<3x2x4xf32> to vector<3x2x1xf32>
    %86 = vector.extract_strided_slice %44 {offsets = [0, 0, 16], sizes = [3, 2, 8], strides = [1, 1, 1]} : vector<3x2x32xf32> to vector<3x2x8xf32>
    %87 = vector.broadcast %85 : vector<3x2x1xf32> to vector<3x2x8xf32>
    %88 = arith.mulf %87, %86 : vector<3x2x8xf32>
    %cst_86 = arith.constant dense<0.000000e+00> : vector<2x8xf32>
    %89 = vector.multi_reduction <add>, %88, %cst_86 [0] : vector<3x2x8xf32> to vector<2x8xf32>
    %c0_87 = arith.constant 0 : index
    %c16_88 = arith.constant 16 : index
    %90 = vector.load %arg8[%c0_87, %c16_88] : memref<2x32xf32, #tpu.memory_space<vmem>>, vector<2x8xf32>
    tpu.vector_store %arg8[%c0_87, %c16_88], %89 {strides = array<i32>} : memref<2x32xf32, #tpu.memory_space<vmem>>, vector<2x8xf32>,
    %91 = vector.extract_strided_slice %72 {offsets = [0, 0, 3], sizes = [3, 2, 1], strides = [1, 1, 1]} : vector<3x2x4xf32> to vector<3x2x1xf32>
    %92 = vector.extract_strided_slice %44 {offsets = [0, 0, 24], sizes = [3, 2, 8], strides = [1, 1, 1]} : vector<3x2x32xf32> to vector<3x2x8xf32>
    %93 = vector.broadcast %91 : vector<3x2x1xf32> to vector<3x2x8xf32>
    %94 = arith.mulf %93, %92 : vector<3x2x8xf32>
    %cst_89 = arith.constant dense<0.000000e+00> : vector<2x8xf32>
    %95 = vector.multi_reduction <add>, %94, %cst_89 [0] : vector<3x2x8xf32> to vector<2x8xf32>
    %c0_90 = arith.constant 0 : index
    %c24 = arith.constant 24 : index
    %96 = vector.load %arg8[%c0_90, %c24] : memref<2x32xf32, #tpu.memory_space<vmem>>, vector<2x8xf32>
    tpu.vector_store %arg8[%c0_90, %c24], %95 {strides = array<i32>} : memref<2x32xf32, #tpu.memory_space<vmem>>, vector<2x8xf32>,
    return
  }
}

</mosaic_0001>

<bundles_post_ra>
// kernel: forward_impl.4
= control target key start
LH: loop header
LB: loop body
LE: loop exit
PB: predicated region body
PF: predicated region fallthrough
CT: control target
= control target key end

     0   :  { %vm30_vm0 = vcmask 64512   ;;  %vm137_vm2 = vcmask 130048   ;;  %s333_s1 = inlined_call_operand.vmem [shape: f32[8,16], index: 1, kind: input, shape index: {}]   ;;  %s334_s0 = inlined_call_operand.vmem [shape: f32[16,8], index: 0, kind: input, shape index: {}]   ;;  %s335_s3 = inlined_call_operand.vmem [shape: f32[16,16], index: 3, kind: input, shape index: {}]   ;;  %s336_s2 = inlined_call_operand.vmem [shape: f32[1,16], index: 2, kind: input, shape index: {}]   ;;  %s337_s4 = inlined_call_operand.vmem [shape: f32[1,16], index: 4, kind: input, shape index: {}]   ;;  %s338_s5 = inlined_call_operand.vmem [shape: f32[16,16], index: 5, kind: output, shape index: {}]  }
   0x1   :  { %v22_v0 = vld [vmem:[%s333_s1] sm:$0xff]  ;;  %v21_v2 = vld [vmem:[%s334_s0 + $0x8] sm:$0xff] }
   0x2   :  { %v20_v1 = vld [vmem:[%s334_s0] sm:$0xff]  ;;  %254 = vmatprep.subr.mxu0 %v22_v0  ;;  %v113_v4 = vand.u32 2147483647, %v21_v2  ;;  %v129_v8 = vld [vmem:[%s335_s3 + $0x8] sm:$0xff] }
   0x3   :  { %256 = vmatprep.mubr.msk.f32.mxu0 %vm30_vm0, %v20_v1  ;;  %v112_v3 = vand.u32 2147483647, %v20_v1  ;;  %255 = vmatpush3.msra.mxu0 %v22_v0  ;;  %v128_v7 = vld [vmem:[%s335_s3] sm:$0xff] }
   0x4   :  { %257 = vmatmul.mubr.msk.f32.vlgmr.msra.gmra.mrb[0].mxu0 %vm30_vm0, %v21_v2  ;;  %v117_v6 = vsel %vm30_vm0, %v113_v4, 0.0  ;;  %v266_v9 = vpack.c.bf16 %v129_v8, %v128_v7  ;;  %v241_v11 = vld [vmem:[%s336_s2] ss:$0 sm:$0xff] }
   0x5   :  { %v114_v5 = vsel %vm30_vm0, %v112_v3, 0.0  ;;  %v244_v24 = vld [vmem:[%s337_s4] ss:$0 sm:$0xff] }
   0x6   :  { %115 = vadd.xlane.f32.xlu0 %v114_v5  ;;  %267 = vmatprep.subr.bf16.mxu1 %v266_v9 }
   0x7   :  { %269 = vmatpush3.bf16.msra.mxu1 %v266_v9 }
   0xa   :  { %118 = vadd.xlane.f32.xlu0 %v117_v6 }
  0x93   :  { %v116_v10 = vpop.xlane.xlu0 %115 }
  0x94   :  { %vm120_vm3 = vcmp.eq.f32.partialorder %v116_v10, 0.0 }
  0x97   :  { %v119_v12 = vpop.xlane.xlu0 %118 }
  0x98   :  { %vm121_vm1 = vcmp.eq.f32.partialorder %v119_v12, 0.0 }
  0xd7   :  { %v258_v13 = vpop.f32.mrb[0].mxu0 }
  0xd8   :  { %v109_v14 = vadd.f32 %v258_v13, %v241_v11  ;;  %v103_v15 = vpop.f32.mrb[1].mxu0 }
  0xd9   :  { %v104_v16 = vadd.f32 %v241_v11, %v103_v15 }
  0xda   :  { %v127_v17 = vsel %vm121_vm1, 0.0, %v109_v14 }
  0xdb   :  { %v126_v18 = vsel %vm120_vm3, 0.0, %v104_v16  ;;  %v220_v20 = vand.u32 2147483647, %v127_v17 }
  0xdc   :  { %263 = vmatprep.mubr.msk.f32.mxu1 %vm137_vm2, %v126_v18  ;;  %v219_v19 = vand.u32 2147483647, %v126_v18 }
  0xdd   :  { %264 = vmatmul.mubr.msk.f32.vlgmr.msra.gmra.mrb[0].mxu1 %vm137_vm2, %v127_v17  ;;  %v224_v22 = vsel %vm137_vm2, %v220_v20, 0.0 }
  0xde   :  { %v221_v21 = vsel %vm137_vm2, %v219_v19, 0.0 }
  0xdf   :  { %222 = vadd.xlane.f32.xlu1 %v221_v21 }
  0xe3   :  { %225 = vadd.xlane.f32.xlu1 %v224_v22 }
 0x16c   :  { %v223_v23 = vpop.xlane.xlu1 %222 }
 0x16d   :  { %vm227_vm5 = vcmp.eq.f32.partialorder %v223_v23, 0.0 }
 0x170   :  { %v226_v25 = vpop.xlane.xlu1 %225 }
 0x171   :  { %vm228_vm4 = vcmp.eq.f32.partialorder %v226_v25, 0.0 }
 0x1b0   :  { %v265_v26 = vpop.f32.mrb[0].mxu1 }
 0x1b1   :  { %v216_v27 = vadd.f32 %v265_v26, %v244_v24  ;;  %v210_v28 = vpop.f32.mrb[1].mxu1 }
 0x1b2   :  { %v211_v29 = vadd.f32 %v244_v24, %v210_v28 }
 0x1b3   :  { %v234_v30 = vsel %vm228_vm4, 0.0, %v216_v27 }
 0x1b4   :  { %236 = vst.msk [vmem:[%s338_s5 + $0x8] sm:$0xff] %vm137_vm2, %v234_v30  ;;  %v233_v31 = vsel %vm227_vm5, 0.0, %v211_v29 }
 0x1b5   :  { %235 = vst.msk [vmem:[%s338_s5] sm:$0xff] %vm137_vm2, %v233_v31 }

// kernel: forward_impl.5
= control target key start
LH: loop header
LB: loop body
LE: loop exit
PB: predicated region body
PF: predicated region fallthrough
CT: control target
= control target key end

     0   :  { %v54_v0 = vlaneseq  ;;  %v704_v4 = vmov 1983009808   ;;  %vm83_vm0 = vcmask 130048   ;;  %v799_v46 = vmov 0.0   ;;  %s921_s1 = inlined_call_operand.vmem [shape: f32[16,128], index: 1, kind: input, shape index: {}]   ;;  %s922_s2 = inlined_call_operand.vmem [shape: f32[16,64], index: 2, kind: input, shape index: {}]   ;;  %s923_s3 = inlined_call_operand.vmem [shape: f32[16,64], index: 3, kind: input, shape index: {}]   ;;  %s924_s5 = inlined_call_operand.vmem [shape: f32[8,2,32], index: 5, kind: output, shape index: {}]   ;;  %s925_s0 = inlined_call_operand.vmem [shape: f32[8,2,16], index: 0, kind: input, shape index: {}]   ;;  %s926_s4 = inlined_call_operand.vmem [shape: f32[1,128], index: 4, kind: input, shape index: {}]  }
   0x1   :  { %v28_v1 = vld [vmem:[%s921_s1] sm:$0xff]  ;;  %v29_v2 = vld [vmem:[%s921_s1 + $0x8] sm:$0xff]  ;;  %v52_v5 = vunpack.c.l.s4 %v704_v4  ;;  %v801_v47 = vmov 0.0   ;;  %v803_v48 = vmov 0.0   ;;  %v805_v49 = vmov 0.0  }
   0x2   :  { %v753_v3 = vld [vmem:[%s922_s2] sm:$0xff]  ;;  %v758_v6 = vld [vmem:[%s922_s2 + $0x8] sm:$0xff]  ;;  %v588_v9 = vpack.c.bf16 %v29_v2, %v28_v1  ;;  %v55_v10 = vshrl.u32 %v54_v0, 7 }
   0x3   :  { %v763_v7 = vld [vmem:[%s923_s3] sm:$0xff]  ;;  %v768_v8 = vld [vmem:[%s923_s3 + $0x8] sm:$0xff]  ;;  %v53_v14 = vunpack.c.0.s8 %v52_v5 }
   0x4   :  { %v20_v11 = vld [vmem:[%s925_s0] sm:$0x3]  ;;  %v21_v12 = vld [vmem:[%s925_s0 + $0x2] sm:$0x3]  ;;  %v22_v13 = vld [vmem:[%s925_s0 + $0x4] sm:$0x3]  ;;  %589 = vmatprep.subr.bf16.mxu0 %v588_v9 }
   0x5   :  { %v23_v15 = vld [vmem:[%s925_s0 + $0x6] sm:$0x3]  ;;  %v49_v16 = vcombine.low %v20_v11, %v21_v12  ;;  %v24_v17 = vld [vmem:[%s925_s0 + $0x8] sm:$0x3]  ;;  %v25_v18 = vld [vmem:[%s925_s0 + $0xa] sm:$0x3]  ;;  %591 = vmatpush3.bf16.msra.mxu0 %v588_v9  ;;  %v56_v20 = vsub.s32 %v53_v14, %v55_v10 }
   0x6   :  { %v50_v19 = vcombine.low %v22_v13, %v23_v15  ;;  %v26_v21 = vld [vmem:[%s925_s0 + $0xc] sm:$0x3]  ;;  %v27_v22 = vld [vmem:[%s925_s0 + $0xe] sm:$0x3]  ;;  %v66_v23 = vcombine.low %v24_v17, %v25_v18  ;;  %v544_v31 = vld [vmem:[%s926_s4] ss:$0 sm:$0xff] }
   0x7   :  { %v67_v24 = vcombine.low %v26_v21, %v27_v22  ;;  %v57_v25 = vrot.slane %v49_v16, %v56_v20  ;;  %s807_s0 = smov 0  }
   0x8   :  { %v64_v26 = vrot.slane %v50_v19, %v56_v20  ;;  %v74_v27 = vrot.slane %v66_v23, %v56_v20 }
   0x9   :  { %v81_v28 = vrot.slane %v67_v24, %v56_v20 }
   0xa   :  { %v65_v29 = vcombine.low %v57_v25, %v64_v26 }
   0xb   :  { %v82_v30 = vcombine.low %v74_v27, %v81_v28 }
   0xc   :  { %571 = vmatprep.mubr.msk.f32.mxu0 %vm83_vm0, %v65_v29 }
   0xd   :  { %572 = vmatmul.mubr.msk.f32.vlgmr.msra.gmra.mrb[0].mxu0 %vm83_vm0, %v82_v30 }
  0xe0   :  { %v573_v32 = vpop.f32.mrb[0].mxu0 }
  0xe1   :  { %v160_v33 = vadd.f32 %v573_v32, %v544_v31  ;;  %v154_v34 = vpop.f32.mrb[1].mxu0 }
  0xe2   :  { %v155_v35 = vadd.f32 %v544_v31, %v154_v34 }
  0xe3   :  { %v182_v36 = vcombine.high %v160_v33, %v160_v33  ;;  %v189_v37 = vrot.slane %v160_v33, %v56_v20  ;;  %549 = vst.sshfl [vmem:[#allocation2 + $0x8] sm:$0x3 pattern:$0x76325410] %v160_v33 }
  0xe4   :  { %v165_v38 = vcombine.high %v155_v35, %v155_v35  ;;  %v172_v39 = vrot.slane %v155_v35, %v56_v20  ;;  %547 = vst.sshfl [vmem:[#allocation2] sm:$0x3 pattern:$0x76325410] %v155_v35 }
  0xe5   :  { %v196_v40 = vrot.slane %v182_v36, %v56_v20  ;;  %v197_v41 = vcombine.high %v189_v37, %v189_v37  ;;  %550 = vst.sshfl [vmem:[#allocation2 + $0xc] sm:$0x3 pattern:$0x76325410] %v182_v36 }
  0xe6   :  { %v179_v42 = vrot.slane %v165_v38, %v56_v20  ;;  %v180_v43 = vcombine.high %v172_v39, %v172_v39  ;;  %548 = vst.sshfl [vmem:[#allocation2 + $0x4] sm:$0x3 pattern:$0x76325410] %v165_v38 }
  0xe7   :  { %v198_v44 = vcombine.high %v196_v40, %v196_v40  ;;  %212 = vst [vmem:[#allocation2 + $0xa] sm:$0x3] %v197_v41 }
  0xe8   :  { %v181_v45 = vcombine.high %v179_v42, %v179_v42  ;;  %208 = vst [vmem:[#allocation2 + $0x2] sm:$0x3] %v180_v43 }
  0xe9   :  { %214 = vst [vmem:[#allocation2 + $0xe] sm:$0x3] %v198_v44 }
  0xea   :  { %210 = vst [vmem:[#allocation2 + $0x6] sm:$0x3] %v181_v45 }
  0xeb LB: > { %v596_v50 = vpack.c.bf16 %v768_v8, %v763_v7  ;;  %v705_v51 = vmov 0.0|0.0   ;;  %s706_s4 = smov 16   ;;  %v593_v52 = vpack.c.bf16 %v758_v6, %v753_v3  ;;  %vm707_vm1 = vmmov 0   ;;  %s709_s20 = smov 80   ;;  %s702_s0 = sphi %s807_s0, %s220_s0   ;;  %v698_v49 = vphi %v805_v49, %v327_v49   ;;  %v694_v48 = vphi %v803_v48, %v321_v48   ;;  %v690_v47 = vphi %v801_v47, %v442_v47   ;;  %v686_v46 = vphi %v799_v46, %v436_v46  }
  0xec   : > { %595 = vmatprep.subr.bf16.mxu1 %v705_v51  ;;  %592 = vmatprep.subr.bf16.mxu0 %v705_v51  ;;  %v708_v53 = vmov 0.0   ;;  %s551_s21 = sshll.u32 %s702_s0, 1  ;;  %s710_s22 = smov 64   ;;  %vm333_vm2 = vcmask 123904  }
  0xed   : > { %340 = vrot.lane.b32.xlu0 %v690_v47, %s706_s4  ;;  %597 = vmatpush3.bf16.msra.mxu1 %v596_v50  ;;  %s226_s23 = scalar_lea.vmem [#allocation2], %s551_s21  ;;  %s711_s24 = smov 96  }
  0xee   : > { %585 = vmatprep.mubr.msk.f32.mxu1 %vm707_vm1, %v708_v53  ;;  %578 = vmatprep.mubr.msk.f32.mxu0 %vm707_vm1, %v708_v53  ;;  %s335_s25 = ssub.s32 7, %s702_s0  ;;  %s712_s28 = smov 32  }
  0xef   : > { %594 = vmatpush3.bf16.msra.mxu0 %v593_v52  ;;  %s832_s26 = sshll.u32 %s335_s25, 1  ;;  %s332_s29 = scalar_lea.vmem [#allocation3], %s551_s21 }
  0xf0   : > { %s337_s27 = scalar_lea.vmem [#allocation2], %s832_s26  ;;  %s447_s1 = scalar_lea.vmem [#allocation4], %s832_s26 }
  0xf1   : > { %229 = vrot.lane.b32.xlu0 %v698_v49, %s709_s20  ;;  %v227_v58 = vld [vmem:[%s226_s23] sm:$0x3]  ;;  %s220_s0 = sadd.s32 1, %s702_s0  }
  0xf2   : > { %v338_v1 = vld [vmem:[%s337_s27] sm:$0x3]  ;;  %p217_p0 = scmp.ge.s32.totalorder %s220_s0, 8  }
  0xf3   :  { %s713_s30 = smov (%p217_p0), 16   ;;  %vm506_vm3 = vcmask (%p217_p0), 255104  }
 0x15f   : > { %v341_v54 = vpop.permute.xlu0 %340 }
 0x160   : > { %586 = vmatmul.mubr.msk.f32.vlgmr.msra.gmra.mrb[0].mxu1 %vm83_vm0, %v341_v54 }
 0x163   : > { %v230_v55 = vpop.permute.xlu0 %229 }
 0x164   : > { %579 = vmatmul.mubr.msk.f32.vlgmr.msra.gmra.mrb[0].mxu0 %vm83_vm0, %v230_v55 }
 0x233   : > { %v410_v56 = vpop.f32.mrb[0].mxu1 }
 0x234   : > { %415 = vrot.lane.b32.xlu1 %v410_v56, %s710_s22  ;;  %v587_v57 = vpop.f32.mrb[1].mxu1 }
 0x237   : > { %v299_v59 = vpop.f32.mrb[0].mxu0 }
 0x238   : > { %v303_v60 = vadd.f32 %v299_v59, %v227_v58  ;;  %v580_v61 = vpop.f32.mrb[1].mxu0 }
 0x23a   : > { %648 = vtanh.f32 %v303_v60  ;;  %v553_v63 = vmul.f32 -1.442695, %v303_v60 }
 0x23c   : > { %650 = vpow2.f32 %v553_v63 }
 0x244   : > { %v649_v62 = vpop.eup %648 }
 0x245   : > { %313 = vrot.lane.b32.xlu1 %v649_v62, %s711_s24 }
 0x246   : > { %v651_v0 = vpop.eup %650 }
 0x247   : > { %v307_v4 = vadd.f32 1.0, %v651_v0 }
 0x2a6   : > { %v416_v2 = vpop.permute.xlu1 %415 }
 0x2a7   : > { %v418_v5 = vadd.f32 %v416_v2, %v338_v1 }
 0x2a9   : > { %652 = vtanh.f32 %v418_v5  ;;  %v556_v13 = vmul.f32 -1.442695, %v418_v5 }
 0x2aa   : > { %654 = vrcp.f32 %v307_v4 }
 0x2ab   : > { %656 = vpow2.f32 %v556_v13 }
 0x2b3   : > { %v653_v9 = vpop.eup %652 }
 0x2b4   : > { %428 = vrot.lane.b32.xlu0 %v653_v9, %s711_s24  ;;  %v655_v10 = vpop.eup %654 }
 0x2b5   : > { %v657_v14 = vpop.eup %656  ;;  %v311_v19 = vmul.f32 %v694_v48, %v655_v10 }
 0x2b6   : > { %v422_v15 = vadd.f32 1.0, %v657_v14 }
 0x2b7   : > { %v314_v11 = vpop.permute.xlu1 %313 }
 0x2b8   : > { %v316_v12 = vmul.f32 %v655_v10, %v314_v11  ;;  %658 = vrcp.f32 %v422_v15 }
 0x2ba   : > { %318 = vrot.lane.b32.xlu1 %v316_v12, %s706_s4 }
 0x2c2   : > { %v659_v16 = vpop.eup %658 }
 0x2c3   : > { %v426_v22 = vmul.f32 %v686_v46, %v659_v16 }
 0x326   : > { %v429_v17 = vpop.permute.xlu0 %428 }
 0x327   : > { %v431_v18 = vmul.f32 %v659_v16, %v429_v17 }
 0x329   : > { %433 = vrot.lane.b32.xlu0 %v431_v18, %s706_s4 }
 0x32c   : > { %v319_v20 = vpop.permute.xlu1 %318 }
 0x32d   : > { %v321_v48 = vadd.f32 %v319_v20, %v311_v19  }
 0x32f   : > { %660 = vtanh.f32 %v321_v48 }
 0x339   : > { %v661_v21 = vpop.eup %660 }
 0x33a   : > { %324 = vrot.lane.b32.xlu1 %v661_v21, %s712_s28 }
 0x39b   : > { %v434_v23 = vpop.permute.xlu0 %433 }
 0x39c   : > { %v436_v46 = vadd.f32 %v434_v23, %v426_v22  }
 0x39e   : > { %662 = vtanh.f32 %v436_v46 }
 0x3a8   : > { %v663_v24 = vpop.eup %662 }
 0x3a9   : > { %439 = vrot.lane.b32.xlu0 %v663_v24, %s712_s28 }
 0x3ac   : > { %v325_v25 = vpop.permute.xlu1 %324 }
 0x3ad   : > { %v327_v49 = vmul.f32 %v655_v10, %v325_v25  }
 0x3af   : > { %329 = vrot.lane.b32.xlu1 %v327_v49, %s709_s20 }
 0x41b   : > { %v440_v26 = vpop.permute.xlu0 %439 }
 0x41c   : > { %v442_v47 = vmul.f32 %v659_v16, %v440_v26  }
 0x41e   : > { %444 = vrot.lane.b32.xlu0 %v442_v47, %s706_s4 }
 0x421   : > { %v330_v27 = vpop.permute.xlu1 %329 }
 0x422   : > { %334 = vst.msk [vmem:[%s332_s29] sm:$0x3] %vm333_vm2, %v330_v27 }
 0x429   :  { %v451_v33 = vld [vmem:[#allocation3 + $0x4] sm:$0x3] (%p217_p0)  ;;  %v449_v34 = vld [vmem:[#allocation3] sm:$0x3] (%p217_p0)  ;;  %v452_v35 = vld [vmem:[#allocation3 + $0x6] sm:$0x3] (%p217_p0) }
 0x42a   :  { %460 = vst.msk [vmem:[%s924_s5 + $0x4] sm:$0x3] (%p217_p0), %vm333_vm2, %v451_v33  ;;  %458 = vst.msk [vmem:[%s924_s5] sm:$0x3] (%p217_p0), %vm333_vm2, %v449_v34  ;;  %v450_v3 = vld [vmem:[#allocation3 + $0x2] sm:$0x3] (%p217_p0) }
 0x42b   :  { %461 = vst.msk [vmem:[%s924_s5 + $0x6] sm:$0x3] (%p217_p0), %vm333_vm2, %v452_v35  ;;  %v454_v6 = vld [vmem:[#allocation3 + $0xa] sm:$0x3] (%p217_p0)  ;;  %v453_v7 = vld [vmem:[#allocation3 + $0x8] sm:$0x3] (%p217_p0) }
 0x42c   :  { %459 = vst.msk [vmem:[%s924_s5 + $0x2] sm:$0x3] (%p217_p0), %vm333_vm2, %v450_v3  ;;  %463 = vst.msk [vmem:[%s924_s5 + $0xa] sm:$0x3] (%p217_p0), %vm333_vm2, %v454_v6  ;;  %v456_v8 = vld [vmem:[#allocation3 + $0xe] sm:$0x3] (%p217_p0) }
 0x42d   :  { %462 = vst.msk [vmem:[%s924_s5 + $0x8] sm:$0x3] (%p217_p0), %vm333_vm2, %v453_v7  ;;  %v455_v36 = vld [vmem:[#allocation3 + $0xc] sm:$0x3] (%p217_p0)  ;;  %465 = vst.msk [vmem:[%s924_s5 + $0xe] sm:$0x3] (%p217_p0), %vm333_vm2, %v456_v8 }
 0x42e   :  { %464 = vst.msk [vmem:[%s924_s5 + $0xc] sm:$0x3] (%p217_p0), %vm333_vm2, %v455_v36 }
 0x48b   :  { %219 = sbr.rel (!%p217_p0) target bundleno = 235 (0xeb), region = 51 }
 0x490   : > { %v445_v28 = vpop.permute.xlu0 %444 }
 0x491   : > { %448 = vst.msk [vmem:[%s447_s1] sm:$0x3] %vm333_vm2, %v445_v28 }
 0x498   :  { %v468_v29 = vld [vmem:[#allocation4 + $0x4] sm:$0x3]  ;;  %v466_v30 = vld [vmem:[#allocation4] sm:$0x3]  ;;  %v469_v31 = vld [vmem:[#allocation4 + $0x6] sm:$0x3] }
 0x499   :  { %486 = vrot.lane.b32.xlu1 %v468_v29, %s713_s30  ;;  %482 = vrot.lane.b32.xlu0 %v466_v30, %s713_s30  ;;  %v467_v32 = vld [vmem:[#allocation4 + $0x2] sm:$0x3]  ;;  %v471_v37 = vld [vmem:[#allocation4 + $0xa] sm:$0x3]  ;;  %v470_v38 = vld [vmem:[#allocation4 + $0x8] sm:$0x3] }
 0x49a   :  { %v473_v39 = vld [vmem:[#allocation4 + $0xe] sm:$0x3]  ;;  %v472_v40 = vld [vmem:[#allocation4 + $0xc] sm:$0x3] }
 0x49d   :  { %488 = vrot.lane.b32.xlu1 %v469_v31, %s713_s30  ;;  %484 = vrot.lane.b32.xlu0 %v467_v32, %s713_s30 }
 0x4a1   :  { %492 = vrot.lane.b32.xlu1 %v471_v37, %s713_s30  ;;  %490 = vrot.lane.b32.xlu0 %v470_v38, %s713_s30 }
 0x4a5   :  { %496 = vrot.lane.b32.xlu1 %v473_v39, %s713_s30  ;;  %494 = vrot.lane.b32.xlu0 %v472_v40, %s713_s30 }
 0x50b   :  { %v487_v41 = vpop.permute.xlu1 %486  ;;  %v483_v42 = vpop.permute.xlu0 %482 }
 0x50c   :  { %509 = vst.msk [vmem:[%s924_s5 + $0x4] sm:$0x3] %vm506_vm3, %v487_v41  ;;  %507 = vst.msk [vmem:[%s924_s5] sm:$0x3] %vm506_vm3, %v483_v42 }
 0x50f   :  { %v489_v43 = vpop.permute.xlu1 %488  ;;  %v485_v44 = vpop.permute.xlu0 %484 }
 0x510   :  { %510 = vst.msk [vmem:[%s924_s5 + $0x6] sm:$0x3] %vm506_vm3, %v489_v43  ;;  %508 = vst.msk [vmem:[%s924_s5 + $0x2] sm:$0x3] %vm506_vm3, %v485_v44 }
 0x513   :  { %v493_v45 = vpop.permute.xlu1 %492  ;;  %v491_v46 = vpop.permute.xlu0 %490 }
 0x514   :  { %512 = vst.msk [vmem:[%s924_s5 + $0xa] sm:$0x3] %vm506_vm3, %v493_v45  ;;  %511 = vst.msk [vmem:[%s924_s5 + $0x8] sm:$0x3] %vm506_vm3, %v491_v46 }
 0x517   :  { %v497_v47 = vpop.permute.xlu1 %496  ;;  %v495_v48 = vpop.permute.xlu0 %494 }
 0x518   :  { %514 = vst.msk [vmem:[%s924_s5 + $0xe] sm:$0x3] %vm506_vm3, %v497_v47  ;;  %513 = vst.msk [vmem:[%s924_s5 + $0xc] sm:$0x3] %vm506_vm3, %v495_v48 }

// kernel: forward_impl.6
= control target key start
LH: loop header
LB: loop body
LE: loop exit
PB: predicated region body
PF: predicated region fallthrough
CT: control target
= control target key end

     0   :  { %vm33_vm0 = vcmask 261120   ;;  %v136_v35 = vlaneseq  ;;  %vm153_vm2 = vcmask 59392   ;;  %vm1137_vm4 = vmmov 0   ;;  %s1138_s15 = smov 112   ;;  %s1139_s16 = smov 104   ;;  %s1384_s2 = inlined_call_operand.vmem [shape: f32[32,32], index: 2, kind: input, shape index: {}]   ;;  %s1385_s0 = inlined_call_operand.vmem [shape: f32[2,8,32], index: 0, kind: input, shape index: {}]   ;;  %s1386_s3 = inlined_call_operand.vmem [shape: f32[1,32], index: 3, kind: input, shape index: {}]   ;;  %s1387_s4 = inlined_call_operand.vmem [shape: f32[4,32], index: 4, kind: input, shape index: {}]   ;;  %s1388_s1 = inlined_call_operand.vmem [shape: f32[2,3,8], index: 1, kind: input, shape index: {}]   ;;  %s1389_s5 = inlined_call_operand.vmem [shape: f32[2,3,32], index: 5, kind: output, shape index: {}]  }
   0x1   :  { %v22_v0 = vld [vmem:[%s1384_s2] sm:$0xff]  ;;  %v23_v1 = vld [vmem:[%s1384_s2 + $0x8] sm:$0xff]  ;;  %v24_v2 = vld [vmem:[%s1384_s2 + $0x10] sm:$0xff]  ;;  %vm182_vm9 = vcmask 64512   ;;  %s1140_s21 = smov 8   ;;  %s1141_s22 = smov 16  }
   0x2   :  { %v1083_v3 = vpack.c.bf16 %v23_v1, %v22_v0  ;;  %v25_v4 = vld [vmem:[%s1384_s2 + $0x18] sm:$0xff]  ;;  %v1188_v5 = vld [vmem:[%s1385_s0] sm:$0xff]  ;;  %v1195_v7 = vld [vmem:[%s1385_s0 + $0x8] sm:$0xff]  ;;  %v137_v36 = vand.u32 127, %v136_v35  ;;  %v139_v37 = vshrl.u32 %v136_v35, 7  ;;  %s1142_s23 = smov 24  }
   0x3   :  { %v1087_v6 = vpack.c.bf16 %v25_v4, %v24_v2  ;;  %1040 = vmatprep.mubr.msk.f32.mxu0 %vm33_vm0, %v1188_v5  ;;  %v995_v8 = vld [vmem:[%s1386_s3] ss:$0 sm:$0xff]  ;;  %v1001_v13 = vld [vmem:[%s1387_s4 + $0x1] ss:$0 sm:$0xff]  ;;  %v1004_v23 = vld [vmem:[%s1387_s4 + $0x2] ss:$0 sm:$0xff] }
   0x4   :  { %1084 = vmatprep.subr.bf16.mxu0 %v1083_v3  ;;  %v998_v14 = vld [vmem:[%s1387_s4] ss:$0 sm:$0xff]  ;;  %v1007_v28 = vld [vmem:[%s1387_s4 + $0x3] ss:$0 sm:$0xff]  ;;  %v140_v38 = vsub.s32 %v137_v36, %v139_v37  ;;  %v1233_v45 = vld [vmem:[%s1388_s1 + $0x4] sm:$0x7] }
   0x5   :  { %1086 = vmatpush3.bf16.msra.mxu0 %v1083_v3  ;;  %v1225_v39 = vld [vmem:[%s1388_s1] sm:$0x7]  ;;  %vm133_vm3 = vcmp.gt.f32.partialorder %v1233_v45, 0.5  ;;  %s1135_s1 = smov 120   ;;  %vm548_vm14 = vcmask 124992   ;;  %vm768_vm15 = vcmask 190592  }
   0x6   :  { %1088 = vmatprep.subr.bf16.mxu0 %v1087_v6  ;;  %vm132_vm1 = vcmp.gt.f32.partialorder %v1225_v39, 0.5 }
   0x9   :  { %1090 = vmatpush3.bf16.msra.mxu0 %v1087_v6 }
   0xc   :  { %1041 = vmatmul.mubr.msk.f32.vlgmr.msra.gmra.mrb[0].mxu0 %vm33_vm0, %v1195_v7 }
  0xdf   :  { %v1042_v9 = vpop.f32.mrb[0].mxu0 }
  0xe0   :  { %v112_v10 = vadd.f32 %v1042_v9, %v995_v8  ;;  %v106_v11 = vpop.f32.mrb[1].mxu0 }
  0xe1   :  { %v107_v12 = vadd.f32 %v995_v8, %v106_v11 }
  0xe2   :  { %1099 = vtanh.f32 %v112_v10 }
  0xe3   :  { %1101 = vtanh.f32 %v107_v12 }
  0xec   :  { %v1100_v15 = vpop.eup %1099 }
  0xed   :  { %v1102_v16 = vpop.eup %1101  ;;  %v337_v17 = vmul.f32 %v1100_v15, %v1001_v13  ;;  %v125_v22 = vmul.f32 %v1100_v15, %v998_v14  ;;  %v557_v25 = vmul.f32 %v1100_v15, %v1004_v23  ;;  %v777_v30 = vmul.f32 %v1100_v15, %v1007_v28 }
  0xee   :  { %v124_v18 = vmul.f32 %v1102_v16, %v998_v14  ;;  %v336_v20 = vmul.f32 %v1102_v16, %v1001_v13  ;;  %v556_v27 = vmul.f32 %v1102_v16, %v1004_v23  ;;  %v776_v32 = vmul.f32 %v1102_v16, %v1007_v28 }
  0xef   :  { %v341_v19 = vsel %vm33_vm0, %v337_v17, 0.0  ;;  %v129_v26 = vsel %vm33_vm0, %v125_v22, 0.0  ;;  %v561_v29 = vsel %vm33_vm0, %v557_v25, 0.0  ;;  %v781_v33 = vsel %vm33_vm0, %v777_v30, 0.0 }
  0xf0   :  { %342 = vadd.xlane.f32.xlu1 %v341_v19  ;;  %v126_v21 = vsel %vm33_vm0, %v124_v18, 0.0  ;;  %v338_v24 = vsel %vm33_vm0, %v336_v20, 0.0  ;;  %v558_v31 = vsel %vm33_vm0, %v556_v27, 0.0  ;;  %v778_v34 = vsel %vm33_vm0, %v776_v32, 0.0 }
  0xf1   :  { %127 = vadd.xlane.f32.xlu0 %v126_v21  ;;  %vm988_vm0 = vcmask 256192  }
  0xf4   :  { %339 = vadd.xlane.f32.xlu1 %v338_v24 }
  0xf5   :  { %130 = vadd.xlane.f32.xlu0 %v129_v26 }
  0xf8   :  { %562 = vadd.xlane.f32.xlu1 %v561_v29 }
  0xf9   :  { %559 = vadd.xlane.f32.xlu0 %v558_v31 }
  0xfc   :  { %782 = vadd.xlane.f32.xlu1 %v781_v33 }
  0xfd   :  { %779 = vadd.xlane.f32.xlu0 %v778_v34 }
 0x17d   :  { %v343_v40 = vpop.xlane.xlu1 %342 }
 0x17e   :  { %v128_v41 = vpop.xlane.xlu0 %127  ;;  %v353_v49 = vrot.slane %v343_v40, %v140_v38 }
 0x17f   :  { %v141_v42 = vrot.slane %v128_v41, %v140_v38 }
 0x180   :  { %v359_v59 = vsel %vm133_vm3, %v353_v49, -1e+30 }
 0x181   :  { %v340_v43 = vpop.xlane.xlu1 %339  ;;  %v151_v44 = vsel %vm132_vm1, %v141_v42, -1e+30  ;;  %v363_v63 = vsel %vm153_vm2, %v359_v59, -inf }
 0x182   :  { %v349_v46 = vrot.slane %v340_v43, %v140_v38  ;;  %v131_v47 = vpop.xlane.xlu0 %130  ;;  %v154_v48 = vsel %vm153_vm2, %v151_v44, -inf }
 0x183   :  { %v145_v50 = vrot.slane %v131_v47, %v140_v38  ;;  %155 = vmax.xlane.f32.xlu0 %v154_v48 }
 0x184   :  { %v1238_v51 = vsel %vm132_vm1, %v349_v46, -1e+30  ;;  %v1136_v46 = vmov 0.0  }
 0x185   :  { %v563_v52 = vpop.xlane.xlu1 %562  ;;  %v360_v53 = vsel %vm153_vm2, %v1238_v51, -inf  ;;  %v152_v54 = vsel %vm133_vm3, %v145_v50, -1e+30  ;;  %1043 = vmatprep.subr.mxu1 %v1136_v46  ;;  %1058 = vmatprep.subr.mxu0 %v1136_v46 }
 0x186   :  { %v560_v55 = vpop.xlane.xlu0 %559  ;;  %v157_v56 = vsel %vm153_vm2, %v152_v54, -inf  ;;  %v573_v57 = vrot.slane %v563_v52, %v140_v38  ;;  %1044 = vmatpush3.msra.mxu1 %v1188_v5  ;;  %1045 = vmatprep.mubr.msk.f32.mxu1 %vm1137_vm4, %v1136_v46 }
 0x187   :  { %v569_v58 = vrot.slane %v560_v55, %v140_v38  ;;  %361 = vmax.xlane.f32.xlu0 %v360_v53  ;;  %158 = vmax.xlane.f32.xlu1 %v157_v56 }
 0x188   :  { %v579_v3 = vsel %vm133_vm3, %v573_v57, -1e+30  ;;  %1048 = vmatprep.subr.mxu1 %v1136_v46  ;;  %1060 = vmatprep.mubr.msk.f32.mxu0 %vm1137_vm4, %v1136_v46 }
 0x189   :  { %v783_v60 = vpop.xlane.xlu1 %782  ;;  %v1250_v61 = vsel %vm132_vm1, %v569_v58, -1e+30  ;;  %v583_v6 = vsel %vm153_vm2, %v579_v3, -inf }
 0x18a   :  { %v780_v62 = vpop.xlane.xlu0 %779  ;;  %v580_v0 = vsel %vm153_vm2, %v1250_v61, -inf  ;;  %v793_v1 = vrot.slane %v783_v60, %v140_v38 }
 0x18b   :  { %v789_v2 = vrot.slane %v780_v62, %v140_v38  ;;  %364 = vmax.xlane.f32.xlu1 %v363_v63  ;;  %581 = vmax.xlane.f32.xlu0 %v580_v0 }
 0x18c   :  { %v799_v9 = vsel %vm133_vm3, %v793_v1, -1e+30 }
 0x18d   :  { %v1259_v4 = vsel %vm132_vm1, %v789_v2, -1e+30  ;;  %v803_v10 = vsel %vm153_vm2, %v799_v9, -inf }
 0x18e   :  { %v800_v8 = vsel %vm153_vm2, %v1259_v4, -inf }
 0x18f   :  { %584 = vmax.xlane.f32.xlu1 %v583_v6  ;;  %801 = vmax.xlane.f32.xlu0 %v800_v8 }
 0x193   :  { %804 = vmax.xlane.f32.xlu1 %v803_v10 }
 0x210   :  { %v156_v11 = vpop.xlane.xlu0 %155 }
 0x211   :  { %v160_v12 = vsub.f32 %v151_v44, %v156_v11 }
 0x213   :  { %v162_v13 = vmul.f32 1.442695, %v160_v12 }
 0x214   :  { %v159_v14 = vpop.xlane.xlu1 %158  ;;  %v362_v42 = vpop.xlane.xlu0 %361 }
 0x215   :  { %1103 = vpow2.f32 %v162_v13  ;;  %v161_v15 = vsub.f32 %v152_v54, %v159_v14  ;;  %v366_v44 = vsub.f32 %v1238_v51, %v362_v42 }
 0x217   :  { %v164_v16 = vmul.f32 1.442695, %v161_v15 }
 0x218   :  { %v365_v17 = vpop.xlane.xlu1 %364  ;;  %v582_v43 = vpop.xlane.xlu0 %581 }
 0x219   :  { %1105 = vpow2.f32 %v164_v16  ;;  %v367_v18 = vsub.f32 %v359_v59, %v365_v17  ;;  %v586_v47 = vsub.f32 %v1250_v61, %v582_v43 }
 0x21b   :  { %v370_v19 = vmul.f32 1.442695, %v367_v18  ;;  %v588_v49 = vmul.f32 1.442695, %v586_v47 }
 0x21c   :  { %v585_v20 = vpop.xlane.xlu1 %584  ;;  %v802_v48 = vpop.xlane.xlu0 %801 }
 0x21d   :  { %1107 = vpow2.f32 %v370_v19  ;;  %v587_v21 = vsub.f32 %v579_v3, %v585_v20  ;;  %v806_v50 = vsub.f32 %v1259_v4, %v802_v48 }
 0x21f   :  { %v1104_v22 = vpop.eup %1103  ;;  %v590_v23 = vmul.f32 1.442695, %v587_v21  ;;  %v808_v51 = vmul.f32 1.442695, %v806_v50 }
 0x220   :  { %v805_v24 = vpop.xlane.xlu1 %804  ;;  %v1268_v25 = vmul.f32 %v1104_v22, %v1225_v39 }
 0x221   :  { %1109 = vpow2.f32 %v590_v23  ;;  %v807_v26 = vsub.f32 %v799_v9, %v805_v24 }
 0x222   :  { %v168_v27 = vsel %vm153_vm2, %v1268_v25, 0.0 }
 0x223   :  { %v1106_v28 = vpop.eup %1105  ;;  %v810_v29 = vmul.f32 1.442695, %v807_v26  ;;  %169 = vadd.xlane.f32.xlu0 %v168_v27 }
 0x224   :  { %v1273_v30 = vmul.f32 %v1106_v28, %v1233_v45 }
 0x225   :  { %1111 = vpow2.f32 %v810_v29 }
 0x226   :  { %v171_v31 = vsel %vm153_vm2, %v1273_v30, 0.0 }
 0x227   :  { %v1108_v32 = vpop.eup %1107  ;;  %172 = vadd.xlane.f32.xlu1 %v171_v31 }
 0x228   :  { %v1278_v33 = vmul.f32 %v1108_v32, %v1233_v45 }
 0x22a   :  { %v377_v34 = vsel %vm153_vm2, %v1278_v33, 0.0 }
 0x22b   :  { %v1110_v35 = vpop.eup %1109  ;;  %378 = vadd.xlane.f32.xlu1 %v377_v34 }
 0x22c   :  { %v1283_v36 = vmul.f32 %v1110_v35, %v1233_v45 }
 0x22e   :  { %v597_v37 = vsel %vm153_vm2, %v1283_v36, 0.0 }
 0x22f   :  { %v1112_v38 = vpop.eup %1111  ;;  %598 = vadd.xlane.f32.xlu1 %v597_v37 }
 0x230   :  { %v1288_v40 = vmul.f32 %v1112_v38, %v1233_v45  ;;  %v368_v45 = vmul.f32 1.442695, %v366_v44 }
 0x232   :  { %v817_v41 = vsel %vm153_vm2, %v1288_v40, 0.0  ;;  %1113 = vpow2.f32 %v368_v45 }
 0x233   :  { %818 = vadd.xlane.f32.xlu1 %v817_v41  ;;  %1115 = vpow2.f32 %v588_v49 }
 0x234   :  { %1117 = vpow2.f32 %v808_v51 }
 0x239   :  { %388 = vrot.lane.b32.xlu0 %v1188_v5, %s1135_s1 }
 0x23c   :  { %v1114_v52 = vpop.eup %1113 }
 0x23d   :  { %v1309_v53 = vmul.f32 %v1114_v52, %v1225_v39  ;;  %v1116_v54 = vpop.eup %1115 }
 0x23e   :  { %v1314_v56 = vmul.f32 %v1116_v54, %v1225_v39  ;;  %v1118_v57 = vpop.eup %1117 }
 0x23f   :  { %v374_v55 = vsel %vm153_vm2, %v1309_v53, 0.0  ;;  %v1319_v59 = vmul.f32 %v1118_v57, %v1225_v39 }
 0x240   :  { %v594_v58 = vsel %vm153_vm2, %v1314_v56, 0.0 }
 0x241   :  { %v814_v60 = vsel %vm153_vm2, %v1319_v59, 0.0 }
 0x244   :  { %464 = vrot.lane.b32.xlu1 %v1195_v7, %s1135_s1 }
 0x248   :  { %608 = vrot.lane.b32.xlu1 %v1188_v5, %s1138_s15 }
 0x24c   :  { %684 = vrot.lane.b32.xlu1 %v1195_v7, %s1138_s15 }
 0x250   :  { %904 = vrot.lane.b32.xlu1 %v1195_v7, %s1139_s16 }
 0x258   :  { %375 = vadd.xlane.f32.xlu0 %v374_v55 }
 0x25c   :  { %595 = vadd.xlane.f32.xlu0 %v594_v58 }
 0x260   :  { %815 = vadd.xlane.f32.xlu0 %v814_v60 }
 0x276   :  { %828 = vrot.lane.b32.xlu0 %v1188_v5, %s1139_s16 }
 0x2b0   :  { %v170_v61 = vpop.xlane.xlu0 %169 }
 0x2b1   :  { %vm174_vm5 = vcmp.eq.f32.partialorder %v170_v61, 0.0 }
 0x2b2   :  { %v176_v62 = vsel %vm174_vm5, 1.0, %v170_v61 }
 0x2b3   :  { %1119 = vrcp.f32 %v176_v62 }
 0x2b4   :  { %v173_v63 = vpop.xlane.xlu1 %172  ;;  %v389_v11 = vpop.permute.xlu0 %388 }
 0x2b5   :  { %vm175_vm6 = vcmp.eq.f32.partialorder %v173_v63, 0.0 }
 0x2b6   :  { %v177_v0 = vsel %vm175_vm6, 1.0, %v173_v63 }
 0x2b7   :  { %1121 = vrcp.f32 %v177_v0 }
 0x2b8   :  { %v379_v1 = vpop.xlane.xlu1 %378 }
 0x2b9   :  { %vm381_vm7 = vcmp.eq.f32.partialorder %v379_v1, 0.0 }
 0x2ba   :  { %v383_v2 = vsel %vm381_vm7, 1.0, %v379_v1 }
 0x2bb   :  { %1123 = vrcp.f32 %v383_v2 }
 0x2bc   :  { %v599_v39 = vpop.xlane.xlu1 %598 }
 0x2bd   :  { %v1120_v3 = vpop.eup %1119  ;;  %vm601_vm8 = vcmp.eq.f32.partialorder %v599_v39, 0.0 }
 0x2be   :  { %v603_v4 = vsel %vm601_vm8, 1.0, %v599_v39  ;;  %v180_v6 = vmul.f32 %v1120_v3, %v1268_v25 }
 0x2bf   :  { %1125 = vrcp.f32 %v603_v4 }
 0x2c0   :  { %v819_v5 = vpop.xlane.xlu1 %818  ;;  %1046 = vmatmul.mubr.msk.f32.vlgmr.msra.gmra.mrb[0].mxu1 %vm182_vm9, %v180_v6 }
 0x2c1   :  { %v1122_v8 = vpop.eup %1121  ;;  %vm821_vm10 = vcmp.eq.f32.partialorder %v819_v5, 0.0  ;;  %1049 = vmatpush3.msra.mxu1 %v1195_v7  ;;  %1050 = vmatprep.mubr.msk.f32.mxu1 %vm1137_vm4, %v1136_v46 }
 0x2c2   :  { %v823_v9 = vsel %vm821_vm10, 1.0, %v819_v5  ;;  %1053 = vmatprep.subr.mxu1 %v1136_v46  ;;  %v181_v10 = vmul.f32 %v1122_v8, %v1273_v30 }
 0x2c3   :  { %1127 = vrcp.f32 %v823_v9 }
 0x2c4   :  { %v465_v12 = vpop.permute.xlu1 %464  ;;  %1051 = vmatmul.mubr.msk.f32.vlgmr.msra.gmra.mrb[2].mxu1 %vm182_vm9, %v181_v10 }
 0x2c5   :  { %v1124_v13 = vpop.eup %1123  ;;  %1054 = vmatpush3.msra.mxu1 %v389_v11  ;;  %1059 = vmatpush3.msra.mxu0 %v465_v12 }
 0x2c6   :  { %v387_v14 = vmul.f32 %v1124_v13, %v1278_v33  ;;  %1068 = vmatprep.subr.mxu0 %v1136_v46  ;;  %1055 = vmatprep.mubr.msk.f32.mxu1 %vm1137_vm4, %v1136_v46 }
 0x2c7   :  { %1063 = vmatprep.subr.mxu1 %v1136_v46 }
 0x2c8   :  { %1061 = vmatmul.mubr.msk.f32.vlgmr.msra.gmra.mrb[2].mxu0 %vm182_vm9, %v387_v14  ;;  %v609_v7 = vpop.permute.xlu1 %608 }
 0x2c9   :  { %v1126_v15 = vpop.eup %1125  ;;  %1070 = vmatprep.mubr.msk.f32.mxu0 %vm1137_vm4, %v1136_v46 }
 0x2ca   :  { %v607_v17 = vmul.f32 %v1126_v15, %v1283_v36 }
 0x2cc   :  { %v685_v16 = vpop.permute.xlu1 %684 }
 0x2cd   :  { %v1128_v18 = vpop.eup %1127  ;;  %1069 = vmatpush3.msra.mxu0 %v685_v16 }
 0x2ce   :  { %1071 = vmatmul.mubr.msk.f32.vlgmr.msra.gmra.mrb[4].mxu0 %vm182_vm9, %v607_v17  ;;  %1078 = vmatprep.subr.mxu0 %v1136_v46  ;;  %v827_v20 = vmul.f32 %v1128_v18, %v1288_v40 }
 0x2cf   :  { %1080 = vmatprep.mubr.msk.f32.mxu0 %vm1137_vm4, %v1136_v46 }
 0x2d0   :  { %v905_v19 = vpop.permute.xlu1 %904 }
 0x2d1   :  { %1079 = vmatpush3.msra.mxu0 %v905_v19 }
 0x2d2   :  { %1081 = vmatmul.mubr.msk.f32.vlgmr.msra.gmra.mrb[6].mxu0 %vm182_vm9, %v827_v20 }
 0x2e5   :  { %v376_v21 = vpop.xlane.xlu0 %375 }
 0x2e6   :  { %vm380_vm11 = vcmp.eq.f32.partialorder %v376_v21, 0.0 }
 0x2e7   :  { %v382_v22 = vsel %vm380_vm11, 1.0, %v376_v21 }
 0x2e8   :  { %1129 = vrcp.f32 %v382_v22 }
 0x2e9   :  { %v596_v23 = vpop.xlane.xlu0 %595 }
 0x2ea   :  { %vm600_vm12 = vcmp.eq.f32.partialorder %v596_v23, 0.0 }
 0x2eb   :  { %v602_v24 = vsel %vm600_vm12, 1.0, %v596_v23 }
 0x2ec   :  { %1131 = vrcp.f32 %v602_v24 }
 0x2ed   :  { %v816_v25 = vpop.xlane.xlu0 %815 }
 0x2ee   :  { %vm820_vm13 = vcmp.eq.f32.partialorder %v816_v25, 0.0 }
 0x2ef   :  { %v822_v26 = vsel %vm820_vm13, 1.0, %v816_v25 }
 0x2f0   :  { %1133 = vrcp.f32 %v822_v26 }
 0x2f1   :  { %v829_v30 = vpop.permute.xlu0 %828 }
 0x2f2   :  { %v1130_v27 = vpop.eup %1129 }
 0x2f3   :  { %v386_v28 = vmul.f32 %v1130_v27, %v1309_v53 }
 0x2f5   :  { %1056 = vmatmul.mubr.msk.f32.vlgmr.msra.gmra.mrb[4].mxu1 %vm182_vm9, %v386_v28 }
 0x2f6   :  { %v1132_v29 = vpop.eup %1131  ;;  %1064 = vmatpush3.msra.mxu1 %v609_v7  ;;  %1065 = vmatprep.mubr.msk.f32.mxu1 %vm1137_vm4, %v1136_v46 }
 0x2f7   :  { %1073 = vmatprep.subr.mxu1 %v1136_v46  ;;  %v606_v31 = vmul.f32 %v1132_v29, %v1314_v56 }
 0x2f9   :  { %1066 = vmatmul.mubr.msk.f32.vlgmr.msra.gmra.mrb[6].mxu1 %vm182_vm9, %v606_v31 }
 0x2fa   :  { %v1134_v32 = vpop.eup %1133  ;;  %1074 = vmatpush3.msra.mxu1 %v829_v30  ;;  %1075 = vmatprep.mubr.msk.f32.mxu1 %vm1137_vm4, %v1136_v46 }
 0x2fb   :  { %v826_v33 = vmul.f32 %v1134_v32, %v1319_v59 }
 0x2fd   :  { %1076 = vmatmul.mubr.msk.f32.vlgmr.msra.gmra.mrb[8].mxu1 %vm182_vm9, %v826_v33 }
 0x393   :  { %v252_v34 = vpop.f32.mrb[0].mxu1 }
 0x394   :  { %329 = vst.msk [vmem:[%s1389_s5] sm:$0x7] %vm153_vm2, %v252_v34  ;;  %v1047_v35 = vpop.f32.mrb[1].mxu1 }
 0x397   :  { %v325_v36 = vpop.f32.mrb[2].mxu1 }
 0x398   :  { %330 = vst.msk [vmem:[%s1389_s5 + $0x4] sm:$0x7] %vm153_vm2, %v325_v36  ;;  %v1052_v37 = vpop.f32.mrb[3].mxu1 }
 0x39b   :  { %v536_v38 = vpop.f32.mrb[2].mxu0 }
 0x39c   :  { %544 = vrot.lane.b32.xlu1 %v536_v38, %s1140_s21  ;;  %v1062_v40 = vpop.f32.mrb[3].mxu0 }
 0x3a1   :  { %v756_v41 = vpop.f32.mrb[4].mxu0 }
 0x3a2   :  { %764 = vrot.lane.b32.xlu1 %v756_v41, %s1141_s22  ;;  %v1072_v42 = vpop.f32.mrb[5].mxu0 }
 0x3a5   :  { %v976_v43 = vpop.f32.mrb[6].mxu0 }
 0x3a6   :  { %984 = vrot.lane.b32.xlu1 %v976_v43, %s1142_s23  ;;  %v1082_v44 = vpop.f32.mrb[7].mxu0 }
 0x3c8   :  { %v460_v46 = vpop.f32.mrb[4].mxu1 }
 0x3c9   :  { %542 = vrot.lane.b32.xlu0 %v460_v46, %s1140_s21  ;;  %v1057_v45 = vpop.f32.mrb[5].mxu1 }
 0x3cc   :  { %v680_v47 = vpop.f32.mrb[6].mxu1 }
 0x3cd   :  { %762 = vrot.lane.b32.xlu0 %v680_v47, %s1141_s22  ;;  %v1067_v48 = vpop.f32.mrb[7].mxu1 }
 0x3d0   :  { %v900_v49 = vpop.f32.mrb[8].mxu1 }
 0x3d1   :  { %982 = vrot.lane.b32.xlu0 %v900_v49, %s1142_s23  ;;  %v1077_v50 = vpop.f32.mrb[9].mxu1 }
 0x40e   :  { %v545_v51 = vpop.permute.xlu1 %544 }
 0x40f   :  { %550 = vst.msk [vmem:[%s1389_s5 + $0x4] sm:$0x7] %vm548_vm14, %v545_v51 }
 0x414   :  { %v765_v52 = vpop.permute.xlu1 %764 }
 0x415   :  { %770 = vst.msk [vmem:[%s1389_s5 + $0x4] sm:$0x7] %vm768_vm15, %v765_v52 }
 0x418   :  { %v985_v53 = vpop.permute.xlu1 %984 }
 0x419   :  { %990 = vst.msk [vmem:[%s1389_s5 + $0x4] sm:$0x7] %vm988_vm0, %v985_v53 }
 0x43b   :  { %v543_v54 = vpop.permute.xlu0 %542 }
 0x43c   :  { %549 = vst.msk [vmem:[%s1389_s5] sm:$0x7] %vm548_vm14, %v543_v54 }
 0x43f   :  { %v763_v55 = vpop.permute.xlu0 %762 }
 0x440   :  { %769 = vst.msk [vmem:[%s1389_s5] sm:$0x7] %vm768_vm15, %v763_v55 }
 0x443   :  { %v983_v56 = vpop.permute.xlu0 %982 }
 0x444   :  { %989 = vst.msk [vmem:[%s1389_s5] sm:$0x7] %vm988_vm0, %v983_v56 }

// kernel: forward_impl.7
= control target key start
LH: loop header
LB: loop body
LE: loop exit
PB: predicated region body
PF: predicated region fallthrough
CT: control target
= control target key end

     0   :  { %13 = vsyncpa [#allocation7], 0  ;;  %v55_v2 = vlaneseq  ;;  %v1657_v5 = vmov 0.0|0.0   ;;  %vm1658_vm0 = vmmov 0   ;;  %v1659_v10 = vmov 0.0   ;;  %s2044_s0 = inlined_call_operand.vmem [shape: f32[3,2,32], index: 0, kind: input, shape index: {}]   ;;  %s2045_s1 = inlined_call_operand.vmem [shape: f32[2,32,128], index: 1, kind: input, shape index: {}]   ;;  %s2046_s2 = inlined_call_operand.vmem [shape: f32[2,16,64], index: 2, kind: input, shape index: {}]   ;;  %s2047_s3 = inlined_call_operand.vmem [shape: f32[2,16,64], index: 3, kind: input, shape index: {}]   ;;  %s2048_s4 = inlined_call_operand.vmem [shape: f32[2,1,128], index: 4, kind: input, shape index: {}]   ;;  %s2049_s5 = inlined_call_operand.vmem [shape: f32[32,32], index: 5, kind: input, shape index: {}]   ;;  %s2050_s6 = inlined_call_operand.vmem [shape: f32[1,32], index: 6, kind: input, shape index: {}]   ;;  %s2051_s7 = inlined_call_operand.vmem [shape: f32[32,4], index: 7, kind: input, shape index: {}]   ;;  %s2052_s8 = inlined_call_operand.hbm [shape: f32[2,32], index: 8, kind: output, shape index: {}]  }
   0x1   :  { %v1731_v0 = vld [vmem:[%s2046_s2] sm:$0xff]  ;;  %v1736_v1 = vld [vmem:[%s2046_s2 + $0x8] sm:$0xff]  ;;  %1360 = vmatprep.subr.bf16.mxu0 %v1657_v5  ;;  %v35_v8 = vld [vmem:[%s2045_s1 + $0x10] sm:$0xff]  ;;  %1296 = vmatprep.mubr.msk.f32.mxu0 %vm1658_vm0, %v1659_v10  ;;  %v1660_v11 = vmov 1983009808   ;;  %vm67_vm1 = vcmask 261120  }
   0x2   :  { %v1741_v3 = vld [vmem:[%s2047_s3] sm:$0xff]  ;;  %v1746_v4 = vld [vmem:[%s2047_s3 + $0x8] sm:$0xff]  ;;  %v36_v9 = vld [vmem:[%s2045_s1 + $0x18] sm:$0xff]  ;;  %v53_v12 = vunpack.c.l.s4 %v1660_v11  ;;  %v56_v13 = vshrl.u32 %v55_v2, 7  ;;  %v1781_v31 = vmov 0.0   ;;  %v1783_v32 = vmov 0.0  }
   0x3   :  { %v33_v6 = vld [vmem:[%s2045_s1] sm:$0xff]  ;;  %v34_v7 = vld [vmem:[%s2045_s1 + $0x8] sm:$0xff]  ;;  %v1364_v19 = vpack.c.bf16 %v36_v9, %v35_v8  ;;  %v1785_v33 = vmov 0.0   ;;  %v1787_v34 = vmov 0.0  }
   0x4   :  { %v1361_v14 = vpack.c.bf16 %v34_v7, %v33_v6  ;;  %v30_v15 = vld [vmem:[%s2044_s0] sm:$0x3]  ;;  %v31_v16 = vld [vmem:[%s2044_s0 + $0x2] sm:$0x3]  ;;  %v54_v18 = vunpack.c.0.s8 %v53_v12 }
   0x5   :  { %v51_v17 = vcombine.low %v30_v15, %v31_v16  ;;  %v1223_v21 = vld.sshfl [vmem:[%s2044_s0 + $0x4] sm:$0x3 pattern:$0x76325410]  ;;  %v1222_v24 = vld [vmem:[%s2048_s4] ss:$0 sm:$0xff] }
   0x6   :  { %1362 = vmatpush3.bf16.msra.mxu0 %v1361_v14  ;;  %v1770_v20 = vsub.s32 %v54_v18, %v56_v13  ;;  %s1789_s0 = smov 0  }
   0x7   :  { %1363 = vmatprep.subr.bf16.mxu0 %v1657_v5 }
   0x8   :  { %v58_v22 = vrot.slane %v51_v17, %v1770_v20 }
   0xa   :  { %1365 = vmatpush3.bf16.msra.mxu0 %v1364_v19  ;;  %v66_v23 = vcombine.low %v58_v22, %v1223_v21 }
   0xd   :  { %1297 = vmatmul.mubr.msk.f32.vlgmr.msra.gmra.mrb[0].mxu0 %vm67_vm1, %v66_v23 }
  0xe0   :  { %v136_v25 = vpop.f32.mrb[0].mxu0 }
  0xe1   :  { %v137_v26 = vadd.f32 %v1222_v24, %v136_v25  ;;  %v1298_v27 = vpop.f32.mrb[1].mxu0 }
  0xe3   :  { %v141_v28 = vcombine.high %v137_v26, %v137_v26  ;;  %v148_v29 = vrot.slane %v137_v26, %v1770_v20  ;;  %1225 = vst.sshfl [vmem:[#allocation2] sm:$0x3 pattern:$0x76325410] %v137_v26 }
  0xe5   :  { %v156_v30 = vcombine.high %v148_v29, %v148_v29  ;;  %1226 = vst.sshfl [vmem:[#allocation2 + $0x4] sm:$0x3 pattern:$0x76325410] %v141_v28 }
  0xe7   :  { %161 = vst [vmem:[#allocation2 + $0x2] sm:$0x3] %v156_v30 }
  0xe8 LB: > { %v1370_v35 = vpack.c.bf16 %v1746_v4, %v1741_v3  ;;  %v1661_v36 = vmov 0.0|0.0   ;;  %s1662_s29 = smov 16   ;;  %v1367_v37 = vpack.c.bf16 %v1736_v1, %v1731_v0  ;;  %vm1663_vm2 = vmmov 0   ;;  %s1665_s30 = smov 80   ;;  %s1635_s0 = sphi %s1789_s0, %s168_s0   ;;  %v1631_v34 = vphi %v1787_v34, %v276_v34   ;;  %v1627_v33 = vphi %v1785_v33, %v270_v33   ;;  %v1623_v32 = vphi %v1783_v32, %v391_v32   ;;  %v1619_v31 = vphi %v1781_v31, %v385_v31  }
  0xe9   : > { %1369 = vmatprep.subr.bf16.mxu1 %v1661_v36  ;;  %1366 = vmatprep.subr.bf16.mxu0 %v1661_v36  ;;  %v1664_v38 = vmov 0.0   ;;  %vm179_vm3 = vcmask 130048   ;;  %s1227_s9 = sshll.u32 %s1635_s0, 1  ;;  %s1666_s10 = smov 64   ;;  %vm282_vm4 = vcmask 123904  }
  0xea   : > { %289 = vrot.lane.b32.xlu0 %v1623_v32, %s1662_s29  ;;  %1371 = vmatpush3.bf16.msra.mxu1 %v1370_v35  ;;  %s174_s11 = scalar_lea.vmem [#allocation2], %s1227_s9  ;;  %s1667_s12 = smov 96  }
  0xeb   : > { %1310 = vmatprep.mubr.msk.f32.mxu1 %vm1663_vm2, %v1664_v38  ;;  %1303 = vmatprep.mubr.msk.f32.mxu0 %vm1663_vm2, %v1664_v38  ;;  %s284_s13 = ssub.s32 2, %s1635_s0  ;;  %s1668_s16 = smov 32  }
  0xec   : > { %1368 = vmatpush3.bf16.msra.mxu0 %v1367_v37  ;;  %s1814_s14 = sshll.u32 %s284_s13, 1  ;;  %s281_s17 = scalar_lea.vmem [#allocation3], %s1227_s9 }
  0xed   : > { %s286_s15 = scalar_lea.vmem [#allocation2], %s1814_s14  ;;  %s396_s18 = scalar_lea.vmem [#allocation4], %s1814_s14 }
  0xee   : > { %177 = vrot.lane.b32.xlu0 %v1631_v34, %s1665_s30  ;;  %v175_v43 = vld [vmem:[%s174_s11] sm:$0x3]  ;;  %s168_s0 = sadd.s32 1, %s1635_s0  }
  0xef   : > { %v287_v50 = vld [vmem:[%s286_s15] sm:$0x3]  ;;  %p165_p0 = scmp.ge.s32.totalorder %s168_s0, 3  }
  0xf0   :  { %1372 = vmatprep.subr.bf16.mxu0 (%p165_p0), %v1657_v5  ;;  %s1669_s19 = smov (%p165_p0), 16   ;;  %v1849_v0 = vld [vmem:[%s2046_s2 + $0x10] sm:$0xff] (%p165_p0)  ;;  %v1854_v1 = vld [vmem:[%s2046_s2 + $0x18] sm:$0xff] (%p165_p0)  ;;  %v1233_v23 = vld [vmem:[%s2045_s1 + $0x20] sm:$0xff] (%p165_p0)  ;;  %vm420_vm5 = vcmask (%p165_p0), 255104  }
  0xf1   :  { %v1860_v3 = vld [vmem:[%s2047_s3 + $0x10] sm:$0xff] (%p165_p0)  ;;  %v1865_v4 = vld [vmem:[%s2047_s3 + $0x18] sm:$0xff] (%p165_p0)  ;;  %v1234_v24 = vld [vmem:[%s2045_s1 + $0x28] sm:$0xff] (%p165_p0) }
  0xf2   :  { %v1235_v25 = vld [vmem:[%s2045_s1 + $0x30] sm:$0xff] (%p165_p0)  ;;  %v1236_v26 = vld [vmem:[%s2045_s1 + $0x38] sm:$0xff] (%p165_p0)  ;;  %v1373_v27 = vpack.c.bf16 (%p165_p0), %v1234_v24, %v1233_v23  ;;  %v1242_v38 = vld [vmem:[%s2048_s4 + $0x1] ss:$0 sm:$0xff] (%p165_p0) }
  0xf3   :  { %v1376_v28 = vpack.c.bf16 (%p165_p0), %v1236_v26, %v1235_v25 }
 0x15c   : > { %v290_v39 = vpop.permute.xlu0 %289 }
 0x15d   : > { %1311 = vmatmul.mubr.msk.f32.vlgmr.msra.gmra.mrb[0].mxu1 %vm179_vm3, %v290_v39 }
 0x160   : > { %v178_v40 = vpop.permute.xlu0 %177 }
 0x161   : > { %1304 = vmatmul.mubr.msk.f32.vlgmr.msra.gmra.mrb[0].mxu0 %vm179_vm3, %v178_v40 }
 0x162   :  { %1321 = vmatprep.mubr.msk.f32.mxu0 (%p165_p0), %vm1658_vm0, %v1659_v10  ;;  %1374 = vmatpush3.bf16.msra.mxu0 (%p165_p0), %v1373_v27 }
 0x163   :  { %1375 = vmatprep.subr.bf16.mxu0 (%p165_p0), %v1657_v5 }
 0x166   :  { %1377 = vmatpush3.bf16.msra.mxu0 (%p165_p0), %v1376_v28 }
 0x230   : > { %v359_v41 = vpop.f32.mrb[0].mxu1 }
 0x231   : > { %364 = vrot.lane.b32.xlu1 %v359_v41, %s1666_s10  ;;  %v1312_v42 = vpop.f32.mrb[1].mxu1 }
 0x234   : > { %v248_v44 = vpop.f32.mrb[0].mxu0 }
 0x235   : > { %v252_v45 = vadd.f32 %v248_v44, %v175_v43  ;;  %v1305_v46 = vpop.f32.mrb[1].mxu0 }
 0x236   :  { %v1892_v46 = vmov (%p165_p0), 0.0  }
 0x237   : > { %1502 = vtanh.f32 %v252_v45  ;;  %v1229_v48 = vmul.f32 -1.442695, %v252_v45  ;;  %v1890_v45 = vmov (%p165_p0), 0.0  }
 0x239   : > { %1504 = vpow2.f32 %v1229_v48  ;;  %v1896_v48 = vmov (%p165_p0), 0.0  }
 0x241   : > { %v1503_v47 = vpop.eup %1502 }
 0x242   : > { %262 = vrot.lane.b32.xlu1 %v1503_v47, %s1667_s12  ;;  %v1894_v47 = vmov (%p165_p0), 0.0  }
 0x243   : > { %v1505_v49 = vpop.eup %1504 }
 0x244   : > { %v256_v52 = vadd.f32 1.0, %v1505_v49 }
 0x2a3   : > { %v365_v51 = vpop.permute.xlu1 %364 }
 0x2a4   : > { %v367_v53 = vadd.f32 %v365_v51, %v287_v50 }
 0x2a6   : > { %1506 = vtanh.f32 %v367_v53  ;;  %v1232_v58 = vmul.f32 -1.442695, %v367_v53 }
 0x2a7   : > { %1508 = vrcp.f32 %v256_v52 }
 0x2a8   : > { %1510 = vpow2.f32 %v1232_v58 }
 0x2b0   : > { %v1507_v54 = vpop.eup %1506 }
 0x2b1   : > { %377 = vrot.lane.b32.xlu0 %v1507_v54, %s1667_s12  ;;  %v1509_v55 = vpop.eup %1508  ;;  %s1898_s12 = smov (%p165_p0), 0  }
 0x2b2   : > { %v1511_v59 = vpop.eup %1510  ;;  %v260_v2 = vmul.f32 %v1627_v33, %v1509_v55 }
 0x2b3   : > { %v371_v60 = vadd.f32 1.0, %v1511_v59 }
 0x2b4   : > { %v263_v56 = vpop.permute.xlu1 %262 }
 0x2b5   : > { %v265_v57 = vmul.f32 %v1509_v55, %v263_v56  ;;  %1512 = vrcp.f32 %v371_v60 }
 0x2b7   : > { %267 = vrot.lane.b32.xlu1 %v265_v57, %s1662_s29 }
 0x2bf   : > { %v1513_v61 = vpop.eup %1512 }
 0x2c0   : > { %v375_v8 = vmul.f32 %v1619_v31, %v1513_v61 }
 0x323   : > { %v378_v62 = vpop.permute.xlu0 %377 }
 0x324   : > { %v380_v63 = vmul.f32 %v1513_v61, %v378_v62 }
 0x326   : > { %382 = vrot.lane.b32.xlu0 %v380_v63, %s1662_s29 }
 0x329   : > { %v268_v6 = vpop.permute.xlu1 %267 }
 0x32a   : > { %v270_v33 = vadd.f32 %v268_v6, %v260_v2  }
 0x32c   : > { %1514 = vtanh.f32 %v270_v33 }
 0x336   : > { %v1515_v7 = vpop.eup %1514 }
 0x337   : > { %273 = vrot.lane.b32.xlu1 %v1515_v7, %s1668_s16 }
 0x398   : > { %v383_v9 = vpop.permute.xlu0 %382 }
 0x399   : > { %v385_v31 = vadd.f32 %v383_v9, %v375_v8  }
 0x39b   : > { %1516 = vtanh.f32 %v385_v31 }
 0x3a5   : > { %v1517_v11 = vpop.eup %1516 }
 0x3a6   : > { %388 = vrot.lane.b32.xlu0 %v1517_v11, %s1668_s16 }
 0x3a9   : > { %v274_v12 = vpop.permute.xlu1 %273 }
 0x3aa   : > { %v276_v34 = vmul.f32 %v1509_v55, %v274_v12  }
 0x3ac   : > { %278 = vrot.lane.b32.xlu1 %v276_v34, %s1665_s30 }
 0x418   : > { %v389_v13 = vpop.permute.xlu0 %388 }
 0x419   : > { %v391_v32 = vmul.f32 %v1513_v61, %v389_v13  }
 0x41b   : > { %393 = vrot.lane.b32.xlu0 %v391_v32, %s1662_s29 }
 0x41e   : > { %v279_v14 = vpop.permute.xlu1 %278 }
 0x41f   : > { %283 = vst.msk [vmem:[%s281_s17] sm:$0x3] %vm282_vm4, %v279_v14 }
 0x426   :  { %v398_v19 = vld [vmem:[#allocation3] sm:$0x3] (%p165_p0)  ;;  %v399_v21 = vld [vmem:[#allocation3 + $0x2] sm:$0x3] (%p165_p0)  ;;  %v400_v22 = vld [vmem:[#allocation3 + $0x4] sm:$0x3] (%p165_p0) }
 0x427   :  { %402 = vst.msk [vmem:[#allocation5] sm:$0x3] (%p165_p0), %vm282_vm4, %v398_v19  ;;  %403 = vst.msk [vmem:[#allocation5 + $0x2] sm:$0x3] (%p165_p0), %vm282_vm4, %v399_v21 }
 0x428   :  { %404 = vst.msk [vmem:[#allocation5 + $0x4] sm:$0x3] (%p165_p0), %vm282_vm4, %v400_v22 }
 0x488   :  { %167 = sbr.rel (!%p165_p0) target bundleno = 232 (0xe8), region = 78 }
 0x48d   : > { %v394_v15 = vpop.permute.xlu0 %393 }
 0x48e   : > { %397 = vst.msk [vmem:[%s396_s18] sm:$0x3] %vm282_vm4, %v394_v15 }
 0x495   :  { %v405_v16 = vld [vmem:[#allocation4] sm:$0x3]  ;;  %v406_v17 = vld [vmem:[#allocation4 + $0x2] sm:$0x3]  ;;  %v407_v18 = vld [vmem:[#allocation4 + $0x4] sm:$0x3] }
 0x496   :  { %411 = vrot.lane.b32.xlu0 %v405_v16, %s1669_s19  ;;  %415 = vrot.lane.b32.xlu1 %v407_v18, %s1669_s19 }
 0x49a   :  { %413 = vrot.lane.b32.xlu0 %v406_v17, %s1669_s19 }
 0x508   :  { %v412_v29 = vpop.permute.xlu0 %411  ;;  %v416_v30 = vpop.permute.xlu1 %415 }
 0x509   :  { %421 = vst.msk [vmem:[#allocation5] sm:$0x3] %vm420_vm5, %v412_v29  ;;  %423 = vst.msk [vmem:[#allocation5 + $0x4] sm:$0x3] %vm420_vm5, %v416_v30 }
 0x50c   :  { %v414_v31 = vpop.permute.xlu0 %413 }
 0x50d   :  { %422 = vst.msk [vmem:[#allocation5 + $0x2] sm:$0x3] %vm420_vm5, %v414_v31 }
 0x510   :  { %v424_v32 = vld [vmem:[#allocation5] sm:$0x3]  ;;  %v1243_v35 = vld.sshfl [vmem:[#allocation5 + $0x4] sm:$0x3 pattern:$0x76325410] }
 0x514   :  { %v425_v33 = vld [vmem:[#allocation5 + $0x2] sm:$0x3] }
 0x515   :  { %v449_v34 = vcombine.low %v424_v32, %v425_v33 }
 0x517   :  { %v456_v36 = vrot.slane %v449_v34, %v1770_v20 }
 0x519   :  { %v464_v37 = vcombine.low %v456_v36, %v1243_v35 }
 0x51b   :  { %1322 = vmatmul.mubr.msk.f32.vlgmr.msra.gmra.mrb[0].mxu0 %vm67_vm1, %v464_v37 }
 0x5ee   :  { %v533_v39 = vpop.f32.mrb[0].mxu0 }
 0x5ef   :  { %v534_v40 = vadd.f32 %v1242_v38, %v533_v39  ;;  %v1323_v41 = vpop.f32.mrb[1].mxu0 }
 0x5f1   :  { %v538_v42 = vcombine.high %v534_v40, %v534_v40  ;;  %v545_v43 = vrot.slane %v534_v40, %v1770_v20  ;;  %1245 = vst.sshfl [vmem:[#allocation2] sm:$0x3 pattern:$0x76325410] %v534_v40 }
 0x5f3   :  { %v553_v44 = vcombine.high %v545_v43, %v545_v43  ;;  %1246 = vst.sshfl [vmem:[#allocation2 + $0x4] sm:$0x3 pattern:$0x76325410] %v538_v42 }
 0x5f5   :  { %558 = vst [vmem:[#allocation2 + $0x2] sm:$0x3] %v553_v44 }
 0x5f6 LB: > { %v1382_v49 = vpack.c.bf16 %v1865_v4, %v1860_v3  ;;  %v1670_v50 = vmov 0.0|0.0   ;;  %s1671_s4 = smov 16   ;;  %v1379_v51 = vpack.c.bf16 %v1854_v1, %v1849_v0  ;;  %vm1672_vm6 = vmmov 0   ;;  %s1674_s13 = smov 80   ;;  %s1655_s12 = sphi %s1898_s12, %s565_s12   ;;  %v1651_v48 = vphi %v1896_v48, %v673_v48   ;;  %v1647_v47 = vphi %v1894_v47, %v667_v47   ;;  %v1643_v46 = vphi %v1892_v46, %v787_v46   ;;  %v1639_v45 = vphi %v1890_v45, %v781_v45  }
 0x5f7   : > { %1381 = vmatprep.subr.bf16.mxu1 %v1670_v50  ;;  %1378 = vmatprep.subr.bf16.mxu0 %v1670_v50  ;;  %v1673_v52 = vmov 0.0   ;;  %s1247_s14 = sshll.u32 %s1655_s12, 1  ;;  %s1675_s15 = smov 64  }
 0x5f8   : > { %685 = vrot.lane.b32.xlu0 %v1643_v46, %s1671_s4  ;;  %1383 = vmatpush3.bf16.msra.mxu1 %v1382_v49  ;;  %s571_s16 = scalar_lea.vmem [#allocation2], %s1247_s14  ;;  %s1676_s17 = smov 96  }
 0x5f9   : > { %1335 = vmatprep.mubr.msk.f32.mxu1 %vm1672_vm6, %v1673_v52  ;;  %1328 = vmatprep.mubr.msk.f32.mxu0 %vm1672_vm6, %v1673_v52  ;;  %s680_s18 = ssub.s32 2, %s1655_s12  ;;  %s1677_s22 = smov 32  }
 0x5fa   : > { %1380 = vmatpush3.bf16.msra.mxu0 %v1379_v51  ;;  %s1923_s20 = sshll.u32 %s680_s18, 1  ;;  %s678_s23 = scalar_lea.vmem [#allocation3], %s1247_s14 }
 0x5fb   : > { %s682_s21 = scalar_lea.vmem [#allocation2], %s1923_s20  ;;  %s792_s24 = scalar_lea.vmem [#allocation4], %s1923_s20 }
 0x5fc   : > { %574 = vrot.lane.b32.xlu0 %v1651_v48, %s1674_s13  ;;  %v572_v57 = vld [vmem:[%s571_s16] sm:$0x3]  ;;  %s565_s12 = sadd.s32 1, %s1655_s12  }
 0x5fd   : > { %v683_v2 = vld [vmem:[%s682_s21] sm:$0x3]  ;;  %p562_p1 = scmp.ge.s32.totalorder %s565_s12, 3  }
 0x5fe   :  { %1384 = vmatprep.subr.bf16.mxu0 (%p562_p1), %v1657_v5  ;;  %v821_v0 = vld [vmem:[%s2049_s5] sm:$0xff] (%p562_p1)  ;;  %v822_v1 = vld [vmem:[%s2049_s5 + $0x8] sm:$0xff] (%p562_p1)  ;;  %v823_v3 = vld [vmem:[%s2049_s5 + $0x10] sm:$0xff] (%p562_p1)  ;;  %1390 = vmatprep.subr.bf16.mxu1 (%p562_p1), %v1657_v5  ;;  %vm1021_vm7 = vcmask (%p562_p1), 254976   ;;  %vm1043_vm9 = vcmask (%p562_p1), 25600   ;;  %vm1085_vm12 = vcmask (%p562_p1), 58368  }
 0x5ff   :  { %v1385_v4 = vpack.c.bf16 (%p562_p1), %v822_v1, %v821_v0  ;;  %v824_v37 = vld [vmem:[%s2049_s5 + $0x18] sm:$0xff] (%p562_p1)  ;;  %v924_v51 = vld [vmem:[%s2051_s7] sm:$0xff] (%p562_p1)  ;;  %v925_v52 = vld [vmem:[%s2051_s7 + $0x8] sm:$0xff] (%p562_p1)  ;;  %vm1129_vm13 = vcmask (%p562_p1), 189568   ;;  %vm1107_vm14 = vcmask (%p562_p1), 123968   ;;  %vm1151_vm15 = vcmask (%p562_p1), 255168  }
 0x600   :  { %v1388_v38 = vpack.c.bf16 (%p562_p1), %v824_v37, %v823_v3  ;;  %v1679_v3 = vmov (%p562_p1), 2   ;;  %v1681_v37 = vmov (%p562_p1), 3  }
 0x66a   : > { %v686_v53 = vpop.permute.xlu0 %685 }
 0x66b   : > { %1336 = vmatmul.mubr.msk.f32.vlgmr.msra.gmra.mrb[0].mxu1 %vm179_vm3, %v686_v53  ;;  %v926_v53 = vld [vmem:[%s2051_s7 + $0x10] sm:$0xff] (%p562_p1) }
 0x66c   :  { %1357 = vmatprep.mubr.msk.f32.mxu1 (%p562_p1), %vm1658_vm0, %v1659_v10 }
 0x66e   : > { %v575_v54 = vpop.permute.xlu0 %574 }
 0x66f   : > { %1329 = vmatmul.mubr.msk.f32.vlgmr.msra.gmra.mrb[0].mxu0 %vm179_vm3, %v575_v54  ;;  %v1391_v54 = vpack.c.bf16 (%p562_p1), %v925_v52, %v924_v51 }
 0x670   :  { %1346 = vmatprep.mubr.msk.f32.mxu0 (%p562_p1), %vm1658_vm0, %v1659_v10  ;;  %1386 = vmatpush3.bf16.msra.mxu0 (%p562_p1), %v1385_v4  ;;  %v1680_v4 = vmov (%p562_p1), 1  }
 0x671   :  { %1387 = vmatprep.subr.bf16.mxu0 (%p562_p1), %v1657_v5  ;;  %1392 = vmatpush3.bf16.msra.mxu1 (%p562_p1), %v1391_v54 }
 0x672   :  { %1393 = vmatprep.subr.bf16.mxu1 (%p562_p1), %v1657_v5 }
 0x674   :  { %1389 = vmatpush3.bf16.msra.mxu0 (%p562_p1), %v1388_v38 }
 0x73e   : > { %v755_v55 = vpop.f32.mrb[0].mxu1 }
 0x73f   : > { %760 = vrot.lane.b32.xlu1 %v755_v55, %s1675_s15  ;;  %v1337_v56 = vpop.f32.mrb[1].mxu1  ;;  %v927_v55 = vld [vmem:[%s2051_s7 + $0x18] sm:$0xff] (%p562_p1) }
 0x740   :  { %v1394_v56 = vpack.c.bf16 (%p562_p1), %v927_v55, %v926_v53 }
 0x742   : > { %v645_v58 = vpop.f32.mrb[0].mxu0  ;;  %1395 = vmatpush3.bf16.msra.mxu1 (%p562_p1), %v1394_v56 }
 0x743   : > { %v649_v59 = vadd.f32 %v645_v58, %v572_v57  ;;  %v1330_v60 = vpop.f32.mrb[1].mxu0  ;;  %v1253_v57 = vld [vmem:[%s2050_s6] ss:$0 sm:$0xff] (%p562_p1)  ;;  %s1682_s6 = smov (%p562_p1), [#allocation6]  }
 0x744   :  { %s1164_s7 = sshll.u32 (%p562_p1), %s1682_s6, 4  ;;  %s1165_s7 = int_to_ptr.vmem [resolvable:$true] %s1164_s7 }
 0x745   : > { %1518 = vtanh.f32 %v649_v59  ;;  %v1249_v62 = vmul.f32 -1.442695, %v649_v59  ;;  %s1553_s14 = scalar_lea.vmem (%p562_p1), %s1165_s7, 32  ;;  %p1558_p3 = scmp.lt.s32.totalorder (%p562_p1), %s1165_s7, %s1165_s7 }
 0x746   :  { %p1554_p2 = scmp.ne.s32.totalorder (%p562_p1), %s1165_s7, %s1553_s14  ;;  %p1559_p4 = scmp.lt.s32.totalorder (%p562_p1), %s1553_s14, %s1553_s14 }
 0x747   : > { %1520 = vpow2.f32 %v1249_v62  ;;  %v1678_v62 = vmov (%p562_p1), 0  }
 0x748   :  { %1535 = vset.pattern.permute.xlu0 (%p562_p1), %v1678_v62  ;;  %1534 = vset.pattern.permute.xlu1 (%p562_p1), %v1678_v62  ;;  %p1560_p5 = por (%p562_p1), %p1559_p4, %p1558_p3 }
 0x74a   :  { %p1561_p6 = pnand (%p562_p1), %p1560_p5, %p1554_p2 }
 0x74f   : > { %v1519_v61 = vpop.eup %1518 }
 0x750   : > { %659 = vrot.lane.b32.xlu1 %v1519_v61, %s1676_s17 }
 0x751   : > { %v1521_v63 = vpop.eup %1520 }
 0x752   : > { %v653_v7 = vadd.f32 1.0, %v1521_v63 }
 0x7b1   : > { %v761_v6 = vpop.permute.xlu1 %760 }
 0x7b2   : > { %v763_v8 = vadd.f32 %v761_v6, %v683_v2 }
 0x7b4   : > { %1522 = vtanh.f32 %v763_v8  ;;  %v1252_v14 = vmul.f32 -1.442695, %v763_v8 }
 0x7b5   : > { %1524 = vrcp.f32 %v653_v7 }
 0x7b6   : > { %1526 = vpow2.f32 %v1252_v14 }
 0x7be   : > { %v1523_v9 = vpop.eup %1522 }
 0x7bf   : > { %773 = vrot.lane.b32.xlu0 %v1523_v9, %s1676_s17  ;;  %v1525_v11 = vpop.eup %1524 }
 0x7c0   : > { %v1527_v15 = vpop.eup %1526  ;;  %v657_v21 = vmul.f32 %v1647_v47, %v1525_v11 }
 0x7c1   : > { %v767_v16 = vadd.f32 1.0, %v1527_v15 }
 0x7c2   : > { %v660_v12 = vpop.permute.xlu1 %659 }
 0x7c3   : > { %v662_v13 = vmul.f32 %v1525_v11, %v660_v12  ;;  %1528 = vrcp.f32 %v767_v16 }
 0x7c5   : > { %664 = vrot.lane.b32.xlu1 %v662_v13, %s1671_s4 }
 0x7cd   : > { %v1529_v17 = vpop.eup %1528 }
 0x7ce   : > { %v771_v24 = vmul.f32 %v1639_v45, %v1529_v17 }
 0x831   : > { %v774_v18 = vpop.permute.xlu0 %773 }
 0x832   : > { %v776_v19 = vmul.f32 %v1529_v17, %v774_v18 }
 0x834   : > { %778 = vrot.lane.b32.xlu0 %v776_v19, %s1671_s4 }
 0x837   : > { %v665_v22 = vpop.permute.xlu1 %664 }
 0x838   : > { %v667_v47 = vadd.f32 %v665_v22, %v657_v21  }
 0x83a   : > { %1530 = vtanh.f32 %v667_v47 }
 0x844   : > { %v1531_v23 = vpop.eup %1530 }
 0x845   : > { %670 = vrot.lane.b32.xlu1 %v1531_v23, %s1677_s22 }
 0x8a6   : > { %v779_v25 = vpop.permute.xlu0 %778 }
 0x8a7   : > { %v781_v45 = vadd.f32 %v779_v25, %v771_v24  }
 0x8a9   : > { %1532 = vtanh.f32 %v781_v45 }
 0x8b3   : > { %v1533_v26 = vpop.eup %1532 }
 0x8b4   : > { %784 = vrot.lane.b32.xlu0 %v1533_v26, %s1677_s22 }
 0x8b7   : > { %v671_v27 = vpop.permute.xlu1 %670 }
 0x8b8   : > { %v673_v48 = vmul.f32 %v1525_v11, %v671_v27  }
 0x8ba   : > { %675 = vrot.lane.b32.xlu1 %v673_v48, %s1674_s13 }
 0x926   : > { %v785_v28 = vpop.permute.xlu0 %784 }
 0x927   : > { %v787_v46 = vmul.f32 %v1529_v17, %v785_v28  }
 0x929   : > { %789 = vrot.lane.b32.xlu0 %v787_v46, %s1671_s4 }
 0x92c   : > { %v676_v29 = vpop.permute.xlu1 %675 }
 0x92d   : > { %679 = vst.msk [vmem:[%s678_s23] sm:$0x3] %vm282_vm4, %v676_v29 }
 0x934   :  { %v794_v34 = vld [vmem:[#allocation3] sm:$0x3] (%p562_p1)  ;;  %v795_v35 = vld [vmem:[#allocation3 + $0x2] sm:$0x3] (%p562_p1)  ;;  %v796_v36 = vld [vmem:[#allocation3 + $0x4] sm:$0x3] (%p562_p1) }
 0x935   :  { %797 = vst.msk [vmem:[#allocation5] sm:$0x3] (%p562_p1), %vm282_vm4, %v794_v34  ;;  %798 = vst.msk [vmem:[#allocation5 + $0x2] sm:$0x3] (%p562_p1), %vm282_vm4, %v795_v35 }
 0x936   :  { %799 = vst.msk [vmem:[#allocation5 + $0x4] sm:$0x3] (%p562_p1), %vm282_vm4, %v796_v36 }
 0x996   :  { %564 = sbr.rel (!%p562_p1) target bundleno = 1526 (0x5f6), region = 89 }
 0x99b   : > { %v790_v30 = vpop.permute.xlu0 %789 }
 0x99c   : > { %793 = vst.msk [vmem:[%s792_s24] sm:$0x3] %vm282_vm4, %v790_v30 }
 0x9a3   :  { %v800_v31 = vld [vmem:[#allocation4] sm:$0x3]  ;;  %v801_v32 = vld [vmem:[#allocation4 + $0x2] sm:$0x3]  ;;  %v802_v33 = vld [vmem:[#allocation4 + $0x4] sm:$0x3] }
 0x9a4   :  { %806 = vrot.lane.b32.xlu0 %v800_v31, %s1669_s19  ;;  %810 = vrot.lane.b32.xlu1 %v802_v33, %s1669_s19 }
 0x9a8   :  { %808 = vrot.lane.b32.xlu0 %v801_v32, %s1669_s19 }
 0xa16   :  { %v807_v39 = vpop.permute.xlu0 %806  ;;  %v811_v40 = vpop.permute.xlu1 %810 }
 0xa17   :  { %815 = vst.msk [vmem:[#allocation5] sm:$0x3] %vm420_vm5, %v807_v39  ;;  %817 = vst.msk [vmem:[#allocation5 + $0x4] sm:$0x3] %vm420_vm5, %v811_v40 }
 0xa1a   :  { %v809_v41 = vpop.permute.xlu0 %808 }
 0xa1b   :  { %816 = vst.msk [vmem:[#allocation5 + $0x2] sm:$0x3] %vm420_vm5, %v809_v41 }
 0xa1e   :  { %v1976_v10 = vld [vmem:[#allocation5] sm:$0x3]  ;;  %v1979_v43 = vld [vmem:[#allocation5 + $0x4] sm:$0x3] }
 0xa1f   :  { %v1022_v42 = vsel %vm1021_vm7, %v1976_v10, 0.0  ;;  %v849_v47 = vrot.slane %v1979_v43, %v1770_v20  ;;  %v1028_v49 = vsel %vm1021_vm7, %v1979_v43, 0.0 }
 0xa20   :  { %1023 = vadd.xlane.f32.xlu1 %v1022_v42 }
 0xa22   :  { %v1981_v44 = vld [vmem:[#allocation5 + $0x2] sm:$0x3] }
 0xa23   :  { %v1025_v45 = vsel %vm1021_vm7, %v1981_v44, 0.0  ;;  %v835_v46 = vcombine.low %v1976_v10, %v1981_v44 }
 0xa24   :  { %1026 = vadd.xlane.f32.xlu0 %v1025_v45 }
 0xa25   :  { %v842_v48 = vrot.slane %v835_v46, %v1770_v20 }
 0xa27   :  { %v850_v50 = vcombine.low %v842_v48, %v849_v47 }
 0xa28   :  { %1029 = vadd.xlane.f32.xlu0 %v1028_v49 }
 0xa29   :  { %1347 = vmatmul.mubr.msk.f32.vlgmr.msra.gmra.mrb[0].mxu0 %vm67_vm1, %v850_v50 }
 0xaad   :  { %v1024_v2 = vpop.xlane.xlu1 %1023 }
 0xaae   :  { %vm1031_vm8 = vcmp.eq.f32.partialorder %v1024_v2, 0.0 }
 0xab1   :  { %v1027_v63 = vpop.xlane.xlu0 %1026 }
 0xab2   :  { %vm1032_vm10 = vcmp.eq.f32.partialorder %v1027_v63, 0.0 }
 0xab5   :  { %v1030_v7 = vpop.xlane.xlu0 %1029 }
 0xab6   :  { %vm1033_vm11 = vcmp.eq.f32.partialorder %v1030_v7, 0.0 }
 0xafc   :  { %v919_v58 = vpop.f32.mrb[0].mxu0 }
 0xafd   :  { %v920_v59 = vadd.f32 %v1253_v57, %v919_v58  ;;  %v1348_v60 = vpop.f32.mrb[1].mxu0 }
 0xaff   :  { %1543 = vtanh.f32 %v920_v59 }
 0xb09   :  { %v1544_v61 = vpop.eup %1543 }
 0xb0a   :  { %1358 = vmatmul.mubr.msk.f32.vlgmr.msra.gmra.mrb[0].mxu1 %vm67_vm1, %v1544_v61 }
 0xbdd   :  { %v997_v6 = vpop.f32.mrb[0].mxu1 }
 0xbde   :  { %v1002_v5 = vcombine.high %v997_v6, %v997_v6  ;;  %v1009_v8 = vrot.slane %v997_v6, %v1770_v20  ;;  %v1359_v9 = vpop.f32.mrb[1].mxu1 }
 0xbe0   :  { %v1016_v11 = vrot.slane %v1002_v5, %v1770_v20  ;;  %v1017_v12 = vcombine.high %v1009_v8, %v1009_v8  ;;  %v1040_v13 = vsel %vm1031_vm8, -1e+10, %v1009_v8 }
 0xbe1   :  { %v1044_v16 = vsel %vm1043_vm9, %v1040_v13, -inf }
 0xbe2   :  { %v1041_v14 = vsel %vm1032_vm10, -1e+10, %v1017_v12  ;;  %v1042_v15 = vsel %vm1033_vm11, -1e+10, %v1016_v11 }
 0xbe3   :  { %v1045_v17 = vsel %vm1043_vm9, %v1041_v14, -inf  ;;  %v1046_v19 = vsel %vm1043_vm9, %v1042_v15, -inf }
 0xbe4   :  { %v1047_v18 = vmax.f32 %v1044_v16, %v1045_v17 }
 0xbe6   :  { %v1048_v21 = vmax.f32 %v1047_v18, %v1046_v19 }
 0xbe8   :  { %v1049_v22 = vsub.f32 %v1040_v13, %v1048_v21  ;;  %v1050_v23 = vsub.f32 %v1041_v14, %v1048_v21  ;;  %v1051_v24 = vsub.f32 %v1042_v15, %v1048_v21 }
 0xbea   :  { %v1052_v25 = vmul.f32 1.442695, %v1049_v22  ;;  %v1054_v20 = vmul.f32 1.442695, %v1050_v23  ;;  %v1056_v26 = vmul.f32 1.442695, %v1051_v24 }
 0xbec   :  { %1545 = vpow2.f32 %v1052_v25 }
 0xbed   :  { %1547 = vpow2.f32 %v1054_v20 }
 0xbee   :  { %1549 = vpow2.f32 %v1056_v26 }
 0xbf6   :  { %v1546_v27 = vpop.eup %1545 }
 0xbf7   :  { %v1548_v28 = vpop.eup %1547  ;;  %v1058_v29 = vsel %vm1043_vm9, %v1546_v27, 0.0 }
 0xbf8   :  { %v1550_v30 = vpop.eup %1549  ;;  %v1059_v31 = vsel %vm1043_vm9, %v1548_v28, 0.0 }
 0xbf9   :  { %v1060_v32 = vadd.f32 %v1059_v31, %v1058_v29  ;;  %v1061_v33 = vsel %vm1043_vm9, %v1550_v30, 0.0 }
 0xbfb   :  { %v1062_v34 = vadd.f32 %v1061_v33, %v1060_v32 }
 0xbfd   :  { %1551 = vrcp.f32 %v1062_v34 }
 0xc07   :  { %v1552_v35 = vpop.eup %1551 }
 0xc08   :  { %v1065_v36 = vmul.f32 %v1552_v35, %v1548_v28  ;;  %v1064_v0 = vmul.f32 %v1552_v35, %v1546_v27  ;;  %v1066_v1 = vmul.f32 %v1552_v35, %v1550_v30 }
 0xc0a   :  { %1074 = vperm.xlu0 %1535, %v1065_v36   ;;  %1069 = vperm.xlu1 %1534, %v1064_v0  }
 0xc0e   :  { %1541 = vset.pattern.permute.xlu0 %v1679_v3  ;;  %1536 = vset.pattern.permute.xlu1 %v1680_v4 }
 0xc0f   :  { %1123 = vperm.xlu0 %1541, %v1066_v1   ;;  %1093 = vperm.xlu1 %1536, %v1064_v0  }
 0xc13   :  { %1097 = vperm.xlu1 %1536, %v1065_v36   ;;  %1542 = vset.pattern.permute.xlu0 %v1681_v37 }
 0xc17   :  { %1537 = vset.pattern.permute.xlu1 %v1678_v62 }
 0xc18   :  { %1079 = vperm.xlu1 %1537, %v1066_v1  }
 0xc1c   :  { %1538 = vset.pattern.permute.xlu1 %v1679_v3 }
 0xc1d   :  { %1115 = vperm.xlu1 %1538, %v1064_v0  }
 0xc21   :  { %1119 = vperm.xlu1 %1538, %v1065_v36  }
 0xc25   :  { %1539 = vset.pattern.permute.xlu1 %v1680_v4 }
 0xc26   :  { %1101 = vperm.xlu1 %1539, %v1066_v1  }
 0xc2a   :  { %1540 = vset.pattern.permute.xlu1 %v1681_v37 }
 0xc2b   :  { %1137 = vperm.xlu1 %1540, %v1064_v0  }
 0xc2f   :  { %1141 = vperm.xlu1 %1540, %v1065_v36  }
 0xc33   :  { %1145 = vperm.xlu1 %1540, %v1066_v1  }
 0xc89   :  { %v1070_v38 = vpop.permute.xlu1 %1069  ;;  %v1075_v40 = vpop.permute.xlu0 %1074 }
 0xc8a   :  { %v1083_v41 = vmul.f32 %v1075_v40, %v1981_v44  ;;  %v1082_v42 = vmul.f32 %v1070_v38, %v1976_v10 }
 0xc8c   :  { %v1087_v46 = vsel %vm1085_vm12, %v1083_v41, 0.0  ;;  %v1086_v47 = vsel %vm1085_vm12, %v1082_v42, 0.0 }
 0xc8d   :  { %v1088_v50 = vadd.f32 %v1087_v46, %v1086_v47 }
 0xc8e   :  { %v1094_v39 = vpop.permute.xlu1 %1093  ;;  %v1124_v58 = vpop.permute.xlu0 %1123 }
 0xc8f   :  { %v1104_v59 = vmul.f32 %v1094_v39, %v1976_v10  ;;  %v1128_v62 = vmul.f32 %v1124_v58, %v1979_v43 }
 0xc91   :  { %v1108_v6 = vsel %vm1107_vm14, %v1104_v59, 0.0  ;;  %v1133_v11 = vsel %vm1129_vm13, %v1128_v62, 0.0 }
 0xc92   :  { %v1098_v45 = vpop.permute.xlu1 %1097 }
 0xc93   :  { %v1105_v54 = vmul.f32 %v1098_v45, %v1981_v44 }
 0xc95   :  { %v1109_v61 = vsel %vm1107_vm14, %v1105_v54, 0.0 }
 0xc96   :  { %v1110_v8 = vadd.f32 %v1109_v61, %v1108_v6 }
 0xc97   :  { %v1080_v48 = vpop.permute.xlu1 %1079 }
 0xc98   :  { %v1084_v49 = vmul.f32 %v1080_v48, %v1979_v43 }
 0xc9a   :  { %v1089_v51 = vsel %vm1085_vm12, %v1084_v49, 0.0 }
 0xc9b   :  { %v1090_v52 = vadd.f32 %v1089_v51, %v1088_v50 }
 0xc9c   :  { %v1116_v53 = vpop.permute.xlu1 %1115 }
 0xc9d   :  { %1091 = vst.msk [vmem:[#allocation6] sm:$0x3] %vm1085_vm12, %v1090_v52  ;;  %v1126_v56 = vmul.f32 %v1116_v53, %v1976_v10 }
 0xc9f   :  { %v1130_v63 = vsel %vm1129_vm13, %v1126_v56, 0.0 }
 0xca0   :  { %v1120_v55 = vpop.permute.xlu1 %1119 }
 0xca1   :  { %v1127_v57 = vmul.f32 %v1120_v55, %v1981_v44 }
 0xca3   :  { %v1131_v60 = vsel %vm1129_vm13, %v1127_v57, 0.0 }
 0xca4   :  { %v1132_v7 = vadd.f32 %v1131_v60, %v1130_v63 }
 0xca5   :  { %v1102_v2 = vpop.permute.xlu1 %1101 }
 0xca6   :  { %v1106_v5 = vmul.f32 %v1102_v2, %v1979_v43  ;;  %v1134_v13 = vadd.f32 %v1133_v11, %v1132_v7 }
 0xca8   :  { %v1111_v9 = vsel %vm1107_vm14, %v1106_v5, 0.0 }
 0xca9   :  { %v1112_v12 = vadd.f32 %v1111_v9, %v1110_v8 }
 0xcaa   :  { %v1138_v14 = vpop.permute.xlu1 %1137 }
 0xcab   :  { %1113 = vst.msk [vmem:[#allocation6] sm:$0x3] %vm1107_vm14, %v1112_v12  ;;  %v1148_v16 = vmul.f32 %v1138_v14, %v1976_v10 }
 0xcac   :  { %1135 = vst.msk [vmem:[#allocation6] sm:$0x3] %vm1129_vm13, %v1134_v13 }
 0xcad   :  { %v1152_v21 = vsel %vm1151_vm15, %v1148_v16, 0.0 }
 0xcae   :  { %v1142_v15 = vpop.permute.xlu1 %1141 }
 0xcaf   :  { %v1149_v17 = vmul.f32 %v1142_v15, %v1981_v44 }
 0xcb1   :  { %v1153_v18 = vsel %vm1151_vm15, %v1149_v17, 0.0 }
 0xcb2   :  { %v1146_v19 = vpop.permute.xlu1 %1145  ;;  %v1154_v23 = vadd.f32 %v1153_v18, %v1152_v21 }
 0xcb3   :  { %v1150_v22 = vmul.f32 %v1146_v19, %v1979_v43 }
 0xcb5   :  { %v1155_v24 = vsel %vm1151_vm15, %v1150_v22, 0.0 }
 0xcb6   :  { %v1156_v25 = vadd.f32 %v1155_v24, %v1154_v23 }
 0xcb8   :  { %1157 = vst.msk [vmem:[#allocation6] sm:$0x3] %vm1151_vm15, %v1156_v25 }
 0xcb9   :  { %1564 = shalt.err (!%p1561_p6)
}
 0xcba   :  { %s1565_s17 = scalar_lea.hbm %s2052_s8, 32 }
 0xcbb   :  { %p1566_p7 = scmp.ne.s32.totalorder %s2052_s8, %s1565_s17  ;;  %p1569_p8 = scmp.lt.u32.totalorder %s1565_s17, %s2052_s8 }
 0xcbd   :  { %p1571_p9 = pnand %p1569_p8, %p1566_p7 }
 0xcbf   :  { %1574 = shalt.err (!%p1571_p9)
}
 0xcc0   :  { %1167 = dma.vmem_to_hbm [thread:$0]  %s1165_s7, 32, %s2052_s8, [#allocation7]  }
 0xcc1   :  { %1615 = dma.done.wait [#allocation7], 32  }
 0xcc2   :  { %1616 = vsyncadd [#allocation7], 4294967264 }
 0xcc3   :  { %1171 = vsyncpa [#allocation7], 1 }

</bundles_post_ra>
